<compile_context>
chip_gen: v6e
topology: v6e:2x2x1
jax: 0.10.0
libtpu: 0.0.40
codegen_flags: <defaults>
</compile_context>

<pallas_src>
import math
import functools

import jax
import jax.numpy as jnp
from jax.experimental import pallas as pl
from jax.experimental.pallas import tpu as pltpu


# ----------------------------------------------------------------------------
# Per-generation budgets
# ----------------------------------------------------------------------------

@functools.lru_cache(maxsize=None)
def _vmem_limit_bytes():
    """Scoped-VMEM budget: ~3/4 of physical VMEM (v7x 64 MiB -> 48; v5e/v6e 128 -> 96)."""
    try:
        cap = pltpu.get_tpu_info().vmem_capacity_bytes
        return int(min(cap * 3 // 4, 96 * 1024 * 1024))
    except Exception:
        return 48 * 1024 * 1024  # safe on every generation


def _tile(n, unit, cap):
    """Largest multiple of `unit` dividing n (<= cap); otherwise the full extent n."""
    best = None
    t = unit
    while t <= min(n, cap):
        if n % t == 0:
            best = t
        t += unit
    return best if best is not None else n


def _wspec(shape, single_buffer):
    """Constant-index (resident) weight spec; optionally single-buffered (Buffered(1))."""
    nd = len(shape)
    idx = lambda *args, _nd=nd: (0,) * _nd
    if single_buffer and hasattr(pl, "Buffered"):
        try:
            return pl.BlockSpec(shape, idx, pipeline_mode=pl.Buffered(1))
        except TypeError:  # older BlockSpec without pipeline_mode kwarg
            pass
    return pl.BlockSpec(shape, idx)


# ----------------------------------------------------------------------------
# In-kernel helpers (traced inside the fused layer kernel)
# ----------------------------------------------------------------------------

def _layernorm(y, gamma, beta):
    mean = jnp.mean(y, axis=-1, keepdims=True)
    var = jnp.mean((y - mean) ** 2, axis=-1, keepdims=True)   # biased variance
    return gamma * (y - mean) / jnp.sqrt(var + 1e-12) + beta


def _mha(q_in, kv_in, mask, w_ref, b_ref, *, n_head, scale):
    """Multi-head attention on VMEM-resident (S, D) activations.

    Full-width (S,D)@(D,D) projections fill the MXU; heads are a static in-kernel loop
    over lane slices, concatenated, then one full-width output projection (no per-head
    dh-deep Wo accumulation).
    """
    q = jnp.dot(q_in, w_ref[0], preferred_element_type=jnp.float32) + b_ref[0]
    k = jnp.dot(kv_in, w_ref[1], preferred_element_type=jnp.float32) + b_ref[1]
    v = jnp.dot(kv_in, w_ref[2], preferred_element_type=jnp.float32) + b_ref[2]

    d_model = q.shape[-1]
    dh = d_model // n_head
    neg = jnp.float32(-10000.0)
    heads = []
    for h in range(n_head):                       # static head loop (unrolled at trace)
        sl = slice(h * dh, (h + 1) * dh)
        qh, kh, vh = q[:, sl], k[:, sl], v[:, sl]
        # contract last dims of q and k directly (no kh.T -> no XLU transpose)
        s = jax.lax.dot_general(qh, kh, (((1,), (1,)), ((), ())),
                                preferred_element_type=jnp.float32) * scale
        s = jnp.where(mask == 0, neg, s)          # masked_fill(mask == 0, -10000)
        s = s - jnp.max(s, axis=-1, keepdims=True)
        p = jnp.exp(s)
        # exact reciprocal kept to preserve the strict 1e-4 parity check
        # (approx=True would move it to the otherwise-idle EUP slot).
        p = p * pl.reciprocal(jnp.sum(p, axis=-1, keepdims=True), approx=False)
        heads.append(jnp.dot(p, vh, preferred_element_type=jnp.float32))

    o = jnp.concatenate(heads, axis=-1)           # (Sq, D)
    return jnp.dot(o, w_ref[3], preferred_element_type=jnp.float32) + b_ref[3]


# ----------------------------------------------------------------------------
# Fused decoder layer: (self-attn + LN) -> (cross-attn + LN) -> (FFN + LN)
# grid = (B,), "parallel" (megacore / v7x 2-TC sharding); weights resident.
# ----------------------------------------------------------------------------

def _layer_kernel(dec_ref, enc_ref, tmask_ref, smask_ref,
                  a1w_ref, a1b_ref, a2w_ref, a2b_ref,
                  w1_ref, fb1_ref, w2_ref, fb2_ref,
                  lng_ref, lnb_ref, o_ref, *, n_head, scale):
    x = dec_ref[0].astype(jnp.float32)            # (Sq, D)
    enc = enc_ref[0].astype(jnp.float32)          # (Sk, D)

    # masked self-attention + residual + LayerNorm (dropout == identity)
    y = _mha(x, x, tmask_ref[0, 0], a1w_ref, a1b_ref, n_head=n_head, scale=scale)
    x = _layernorm(y + x, lng_ref[0], lnb_ref[0])

    # cross-attention + residual + LayerNorm
    y = _mha(x, enc, smask_ref[0, 0], a2w_ref, a2b_ref, n_head=n_head, scale=scale)
    x = _layernorm(y + x, lng_ref[1], lnb_ref[1])

    # position-wise FFN + residual + LayerNorm
    h = jnp.dot(x, w1_ref[...], preferred_element_type=jnp.float32) + fb1_ref[...]
    h = jnp.maximum(h, 0.0)                       # relu; dropout == identity
    y = jnp.dot(h, w2_ref[...], preferred_element_type=jnp.float32) + fb2_ref[...]
    x = _layernorm(y + x, lng_ref[2], lnb_ref[2])

    o_ref[0] = x.astype(o_ref.dtype)


def _pack_attn(p):
    w = jnp.stack([p["w_q"], p["w_k"], p["w_v"], p["w_o"]])               # (4, D, D)
    b = jnp.stack([p["b_q"], p["b_k"], p["b_v"], p["b_o"]])[:, None, :]   # (4, 1, D)
    return w, b


def decoder_layer(lp, dec, enc, t_mask, s_mask, n_head, single_buffer, vmem_limit):
    B, Sq, D = dec.shape
    Sk = enc.shape[1]
    H = lp["ffn"]["w1"].shape[1]
    dh = D // n_head

    a1w, a1b = _pack_attn(lp["attn1"])
    a2w, a2b = _pack_attn(lp["cross"])
    lng = jnp.stack([lp["ln1"]["gamma"], lp["ln2"]["gamma"], lp["ln3"]["gamma"]])[:, None, :]
    lnb = jnp.stack([lp["ln1"]["beta"], lp["ln2"]["beta"], lp["ln3"]["beta"]])[:, None, :]

    ws = functools.partial(_wspec, single_buffer=single_buffer)
    kernel = functools.partial(_layer_kernel, n_head=n_head, scale=1.0 / math.sqrt(dh))

    return pl.pallas_call(
        kernel,
        out_shape=jax.ShapeDtypeStruct((B, Sq, D), jnp.float32),
        grid=(B,),
        in_specs=[
            pl.BlockSpec((1, Sq, D), lambda b: (b, 0, 0)),          # dec (query / residual)
            pl.BlockSpec((1, Sk, D), lambda b: (b, 0, 0)),          # enc (cross kv)
            pl.BlockSpec((1, 1, Sq, Sq), lambda b: (b, 0, 0, 0)),   # t_mask (no BH broadcast)
            pl.BlockSpec((1, 1, Sq, Sk), lambda b: (b, 0, 0, 0)),   # s_mask
            ws((4, D, D)), ws((4, 1, D)),                           # self-attn  Wq/Wk/Wv/Wo, b
            ws((4, D, D)), ws((4, 1, D)),                           # cross-attn Wq/Wk/Wv/Wo, b
            ws((D, H)), ws((1, H)), ws((H, D)), ws((1, D)),         # FFN w1/b1/w2/b2
            ws((3, 1, D)), ws((3, 1, D)),                           # LN gammas / betas
        ],
        out_specs=pl.BlockSpec((1, Sq, D), lambda b: (b, 0, 0)),
        compiler_params=pltpu.CompilerParams(
            dimension_semantics=("parallel",),       # B >= 2 -> shardable across v7x's 2 TCs
            vmem_limit_bytes=vmem_limit),
    )(dec, enc, t_mask, s_mask, a1w, a1b, a2w, a2b,
      lp["ffn"]["w1"], lp["ffn"]["b1"].reshape(1, H),
      lp["ffn"]["w2"], lp["ffn"]["b2"].reshape(1, D), lng, lnb)


# ----------------------------------------------------------------------------
# Final fc: y = x @ W + b, tiled over rows and lane-dense output columns.
# ----------------------------------------------------------------------------

def _linear_kernel(x_ref, w_ref, b_ref, o_ref):
    y = jnp.dot(x_ref[...], w_ref[...], preferred_element_type=jnp.float32) + b_ref[...]
    o_ref[...] = y.astype(o_ref.dtype)


def linear(x2d, w, b, *, vmem_limit):
    N, Din = x2d.shape
    Dout = w.shape[1]
    cap = 512 if vmem_limit >= (64 << 20) else 256   # v5e/v6e: bigger tiles; v7x: modest
    tm = _tile(N, 8, cap)        # full block when N is small (no forced 2-step grid)
    tn = _tile(Dout, 128, cap)   # lane-dense column tiles: unmasked vst, shardable axis
    return pl.pallas_call(
        _linear_kernel,
        out_shape=jax.ShapeDtypeStruct((N, Dout), jnp.float32),
        grid=(N // tm, Dout // tn),
        in_specs=[
            pl.BlockSpec((tm, Din), lambda i, j: (i, 0)),
            pl.BlockSpec((Din, tn), lambda i, j: (0, j)),
            pl.BlockSpec((1, tn), lambda i, j: (0, j)),
        ],
        out_specs=pl.BlockSpec((tm, tn), lambda i, j: (i, j)),
        compiler_params=pltpu.CompilerParams(
            dimension_semantics=("parallel", "parallel"), vmem_limit_bytes=vmem_limit),
    )(x2d, w, b.reshape(1, Dout))


# ----------------------------------------------------------------------------
# Decoder forward (one fused pallas_call per layer + one for the fc)
# ----------------------------------------------------------------------------

def decoder_forward(params, dec_emb, enc, t_mask, s_mask, n_head, single_buffer=True):
    vmem = _vmem_limit_bytes()
    x = dec_emb
    for lp in params["layers"]:
        x = decoder_layer(lp, x, enc, t_mask, s_mask, n_head, single_buffer, vmem)
    B, S, D = x.shape
    voc = params["fc_w"].shape[1]
    out = linear(x.reshape(B * S, D), params["fc_w"], params["fc_b"], vmem_limit=vmem)
    return out.reshape(B, S, voc)


# ----------------------------------------------------------------------------
# Deterministic parameter init + pure-JAX reference
# ----------------------------------------------------------------------------

def _lin_init(key, din, dout):
    kw, kb = jax.random.split(key)
    bound = 1.0 / math.sqrt(din)
    w = jax.random.uniform(kw, (din, dout), jnp.float32, -bound, bound)
    b = jax.random.uniform(kb, (dout,), jnp.float32, -bound, bound)
    return w, b


def _mha_init(key, d_model):
    ks = jax.random.split(key, 4)
    p = {}
    for kk, nm in zip(ks, ("q", "k", "v", "o")):
        w, b = _lin_init(kk, d_model, d_model)
        p["w_" + nm], p["b_" + nm] = w, b
    return p


def _layer_init(key, d_model, ffn_hidden):
    k1, k2, k3, k4 = jax.random.split(key, 4)
    w1, b1 = _lin_init(k3, d_model, ffn_hidden)
    w2, b2 = _lin_init(k4, ffn_hidden, d_model)
    ln = lambda: {"gamma": jnp.ones((d_model,), jnp.float32),
                  "beta": jnp.zeros((d_model,), jnp.float32)}
    return {"attn1": _mha_init(k1, d_model),
            "cross": _mha_init(k2, d_model),
            "ffn": {"w1": w1, "b1": b1, "w2": w2, "b2": b2},
            "ln1": ln(), "ln2": ln(), "ln3": ln()}


def init_params(key, d_model, ffn_hidden, n_layer, voc_size):
    keys = jax.random.split(key, n_layer + 1)
    layers = [_layer_init(k, d_model, ffn_hidden) for k in keys[:-1]]
    fc_w, fc_b = _lin_init(keys[-1], d_model, voc_size)
    return {"layers": layers, "fc_w": fc_w, "fc_b": fc_b}


def _ref_mha(p, q_in, k_in, v_in, mask, n_head):
    B, Sq, D = q_in.shape
    Sk = k_in.shape[1]
    dh = D // n_head
    q = (q_in @ p["w_q"] + p["b_q"]).reshape(B, Sq, n_head, dh).transpose(0, 2, 1, 3)
    k = (k_in @ p["w_k"] + p["b_k"]).reshape(B, Sk, n_head, dh).transpose(0, 2, 1, 3)
    v = (v_in @ p["w_v"] + p["b_v"]).reshape(B, Sk, n_head, dh).transpose(0, 2, 1, 3)
    s = (q @ k.transpose(0, 1, 3, 2)) / math.sqrt(dh)
    s = jnp.where(mask == 0, -10000.0, s)
    a = jax.nn.softmax(s, axis=-1)
    o = (a @ v).transpose(0, 2, 1, 3).reshape(B, Sq, D)
    return o @ p["w_o"] + p["b_o"]


def _ref_ln(x, g, b):
    mean = jnp.mean(x, axis=-1, keepdims=True)
    var = jnp.mean((x - mean) ** 2, axis=-1, keepdims=True)
    return g * (x - mean) / jnp.sqrt(var + 1e-12) + b


def _ref_layer(lp, dec, enc, t_mask, s_mask, n_head):
    x = _ref_mha(lp["attn1"], dec, dec, dec, t_mask, n_head)
    x = _ref_ln(x + dec, lp["ln1"]["gamma"], lp["ln1"]["beta"])
    res = x
    x = _ref_mha(lp["cross"], x, enc, enc, s_mask, n_head)
    x = _ref_ln(x + res, lp["ln2"]["gamma"], lp["ln2"]["beta"])
    res = x
    h = jnp.maximum(x @ lp["ffn"]["w1"] + lp["ffn"]["b1"], 0.0)
    x = h @ lp["ffn"]["w2"] + lp["ffn"]["b2"]
    x = _ref_ln(x + res, lp["ln3"]["gamma"], lp["ln3"]["beta"])
    return x


def decoder_forward_ref(params, dec_emb, enc, t_mask, s_mask, n_head):
    x = dec_emb
    for lp in params["layers"]:
        x = _ref_layer(lp, x, enc, t_mask, s_mask, n_head)
    return x @ params["fc_w"] + params["fc_b"]


# ----------------------------------------------------------------------------

if __name__ == "__main__":
    B, S_DEC, S_ENC = 2, 8, 8
    D_MODEL, N_HEAD, FFN_HIDDEN = 32, 4, 64
    N_LAYER, VOCAB = 2, 128

    root = jax.random.PRNGKey(0)
    kp, kd, ke = jax.random.split(root, 3)
    params = init_params(kp, D_MODEL, FFN_HIDDEN, N_LAYER, VOCAB)

    # decoder input is pre-embedded [B, S, D] (TransformerEmbedding source not provided)
    dec = jax.random.normal(kd, (B, S_DEC, D_MODEL), jnp.float32)
    enc = jax.random.normal(ke, (B, S_ENC, D_MODEL), jnp.float32)
    # integer masks (1 = keep, 0 = masked)
    t_mask = jnp.broadcast_to(jnp.tril(jnp.ones((S_DEC, S_DEC), jnp.int32))[None, None],
                              (B, 1, S_DEC, S_DEC))
    s_mask = jnp.ones((B, 1, S_DEC, S_ENC), jnp.int32)

    run = jax.jit(functools.partial(decoder_forward, n_head=N_HEAD, single_buffer=True))
    try:
        out = jax.block_until_ready(run(params, dec, enc, t_mask, s_mask))
    except Exception:
        # single-buffer weight hint (pl.Buffered(1)) not supported on this JAX/libtpu:
        # retry with default double-buffered resident weights (correctness unchanged).
        run = jax.jit(functools.partial(decoder_forward, n_head=N_HEAD, single_buffer=False))
        out = jax.block_until_ready(run(params, dec, enc, t_mask, s_mask))

    ref = decoder_forward_ref(params, dec, enc, t_mask, s_mask, N_HEAD)
    assert out.shape == (B, S_DEC, VOCAB)
    assert jnp.allclose(out, ref, rtol=1e-4, atol=1e-4), "mismatch vs pure-JAX reference"

    print("KERNEL_OK")
</pallas_src>

<mosaic_0001>
module attributes {stable_mosaic.version = 11 : i64} {
  func.func @_layer_kernel(%arg0: i32, %arg1: memref<1x8x32xf32, #tpu.memory_space<vmem>>, %arg2: memref<1x8x32xf32, #tpu.memory_space<vmem>>, %arg3: memref<1x1x8x8xi32, #tpu.memory_space<vmem>>, %arg4: memref<1x1x8x8xi32, #tpu.memory_space<vmem>>, %arg5: memref<4x32x32xf32, #tpu.memory_space<vmem>>, %arg6: memref<4x1x32xf32, #tpu.memory_space<vmem>>, %arg7: memref<4x32x32xf32, #tpu.memory_space<vmem>>, %arg8: memref<4x1x32xf32, #tpu.memory_space<vmem>>, %arg9: memref<32x64xf32, #tpu.memory_space<vmem>>, %arg10: memref<1x64xf32, #tpu.memory_space<vmem>>, %arg11: memref<64x32xf32, #tpu.memory_space<vmem>>, %arg12: memref<1x32xf32, #tpu.memory_space<vmem>>, %arg13: memref<3x1x32xf32, #tpu.memory_space<vmem>>, %arg14: memref<3x1x32xf32, #tpu.memory_space<vmem>>, %arg15: memref<1x8x32xf32, #tpu.memory_space<vmem>>) attributes {dimension_semantics = [#tpu.dimension_semantics<parallel>], iteration_bounds = array<i64: 2>, scalar_prefetch = 0 : i64, scratch_operands = 0 : i64, tpu.core_type = #tpu.core_type<tc>, window_params = [{transform_indices = @transform_0, window_bounds = array<i64: 1, 8, 32>}, {transform_indices = @transform_1, window_bounds = array<i64: 1, 8, 32>}, {transform_indices = @transform_2, window_bounds = array<i64: 1, 1, 8, 8>}, {transform_indices = @transform_3, window_bounds = array<i64: 1, 1, 8, 8>}, {pipeline_mode = #tpu.pipeline_mode<synchronous>, transform_indices = @transform_4, window_bounds = array<i64: 4, 32, 32>}, {pipeline_mode = #tpu.pipeline_mode<synchronous>, transform_indices = @transform_5, window_bounds = array<i64: 4, 1, 32>}, {pipeline_mode = #tpu.pipeline_mode<synchronous>, transform_indices = @transform_6, window_bounds = array<i64: 4, 32, 32>}, {pipeline_mode = #tpu.pipeline_mode<synchronous>, transform_indices = @transform_7, window_bounds = array<i64: 4, 1, 32>}, {pipeline_mode = #tpu.pipeline_mode<synchronous>, transform_indices = @transform_8, window_bounds = array<i64: 32, 64>}, {pipeline_mode = #tpu.pipeline_mode<synchronous>, transform_indices = @transform_9, window_bounds = array<i64: 1, 64>}, {pipeline_mode = #tpu.pipeline_mode<synchronous>, transform_indices = @transform_10, window_bounds = array<i64: 64, 32>}, {pipeline_mode = #tpu.pipeline_mode<synchronous>, transform_indices = @transform_11, window_bounds = array<i64: 1, 32>}, {pipeline_mode = #tpu.pipeline_mode<synchronous>, transform_indices = @transform_12, window_bounds = array<i64: 3, 1, 32>}, {pipeline_mode = #tpu.pipeline_mode<synchronous>, transform_indices = @transform_13, window_bounds = array<i64: 3, 1, 32>}, {transform_indices = @transform_14, window_bounds = array<i64: 1, 8, 32>}]} {
    %c0 = arith.constant 0 : index
    %c0_0 = arith.constant 0 : index
    %c0_1 = arith.constant 0 : index
    %0 = vector.load %arg1[%c0, %c0_0, %c0_1] : memref<1x8x32xf32, #tpu.memory_space<vmem>>, vector<1x8x32xf32>
    %1 = vector.shape_cast %0 : vector<1x8x32xf32> to vector<8x32xf32>
    %c0_2 = arith.constant 0 : index
    %c0_3 = arith.constant 0 : index
    %c0_4 = arith.constant 0 : index
    %2 = vector.load %arg2[%c0_2, %c0_3, %c0_4] : memref<1x8x32xf32, #tpu.memory_space<vmem>>, vector<1x8x32xf32>
    %3 = vector.shape_cast %2 : vector<1x8x32xf32> to vector<8x32xf32>
    %c0_5 = arith.constant 0 : index
    %c0_6 = arith.constant 0 : index
    %c0_7 = arith.constant 0 : index
    %c0_8 = arith.constant 0 : index
    %4 = vector.load %arg3[%c0_5, %c0_6, %c0_7, %c0_8] : memref<1x1x8x8xi32, #tpu.memory_space<vmem>>, vector<1x1x8x8xi32>
    %5 = vector.shape_cast %4 : vector<1x1x8x8xi32> to vector<8x8xi32>
    %c0_9 = arith.constant 0 : index
    %c0_10 = arith.constant 0 : index
    %c0_11 = arith.constant 0 : index
    %6 = vector.load %arg5[%c0_9, %c0_10, %c0_11] : memref<4x32x32xf32, #tpu.memory_space<vmem>>, vector<1x32x32xf32>
    %7 = vector.shape_cast %6 : vector<1x32x32xf32> to vector<32x32xf32>
    %cst = arith.constant dense<0.000000e+00> : vector<8x32xf32>
    %8 = tpu.matmul %1, %7, %cst {dimension_numbers = #tpu.dot_dimension_numbers<[1], [0], [0], [1], [0, 0, 1, 1], [], []>} : vector<8x32xf32>, vector<32x32xf32>, vector<8x32xf32> -> vector<8x32xf32>
    %c0_12 = arith.constant 0 : index
    %c0_13 = arith.constant 0 : index
    %c0_14 = arith.constant 0 : index
    %9 = vector.load %arg6[%c0_12, %c0_13, %c0_14] : memref<4x1x32xf32, #tpu.memory_space<vmem>>, vector<1x1x32xf32>
    %10 = vector.shape_cast %9 : vector<1x1x32xf32> to vector<1x32xf32>
    %11 = vector.broadcast %10 : vector<1x32xf32> to vector<8x32xf32>
    %12 = arith.addf %8, %11 : vector<8x32xf32>
    %c1 = arith.constant 1 : index
    %c0_15 = arith.constant 0 : index
    %c0_16 = arith.constant 0 : index
    %13 = vector.load %arg5[%c1, %c0_15, %c0_16] : memref<4x32x32xf32, #tpu.memory_space<vmem>>, vector<1x32x32xf32>
    %14 = vector.shape_cast %13 : vector<1x32x32xf32> to vector<32x32xf32>
    %cst_17 = arith.constant dense<0.000000e+00> : vector<8x32xf32>
    %15 = tpu.matmul %1, %14, %cst_17 {dimension_numbers = #tpu.dot_dimension_numbers<[1], [0], [0], [1], [0, 0, 1, 1], [], []>} : vector<8x32xf32>, vector<32x32xf32>, vector<8x32xf32> -> vector<8x32xf32>
    %c1_18 = arith.constant 1 : index
    %c0_19 = arith.constant 0 : index
    %c0_20 = arith.constant 0 : index
    %16 = vector.load %arg6[%c1_18, %c0_19, %c0_20] : memref<4x1x32xf32, #tpu.memory_space<vmem>>, vector<1x1x32xf32>
    %17 = vector.shape_cast %16 : vector<1x1x32xf32> to vector<1x32xf32>
    %18 = vector.broadcast %17 : vector<1x32xf32> to vector<8x32xf32>
    %19 = arith.addf %15, %18 : vector<8x32xf32>
    %c2 = arith.constant 2 : index
    %c0_21 = arith.constant 0 : index
    %c0_22 = arith.constant 0 : index
    %20 = vector.load %arg5[%c2, %c0_21, %c0_22] : memref<4x32x32xf32, #tpu.memory_space<vmem>>, vector<1x32x32xf32>
    %21 = vector.shape_cast %20 : vector<1x32x32xf32> to vector<32x32xf32>
    %cst_23 = arith.constant dense<0.000000e+00> : vector<8x32xf32>
    %22 = tpu.matmul %1, %21, %cst_23 {dimension_numbers = #tpu.dot_dimension_numbers<[1], [0], [0], [1], [0, 0, 1, 1], [], []>} : vector<8x32xf32>, vector<32x32xf32>, vector<8x32xf32> -> vector<8x32xf32>
    %c2_24 = arith.constant 2 : index
    %c0_25 = arith.constant 0 : index
    %c0_26 = arith.constant 0 : index
    %23 = vector.load %arg6[%c2_24, %c0_25, %c0_26] : memref<4x1x32xf32, #tpu.memory_space<vmem>>, vector<1x1x32xf32>
    %24 = vector.shape_cast %23 : vector<1x1x32xf32> to vector<1x32xf32>
    %25 = vector.broadcast %24 : vector<1x32xf32> to vector<8x32xf32>
    %26 = arith.addf %22, %25 : vector<8x32xf32>
    %27 = vector.extract_strided_slice %12 {offsets = [0, 0], sizes = [8, 8], strides = [1, 1]} : vector<8x32xf32> to vector<8x8xf32>
    %28 = vector.extract_strided_slice %19 {offsets = [0, 0], sizes = [8, 8], strides = [1, 1]} : vector<8x32xf32> to vector<8x8xf32>
    %29 = vector.extract_strided_slice %26 {offsets = [0, 0], sizes = [8, 8], strides = [1, 1]} : vector<8x32xf32> to vector<8x8xf32>
    %cst_27 = arith.constant dense<0.000000e+00> : vector<8x8xf32>
    %30 = tpu.matmul %27, %28, %cst_27 {dimension_numbers = #tpu.dot_dimension_numbers<[1], [1], [0], [0], [0, 0, 1, 0], [], []>} : vector<8x8xf32>, vector<8x8xf32>, vector<8x8xf32> -> vector<8x8xf32>
    %cst_28 = arith.constant 0.353553385 : f32
    %31 = vector.broadcast %cst_28 : f32 to vector<8x8xf32>
    %32 = arith.mulf %30, %31 : vector<8x8xf32>
    %c0_i32 = arith.constant 0 : i32
    %33 = vector.broadcast %c0_i32 : i32 to vector<8x8xi32>
    %34 = arith.cmpi eq, %5, %33 : vector<8x8xi32>
    %cst_29 = arith.constant -1.000000e+04 : f32
    %35 = vector.broadcast %cst_29 : f32 to vector<8x8xf32>
    %36 = arith.select %34, %35, %32 : vector<8x8xi1>, vector<8x8xf32>
    %cst_30 = arith.constant dense<0xFF800000> : vector<8xf32>
    %37 = vector.multi_reduction <maximumf>, %36, %cst_30 [1] : vector<8x8xf32> to vector<8xf32>
    %38 = vector.shape_cast %37 : vector<8xf32> to vector<8x1xf32>
    %39 = vector.broadcast %38 : vector<8x1xf32> to vector<8x8xf32>
    %40 = arith.subf %36, %39 : vector<8x8xf32>
    %41 = math.exp %40 : vector<8x8xf32>
    %cst_31 = arith.constant dense<0.000000e+00> : vector<8xf32>
    %42 = vector.multi_reduction <add>, %41, %cst_31 [1] : vector<8x8xf32> to vector<8xf32>
    %43 = vector.shape_cast %42 : vector<8xf32> to vector<8x1xf32>
    %44 = tpu.reciprocal %43 : vector<8x1xf32> -> vector<8x1xf32>
    %45 = vector.broadcast %44 : vector<8x1xf32> to vector<8x8xf32>
    %46 = arith.mulf %41, %45 : vector<8x8xf32>
    %cst_32 = arith.constant dense<0.000000e+00> : vector<8x8xf32>
    %47 = tpu.matmul %46, %29, %cst_32 {dimension_numbers = #tpu.dot_dimension_numbers<[1], [0], [0], [1], [0, 0, 1, 1], [], []>} : vector<8x8xf32>, vector<8x8xf32>, vector<8x8xf32> -> vector<8x8xf32>
    %48 = vector.extract_strided_slice %12 {offsets = [0, 8], sizes = [8, 8], strides = [1, 1]} : vector<8x32xf32> to vector<8x8xf32>
    %49 = vector.extract_strided_slice %19 {offsets = [0, 8], sizes = [8, 8], strides = [1, 1]} : vector<8x32xf32> to vector<8x8xf32>
    %50 = vector.extract_strided_slice %26 {offsets = [0, 8], sizes = [8, 8], strides = [1, 1]} : vector<8x32xf32> to vector<8x8xf32>
    %cst_33 = arith.constant dense<0.000000e+00> : vector<8x8xf32>
    %51 = tpu.matmul %48, %49, %cst_33 {dimension_numbers = #tpu.dot_dimension_numbers<[1], [1], [0], [0], [0, 0, 1, 0], [], []>} : vector<8x8xf32>, vector<8x8xf32>, vector<8x8xf32> -> vector<8x8xf32>
    %cst_34 = arith.constant 0.353553385 : f32
    %52 = vector.broadcast %cst_34 : f32 to vector<8x8xf32>
    %53 = arith.mulf %51, %52 : vector<8x8xf32>
    %c0_i32_35 = arith.constant 0 : i32
    %54 = vector.broadcast %c0_i32_35 : i32 to vector<8x8xi32>
    %55 = arith.cmpi eq, %5, %54 : vector<8x8xi32>
    %cst_36 = arith.constant -1.000000e+04 : f32
    %56 = vector.broadcast %cst_36 : f32 to vector<8x8xf32>
    %57 = arith.select %55, %56, %53 : vector<8x8xi1>, vector<8x8xf32>
    %cst_37 = arith.constant dense<0xFF800000> : vector<8xf32>
    %58 = vector.multi_reduction <maximumf>, %57, %cst_37 [1] : vector<8x8xf32> to vector<8xf32>
    %59 = vector.shape_cast %58 : vector<8xf32> to vector<8x1xf32>
    %60 = vector.broadcast %59 : vector<8x1xf32> to vector<8x8xf32>
    %61 = arith.subf %57, %60 : vector<8x8xf32>
    %62 = math.exp %61 : vector<8x8xf32>
    %cst_38 = arith.constant dense<0.000000e+00> : vector<8xf32>
    %63 = vector.multi_reduction <add>, %62, %cst_38 [1] : vector<8x8xf32> to vector<8xf32>
    %64 = vector.shape_cast %63 : vector<8xf32> to vector<8x1xf32>
    %65 = tpu.reciprocal %64 : vector<8x1xf32> -> vector<8x1xf32>
    %66 = vector.broadcast %65 : vector<8x1xf32> to vector<8x8xf32>
    %67 = arith.mulf %62, %66 : vector<8x8xf32>
    %cst_39 = arith.constant dense<0.000000e+00> : vector<8x8xf32>
    %68 = tpu.matmul %67, %50, %cst_39 {dimension_numbers = #tpu.dot_dimension_numbers<[1], [0], [0], [1], [0, 0, 1, 1], [], []>} : vector<8x8xf32>, vector<8x8xf32>, vector<8x8xf32> -> vector<8x8xf32>
    %69 = vector.extract_strided_slice %12 {offsets = [0, 16], sizes = [8, 8], strides = [1, 1]} : vector<8x32xf32> to vector<8x8xf32>
    %70 = vector.extract_strided_slice %19 {offsets = [0, 16], sizes = [8, 8], strides = [1, 1]} : vector<8x32xf32> to vector<8x8xf32>
    %71 = vector.extract_strided_slice %26 {offsets = [0, 16], sizes = [8, 8], strides = [1, 1]} : vector<8x32xf32> to vector<8x8xf32>
    %cst_40 = arith.constant dense<0.000000e+00> : vector<8x8xf32>
    %72 = tpu.matmul %69, %70, %cst_40 {dimension_numbers = #tpu.dot_dimension_numbers<[1], [1], [0], [0], [0, 0, 1, 0], [], []>} : vector<8x8xf32>, vector<8x8xf32>, vector<8x8xf32> -> vector<8x8xf32>
    %cst_41 = arith.constant 0.353553385 : f32
    %73 = vector.broadcast %cst_41 : f32 to vector<8x8xf32>
    %74 = arith.mulf %72, %73 : vector<8x8xf32>
    %c0_i32_42 = arith.constant 0 : i32
    %75 = vector.broadcast %c0_i32_42 : i32 to vector<8x8xi32>
    %76 = arith.cmpi eq, %5, %75 : vector<8x8xi32>
    %cst_43 = arith.constant -1.000000e+04 : f32
    %77 = vector.broadcast %cst_43 : f32 to vector<8x8xf32>
    %78 = arith.select %76, %77, %74 : vector<8x8xi1>, vector<8x8xf32>
    %cst_44 = arith.constant dense<0xFF800000> : vector<8xf32>
    %79 = vector.multi_reduction <maximumf>, %78, %cst_44 [1] : vector<8x8xf32> to vector<8xf32>
    %80 = vector.shape_cast %79 : vector<8xf32> to vector<8x1xf32>
    %81 = vector.broadcast %80 : vector<8x1xf32> to vector<8x8xf32>
    %82 = arith.subf %78, %81 : vector<8x8xf32>
    %83 = math.exp %82 : vector<8x8xf32>
    %cst_45 = arith.constant dense<0.000000e+00> : vector<8xf32>
    %84 = vector.multi_reduction <add>, %83, %cst_45 [1] : vector<8x8xf32> to vector<8xf32>
    %85 = vector.shape_cast %84 : vector<8xf32> to vector<8x1xf32>
    %86 = tpu.reciprocal %85 : vector<8x1xf32> -> vector<8x1xf32>
    %87 = vector.broadcast %86 : vector<8x1xf32> to vector<8x8xf32>
    %88 = arith.mulf %83, %87 : vector<8x8xf32>
    %cst_46 = arith.constant dense<0.000000e+00> : vector<8x8xf32>
    %89 = tpu.matmul %88, %71, %cst_46 {dimension_numbers = #tpu.dot_dimension_numbers<[1], [0], [0], [1], [0, 0, 1, 1], [], []>} : vector<8x8xf32>, vector<8x8xf32>, vector<8x8xf32> -> vector<8x8xf32>
    %90 = vector.extract_strided_slice %12 {offsets = [0, 24], sizes = [8, 8], strides = [1, 1]} : vector<8x32xf32> to vector<8x8xf32>
    %91 = vector.extract_strided_slice %19 {offsets = [0, 24], sizes = [8, 8], strides = [1, 1]} : vector<8x32xf32> to vector<8x8xf32>
    %92 = vector.extract_strided_slice %26 {offsets = [0, 24], sizes = [8, 8], strides = [1, 1]} : vector<8x32xf32> to vector<8x8xf32>
    %cst_47 = arith.constant dense<0.000000e+00> : vector<8x8xf32>
    %93 = tpu.matmul %90, %91, %cst_47 {dimension_numbers = #tpu.dot_dimension_numbers<[1], [1], [0], [0], [0, 0, 1, 0], [], []>} : vector<8x8xf32>, vector<8x8xf32>, vector<8x8xf32> -> vector<8x8xf32>
    %cst_48 = arith.constant 0.353553385 : f32
    %94 = vector.broadcast %cst_48 : f32 to vector<8x8xf32>
    %95 = arith.mulf %93, %94 : vector<8x8xf32>
    %c0_i32_49 = arith.constant 0 : i32
    %96 = vector.broadcast %c0_i32_49 : i32 to vector<8x8xi32>
    %97 = arith.cmpi eq, %5, %96 : vector<8x8xi32>
    %cst_50 = arith.constant -1.000000e+04 : f32
    %98 = vector.broadcast %cst_50 : f32 to vector<8x8xf32>
    %99 = arith.select %97, %98, %95 : vector<8x8xi1>, vector<8x8xf32>
    %cst_51 = arith.constant dense<0xFF800000> : vector<8xf32>
    %100 = vector.multi_reduction <maximumf>, %99, %cst_51 [1] : vector<8x8xf32> to vector<8xf32>
    %101 = vector.shape_cast %100 : vector<8xf32> to vector<8x1xf32>
    %102 = vector.broadcast %101 : vector<8x1xf32> to vector<8x8xf32>
    %103 = arith.subf %99, %102 : vector<8x8xf32>
    %104 = math.exp %103 : vector<8x8xf32>
    %cst_52 = arith.constant dense<0.000000e+00> : vector<8xf32>
    %105 = vector.multi_reduction <add>, %104, %cst_52 [1] : vector<8x8xf32> to vector<8xf32>
    %106 = vector.shape_cast %105 : vector<8xf32> to vector<8x1xf32>
    %107 = tpu.reciprocal %106 : vector<8x1xf32> -> vector<8x1xf32>
    %108 = vector.broadcast %107 : vector<8x1xf32> to vector<8x8xf32>
    %109 = arith.mulf %104, %108 : vector<8x8xf32>
    %cst_53 = arith.constant dense<0.000000e+00> : vector<8x8xf32>
    %110 = tpu.matmul %109, %92, %cst_53 {dimension_numbers = #tpu.dot_dimension_numbers<[1], [0], [0], [1], [0, 0, 1, 1], [], []>} : vector<8x8xf32>, vector<8x8xf32>, vector<8x8xf32> -> vector<8x8xf32>
    %111 = tpu.concatenate %47, %68, %89, %110 in 1 : vector<8x8xf32>, vector<8x8xf32>, vector<8x8xf32>, vector<8x8xf32> -> vector<8x32xf32>
    %c3 = arith.constant 3 : index
    %c0_54 = arith.constant 0 : index
    %c0_55 = arith.constant 0 : index
    %112 = vector.load %arg5[%c3, %c0_54, %c0_55] : memref<4x32x32xf32, #tpu.memory_space<vmem>>, vector<1x32x32xf32>
    %113 = vector.shape_cast %112 : vector<1x32x32xf32> to vector<32x32xf32>
    %cst_56 = arith.constant dense<0.000000e+00> : vector<8x32xf32>
    %114 = tpu.matmul %111, %113, %cst_56 {dimension_numbers = #tpu.dot_dimension_numbers<[1], [0], [0], [1], [0, 0, 1, 1], [], []>} : vector<8x32xf32>, vector<32x32xf32>, vector<8x32xf32> -> vector<8x32xf32>
    %c3_57 = arith.constant 3 : index
    %c0_58 = arith.constant 0 : index
    %c0_59 = arith.constant 0 : index
    %115 = vector.load %arg6[%c3_57, %c0_58, %c0_59] : memref<4x1x32xf32, #tpu.memory_space<vmem>>, vector<1x1x32xf32>
    %116 = vector.shape_cast %115 : vector<1x1x32xf32> to vector<1x32xf32>
    %117 = vector.broadcast %116 : vector<1x32xf32> to vector<8x32xf32>
    %118 = arith.addf %114, %117 : vector<8x32xf32>
    %119 = arith.addf %118, %1 : vector<8x32xf32>
    %c0_60 = arith.constant 0 : index
    %c0_61 = arith.constant 0 : index
    %c0_62 = arith.constant 0 : index
    %120 = vector.load %arg13[%c0_60, %c0_61, %c0_62] : memref<3x1x32xf32, #tpu.memory_space<vmem>>, vector<1x1x32xf32>
    %121 = vector.shape_cast %120 : vector<1x1x32xf32> to vector<1x32xf32>
    %c0_63 = arith.constant 0 : index
    %c0_64 = arith.constant 0 : index
    %c0_65 = arith.constant 0 : index
    %122 = vector.load %arg14[%c0_63, %c0_64, %c0_65] : memref<3x1x32xf32, #tpu.memory_space<vmem>>, vector<1x1x32xf32>
    %123 = vector.shape_cast %122 : vector<1x1x32xf32> to vector<1x32xf32>
    %cst_66 = arith.constant dense<0.000000e+00> : vector<8xf32>
    %124 = vector.multi_reduction <add>, %119, %cst_66 [1] : vector<8x32xf32> to vector<8xf32>
    %125 = vector.shape_cast %124 : vector<8xf32> to vector<8x1xf32>
    %cst_67 = arith.constant 3.200000e+01 : f32
    %126 = vector.broadcast %cst_67 : f32 to vector<8x1xf32>
    %127 = arith.divf %125, %126 : vector<8x1xf32>
    %128 = vector.broadcast %127 : vector<8x1xf32> to vector<8x32xf32>
    %129 = arith.subf %119, %128 : vector<8x32xf32>
    %130 = arith.mulf %129, %129 : vector<8x32xf32>
    %cst_68 = arith.constant dense<0.000000e+00> : vector<8xf32>
    %131 = vector.multi_reduction <add>, %130, %cst_68 [1] : vector<8x32xf32> to vector<8xf32>
    %132 = vector.shape_cast %131 : vector<8xf32> to vector<8x1xf32>
    %cst_69 = arith.constant 3.200000e+01 : f32
    %133 = vector.broadcast %cst_69 : f32 to vector<8x1xf32>
    %134 = arith.divf %132, %133 : vector<8x1xf32>
    %135 = vector.broadcast %127 : vector<8x1xf32> to vector<8x32xf32>
    %136 = arith.subf %119, %135 : vector<8x32xf32>
    %137 = vector.broadcast %121 : vector<1x32xf32> to vector<8x32xf32>
    %138 = arith.mulf %137, %136 : vector<8x32xf32>
    %cst_70 = arith.constant 9.99999996E-13 : f32
    %139 = vector.broadcast %cst_70 : f32 to vector<8x1xf32>
    %140 = arith.addf %134, %139 : vector<8x1xf32>
    %141 = math.sqrt %140 : vector<8x1xf32>
    %142 = vector.broadcast %141 : vector<8x1xf32> to vector<8x32xf32>
    %143 = arith.divf %138, %142 : vector<8x32xf32>
    %144 = vector.broadcast %123 : vector<1x32xf32> to vector<8x32xf32>
    %145 = arith.addf %143, %144 : vector<8x32xf32>
    %c0_71 = arith.constant 0 : index
    %c0_72 = arith.constant 0 : index
    %c0_73 = arith.constant 0 : index
    %c0_74 = arith.constant 0 : index
    %146 = vector.load %arg4[%c0_71, %c0_72, %c0_73, %c0_74] : memref<1x1x8x8xi32, #tpu.memory_space<vmem>>, vector<1x1x8x8xi32>
    %147 = vector.shape_cast %146 : vector<1x1x8x8xi32> to vector<8x8xi32>
    %c0_75 = arith.constant 0 : index
    %c0_76 = arith.constant 0 : index
    %c0_77 = arith.constant 0 : index
    %148 = vector.load %arg7[%c0_75, %c0_76, %c0_77] : memref<4x32x32xf32, #tpu.memory_space<vmem>>, vector<1x32x32xf32>
    %149 = vector.shape_cast %148 : vector<1x32x32xf32> to vector<32x32xf32>
    %cst_78 = arith.constant dense<0.000000e+00> : vector<8x32xf32>
    %150 = tpu.matmul %145, %149, %cst_78 {dimension_numbers = #tpu.dot_dimension_numbers<[1], [0], [0], [1], [0, 0, 1, 1], [], []>} : vector<8x32xf32>, vector<32x32xf32>, vector<8x32xf32> -> vector<8x32xf32>
    %c0_79 = arith.constant 0 : index
    %c0_80 = arith.constant 0 : index
    %c0_81 = arith.constant 0 : index
    %151 = vector.load %arg8[%c0_79, %c0_80, %c0_81] : memref<4x1x32xf32, #tpu.memory_space<vmem>>, vector<1x1x32xf32>
    %152 = vector.shape_cast %151 : vector<1x1x32xf32> to vector<1x32xf32>
    %153 = vector.broadcast %152 : vector<1x32xf32> to vector<8x32xf32>
    %154 = arith.addf %150, %153 : vector<8x32xf32>
    %c1_82 = arith.constant 1 : index
    %c0_83 = arith.constant 0 : index
    %c0_84 = arith.constant 0 : index
    %155 = vector.load %arg7[%c1_82, %c0_83, %c0_84] : memref<4x32x32xf32, #tpu.memory_space<vmem>>, vector<1x32x32xf32>
    %156 = vector.shape_cast %155 : vector<1x32x32xf32> to vector<32x32xf32>
    %cst_85 = arith.constant dense<0.000000e+00> : vector<8x32xf32>
    %157 = tpu.matmul %3, %156, %cst_85 {dimension_numbers = #tpu.dot_dimension_numbers<[1], [0], [0], [1], [0, 0, 1, 1], [], []>} : vector<8x32xf32>, vector<32x32xf32>, vector<8x32xf32> -> vector<8x32xf32>
    %c1_86 = arith.constant 1 : index
    %c0_87 = arith.constant 0 : index
    %c0_88 = arith.constant 0 : index
    %158 = vector.load %arg8[%c1_86, %c0_87, %c0_88] : memref<4x1x32xf32, #tpu.memory_space<vmem>>, vector<1x1x32xf32>
    %159 = vector.shape_cast %158 : vector<1x1x32xf32> to vector<1x32xf32>
    %160 = vector.broadcast %159 : vector<1x32xf32> to vector<8x32xf32>
    %161 = arith.addf %157, %160 : vector<8x32xf32>
    %c2_89 = arith.constant 2 : index
    %c0_90 = arith.constant 0 : index
    %c0_91 = arith.constant 0 : index
    %162 = vector.load %arg7[%c2_89, %c0_90, %c0_91] : memref<4x32x32xf32, #tpu.memory_space<vmem>>, vector<1x32x32xf32>
    %163 = vector.shape_cast %162 : vector<1x32x32xf32> to vector<32x32xf32>
    %cst_92 = arith.constant dense<0.000000e+00> : vector<8x32xf32>
    %164 = tpu.matmul %3, %163, %cst_92 {dimension_numbers = #tpu.dot_dimension_numbers<[1], [0], [0], [1], [0, 0, 1, 1], [], []>} : vector<8x32xf32>, vector<32x32xf32>, vector<8x32xf32> -> vector<8x32xf32>
    %c2_93 = arith.constant 2 : index
    %c0_94 = arith.constant 0 : index
    %c0_95 = arith.constant 0 : index
    %165 = vector.load %arg8[%c2_93, %c0_94, %c0_95] : memref<4x1x32xf32, #tpu.memory_space<vmem>>, vector<1x1x32xf32>
    %166 = vector.shape_cast %165 : vector<1x1x32xf32> to vector<1x32xf32>
    %167 = vector.broadcast %166 : vector<1x32xf32> to vector<8x32xf32>
    %168 = arith.addf %164, %167 : vector<8x32xf32>
    %169 = vector.extract_strided_slice %154 {offsets = [0, 0], sizes = [8, 8], strides = [1, 1]} : vector<8x32xf32> to vector<8x8xf32>
    %170 = vector.extract_strided_slice %161 {offsets = [0, 0], sizes = [8, 8], strides = [1, 1]} : vector<8x32xf32> to vector<8x8xf32>
    %171 = vector.extract_strided_slice %168 {offsets = [0, 0], sizes = [8, 8], strides = [1, 1]} : vector<8x32xf32> to vector<8x8xf32>
    %cst_96 = arith.constant dense<0.000000e+00> : vector<8x8xf32>
    %172 = tpu.matmul %169, %170, %cst_96 {dimension_numbers = #tpu.dot_dimension_numbers<[1], [1], [0], [0], [0, 0, 1, 0], [], []>} : vector<8x8xf32>, vector<8x8xf32>, vector<8x8xf32> -> vector<8x8xf32>
    %cst_97 = arith.constant 0.353553385 : f32
    %173 = vector.broadcast %cst_97 : f32 to vector<8x8xf32>
    %174 = arith.mulf %172, %173 : vector<8x8xf32>
    %c0_i32_98 = arith.constant 0 : i32
    %175 = vector.broadcast %c0_i32_98 : i32 to vector<8x8xi32>
    %176 = arith.cmpi eq, %147, %175 : vector<8x8xi32>
    %cst_99 = arith.constant -1.000000e+04 : f32
    %177 = vector.broadcast %cst_99 : f32 to vector<8x8xf32>
    %178 = arith.select %176, %177, %174 : vector<8x8xi1>, vector<8x8xf32>
    %cst_100 = arith.constant dense<0xFF800000> : vector<8xf32>
    %179 = vector.multi_reduction <maximumf>, %178, %cst_100 [1] : vector<8x8xf32> to vector<8xf32>
    %180 = vector.shape_cast %179 : vector<8xf32> to vector<8x1xf32>
    %181 = vector.broadcast %180 : vector<8x1xf32> to vector<8x8xf32>
    %182 = arith.subf %178, %181 : vector<8x8xf32>
    %183 = math.exp %182 : vector<8x8xf32>
    %cst_101 = arith.constant dense<0.000000e+00> : vector<8xf32>
    %184 = vector.multi_reduction <add>, %183, %cst_101 [1] : vector<8x8xf32> to vector<8xf32>
    %185 = vector.shape_cast %184 : vector<8xf32> to vector<8x1xf32>
    %186 = tpu.reciprocal %185 : vector<8x1xf32> -> vector<8x1xf32>
    %187 = vector.broadcast %186 : vector<8x1xf32> to vector<8x8xf32>
    %188 = arith.mulf %183, %187 : vector<8x8xf32>
    %cst_102 = arith.constant dense<0.000000e+00> : vector<8x8xf32>
    %189 = tpu.matmul %188, %171, %cst_102 {dimension_numbers = #tpu.dot_dimension_numbers<[1], [0], [0], [1], [0, 0, 1, 1], [], []>} : vector<8x8xf32>, vector<8x8xf32>, vector<8x8xf32> -> vector<8x8xf32>
    %190 = vector.extract_strided_slice %154 {offsets = [0, 8], sizes = [8, 8], strides = [1, 1]} : vector<8x32xf32> to vector<8x8xf32>
    %191 = vector.extract_strided_slice %161 {offsets = [0, 8], sizes = [8, 8], strides = [1, 1]} : vector<8x32xf32> to vector<8x8xf32>
    %192 = vector.extract_strided_slice %168 {offsets = [0, 8], sizes = [8, 8], strides = [1, 1]} : vector<8x32xf32> to vector<8x8xf32>
    %cst_103 = arith.constant dense<0.000000e+00> : vector<8x8xf32>
    %193 = tpu.matmul %190, %191, %cst_103 {dimension_numbers = #tpu.dot_dimension_numbers<[1], [1], [0], [0], [0, 0, 1, 0], [], []>} : vector<8x8xf32>, vector<8x8xf32>, vector<8x8xf32> -> vector<8x8xf32>
    %cst_104 = arith.constant 0.353553385 : f32
    %194 = vector.broadcast %cst_104 : f32 to vector<8x8xf32>
    %195 = arith.mulf %193, %194 : vector<8x8xf32>
    %c0_i32_105 = arith.constant 0 : i32
    %196 = vector.broadcast %c0_i32_105 : i32 to vector<8x8xi32>
    %197 = arith.cmpi eq, %147, %196 : vector<8x8xi32>
    %cst_106 = arith.constant -1.000000e+04 : f32
    %198 = vector.broadcast %cst_106 : f32 to vector<8x8xf32>
    %199 = arith.select %197, %198, %195 : vector<8x8xi1>, vector<8x8xf32>
    %cst_107 = arith.constant dense<0xFF800000> : vector<8xf32>
    %200 = vector.multi_reduction <maximumf>, %199, %cst_107 [1] : vector<8x8xf32> to vector<8xf32>
    %201 = vector.shape_cast %200 : vector<8xf32> to vector<8x1xf32>
    %202 = vector.broadcast %201 : vector<8x1xf32> to vector<8x8xf32>
    %203 = arith.subf %199, %202 : vector<8x8xf32>
    %204 = math.exp %203 : vector<8x8xf32>
    %cst_108 = arith.constant dense<0.000000e+00> : vector<8xf32>
    %205 = vector.multi_reduction <add>, %204, %cst_108 [1] : vector<8x8xf32> to vector<8xf32>
    %206 = vector.shape_cast %205 : vector<8xf32> to vector<8x1xf32>
    %207 = tpu.reciprocal %206 : vector<8x1xf32> -> vector<8x1xf32>
    %208 = vector.broadcast %207 : vector<8x1xf32> to vector<8x8xf32>
    %209 = arith.mulf %204, %208 : vector<8x8xf32>
    %cst_109 = arith.constant dense<0.000000e+00> : vector<8x8xf32>
    %210 = tpu.matmul %209, %192, %cst_109 {dimension_numbers = #tpu.dot_dimension_numbers<[1], [0], [0], [1], [0, 0, 1, 1], [], []>} : vector<8x8xf32>, vector<8x8xf32>, vector<8x8xf32> -> vector<8x8xf32>
    %211 = vector.extract_strided_slice %154 {offsets = [0, 16], sizes = [8, 8], strides = [1, 1]} : vector<8x32xf32> to vector<8x8xf32>
    %212 = vector.extract_strided_slice %161 {offsets = [0, 16], sizes = [8, 8], strides = [1, 1]} : vector<8x32xf32> to vector<8x8xf32>
    %213 = vector.extract_strided_slice %168 {offsets = [0, 16], sizes = [8, 8], strides = [1, 1]} : vector<8x32xf32> to vector<8x8xf32>
    %cst_110 = arith.constant dense<0.000000e+00> : vector<8x8xf32>
    %214 = tpu.matmul %211, %212, %cst_110 {dimension_numbers = #tpu.dot_dimension_numbers<[1], [1], [0], [0], [0, 0, 1, 0], [], []>} : vector<8x8xf32>, vector<8x8xf32>, vector<8x8xf32> -> vector<8x8xf32>
    %cst_111 = arith.constant 0.353553385 : f32
    %215 = vector.broadcast %cst_111 : f32 to vector<8x8xf32>
    %216 = arith.mulf %214, %215 : vector<8x8xf32>
    %c0_i32_112 = arith.constant 0 : i32
    %217 = vector.broadcast %c0_i32_112 : i32 to vector<8x8xi32>
    %218 = arith.cmpi eq, %147, %217 : vector<8x8xi32>
    %cst_113 = arith.constant -1.000000e+04 : f32
    %219 = vector.broadcast %cst_113 : f32 to vector<8x8xf32>
    %220 = arith.select %218, %219, %216 : vector<8x8xi1>, vector<8x8xf32>
    %cst_114 = arith.constant dense<0xFF800000> : vector<8xf32>
    %221 = vector.multi_reduction <maximumf>, %220, %cst_114 [1] : vector<8x8xf32> to vector<8xf32>
    %222 = vector.shape_cast %221 : vector<8xf32> to vector<8x1xf32>
    %223 = vector.broadcast %222 : vector<8x1xf32> to vector<8x8xf32>
    %224 = arith.subf %220, %223 : vector<8x8xf32>
    %225 = math.exp %224 : vector<8x8xf32>
    %cst_115 = arith.constant dense<0.000000e+00> : vector<8xf32>
    %226 = vector.multi_reduction <add>, %225, %cst_115 [1] : vector<8x8xf32> to vector<8xf32>
    %227 = vector.shape_cast %226 : vector<8xf32> to vector<8x1xf32>
    %228 = tpu.reciprocal %227 : vector<8x1xf32> -> vector<8x1xf32>
    %229 = vector.broadcast %228 : vector<8x1xf32> to vector<8x8xf32>
    %230 = arith.mulf %225, %229 : vector<8x8xf32>
    %cst_116 = arith.constant dense<0.000000e+00> : vector<8x8xf32>
    %231 = tpu.matmul %230, %213, %cst_116 {dimension_numbers = #tpu.dot_dimension_numbers<[1], [0], [0], [1], [0, 0, 1, 1], [], []>} : vector<8x8xf32>, vector<8x8xf32>, vector<8x8xf32> -> vector<8x8xf32>
    %232 = vector.extract_strided_slice %154 {offsets = [0, 24], sizes = [8, 8], strides = [1, 1]} : vector<8x32xf32> to vector<8x8xf32>
    %233 = vector.extract_strided_slice %161 {offsets = [0, 24], sizes = [8, 8], strides = [1, 1]} : vector<8x32xf32> to vector<8x8xf32>
    %234 = vector.extract_strided_slice %168 {offsets = [0, 24], sizes = [8, 8], strides = [1, 1]} : vector<8x32xf32> to vector<8x8xf32>
    %cst_117 = arith.constant dense<0.000000e+00> : vector<8x8xf32>
    %235 = tpu.matmul %232, %233, %cst_117 {dimension_numbers = #tpu.dot_dimension_numbers<[1], [1], [0], [0], [0, 0, 1, 0], [], []>} : vector<8x8xf32>, vector<8x8xf32>, vector<8x8xf32> -> vector<8x8xf32>
    %cst_118 = arith.constant 0.353553385 : f32
    %236 = vector.broadcast %cst_118 : f32 to vector<8x8xf32>
    %237 = arith.mulf %235, %236 : vector<8x8xf32>
    %c0_i32_119 = arith.constant 0 : i32
    %238 = vector.broadcast %c0_i32_119 : i32 to vector<8x8xi32>
    %239 = arith.cmpi eq, %147, %238 : vector<8x8xi32>
    %cst_120 = arith.constant -1.000000e+04 : f32
    %240 = vector.broadcast %cst_120 : f32 to vector<8x8xf32>
    %241 = arith.select %239, %240, %237 : vector<8x8xi1>, vector<8x8xf32>
    %cst_121 = arith.constant dense<0xFF800000> : vector<8xf32>
    %242 = vector.multi_reduction <maximumf>, %241, %cst_121 [1] : vector<8x8xf32> to vector<8xf32>
    %243 = vector.shape_cast %242 : vector<8xf32> to vector<8x1xf32>
    %244 = vector.broadcast %243 : vector<8x1xf32> to vector<8x8xf32>
    %245 = arith.subf %241, %244 : vector<8x8xf32>
    %246 = math.exp %245 : vector<8x8xf32>
    %cst_122 = arith.constant dense<0.000000e+00> : vector<8xf32>
    %247 = vector.multi_reduction <add>, %246, %cst_122 [1] : vector<8x8xf32> to vector<8xf32>
    %248 = vector.shape_cast %247 : vector<8xf32> to vector<8x1xf32>
    %249 = tpu.reciprocal %248 : vector<8x1xf32> -> vector<8x1xf32>
    %250 = vector.broadcast %249 : vector<8x1xf32> to vector<8x8xf32>
    %251 = arith.mulf %246, %250 : vector<8x8xf32>
    %cst_123 = arith.constant dense<0.000000e+00> : vector<8x8xf32>
    %252 = tpu.matmul %251, %234, %cst_123 {dimension_numbers = #tpu.dot_dimension_numbers<[1], [0], [0], [1], [0, 0, 1, 1], [], []>} : vector<8x8xf32>, vector<8x8xf32>, vector<8x8xf32> -> vector<8x8xf32>
    %253 = tpu.concatenate %189, %210, %231, %252 in 1 : vector<8x8xf32>, vector<8x8xf32>, vector<8x8xf32>, vector<8x8xf32> -> vector<8x32xf32>
    %c3_124 = arith.constant 3 : index
    %c0_125 = arith.constant 0 : index
    %c0_126 = arith.constant 0 : index
    %254 = vector.load %arg7[%c3_124, %c0_125, %c0_126] : memref<4x32x32xf32, #tpu.memory_space<vmem>>, vector<1x32x32xf32>
    %255 = vector.shape_cast %254 : vector<1x32x32xf32> to vector<32x32xf32>
    %cst_127 = arith.constant dense<0.000000e+00> : vector<8x32xf32>
    %256 = tpu.matmul %253, %255, %cst_127 {dimension_numbers = #tpu.dot_dimension_numbers<[1], [0], [0], [1], [0, 0, 1, 1], [], []>} : vector<8x32xf32>, vector<32x32xf32>, vector<8x32xf32> -> vector<8x32xf32>
    %c3_128 = arith.constant 3 : index
    %c0_129 = arith.constant 0 : index
    %c0_130 = arith.constant 0 : index
    %257 = vector.load %arg8[%c3_128, %c0_129, %c0_130] : memref<4x1x32xf32, #tpu.memory_space<vmem>>, vector<1x1x32xf32>
    %258 = vector.shape_cast %257 : vector<1x1x32xf32> to vector<1x32xf32>
    %259 = vector.broadcast %258 : vector<1x32xf32> to vector<8x32xf32>
    %260 = arith.addf %256, %259 : vector<8x32xf32>
    %261 = arith.addf %260, %145 : vector<8x32xf32>
    %c1_131 = arith.constant 1 : index
    %c0_132 = arith.constant 0 : index
    %c0_133 = arith.constant 0 : index
    %262 = vector.load %arg13[%c1_131, %c0_132, %c0_133] : memref<3x1x32xf32, #tpu.memory_space<vmem>>, vector<1x1x32xf32>
    %263 = vector.shape_cast %262 : vector<1x1x32xf32> to vector<1x32xf32>
    %c1_134 = arith.constant 1 : index
    %c0_135 = arith.constant 0 : index
    %c0_136 = arith.constant 0 : index
    %264 = vector.load %arg14[%c1_134, %c0_135, %c0_136] : memref<3x1x32xf32, #tpu.memory_space<vmem>>, vector<1x1x32xf32>
    %265 = vector.shape_cast %264 : vector<1x1x32xf32> to vector<1x32xf32>
    %cst_137 = arith.constant dense<0.000000e+00> : vector<8xf32>
    %266 = vector.multi_reduction <add>, %261, %cst_137 [1] : vector<8x32xf32> to vector<8xf32>
    %267 = vector.shape_cast %266 : vector<8xf32> to vector<8x1xf32>
    %cst_138 = arith.constant 3.200000e+01 : f32
    %268 = vector.broadcast %cst_138 : f32 to vector<8x1xf32>
    %269 = arith.divf %267, %268 : vector<8x1xf32>
    %270 = vector.broadcast %269 : vector<8x1xf32> to vector<8x32xf32>
    %271 = arith.subf %261, %270 : vector<8x32xf32>
    %272 = arith.mulf %271, %271 : vector<8x32xf32>
    %cst_139 = arith.constant dense<0.000000e+00> : vector<8xf32>
    %273 = vector.multi_reduction <add>, %272, %cst_139 [1] : vector<8x32xf32> to vector<8xf32>
    %274 = vector.shape_cast %273 : vector<8xf32> to vector<8x1xf32>
    %cst_140 = arith.constant 3.200000e+01 : f32
    %275 = vector.broadcast %cst_140 : f32 to vector<8x1xf32>
    %276 = arith.divf %274, %275 : vector<8x1xf32>
    %277 = vector.broadcast %269 : vector<8x1xf32> to vector<8x32xf32>
    %278 = arith.subf %261, %277 : vector<8x32xf32>
    %279 = vector.broadcast %263 : vector<1x32xf32> to vector<8x32xf32>
    %280 = arith.mulf %279, %278 : vector<8x32xf32>
    %cst_141 = arith.constant 9.99999996E-13 : f32
    %281 = vector.broadcast %cst_141 : f32 to vector<8x1xf32>
    %282 = arith.addf %276, %281 : vector<8x1xf32>
    %283 = math.sqrt %282 : vector<8x1xf32>
    %284 = vector.broadcast %283 : vector<8x1xf32> to vector<8x32xf32>
    %285 = arith.divf %280, %284 : vector<8x32xf32>
    %286 = vector.broadcast %265 : vector<1x32xf32> to vector<8x32xf32>
    %287 = arith.addf %285, %286 : vector<8x32xf32>
    %c0_142 = arith.constant 0 : index
    %c0_143 = arith.constant 0 : index
    %288 = vector.load %arg9[%c0_142, %c0_143] : memref<32x64xf32, #tpu.memory_space<vmem>>, vector<32x64xf32>
    %cst_144 = arith.constant dense<0.000000e+00> : vector<8x64xf32>
    %289 = tpu.matmul %287, %288, %cst_144 {dimension_numbers = #tpu.dot_dimension_numbers<[1], [0], [0], [1], [0, 0, 1, 1], [], []>} : vector<8x32xf32>, vector<32x64xf32>, vector<8x64xf32> -> vector<8x64xf32>
    %c0_145 = arith.constant 0 : index
    %c0_146 = arith.constant 0 : index
    %290 = vector.load %arg10[%c0_145, %c0_146] : memref<1x64xf32, #tpu.memory_space<vmem>>, vector<1x64xf32>
    %291 = vector.broadcast %290 : vector<1x64xf32> to vector<8x64xf32>
    %292 = arith.addf %289, %291 : vector<8x64xf32>
    %cst_147 = arith.constant 0.000000e+00 : f32
    %293 = vector.broadcast %cst_147 : f32 to vector<8x64xf32>
    %294 = arith.maximumf %292, %293 : vector<8x64xf32>
    %c0_148 = arith.constant 0 : index
    %c0_149 = arith.constant 0 : index
    %295 = vector.load %arg11[%c0_148, %c0_149] : memref<64x32xf32, #tpu.memory_space<vmem>>, vector<64x32xf32>
    %cst_150 = arith.constant dense<0.000000e+00> : vector<8x32xf32>
    %296 = tpu.matmul %294, %295, %cst_150 {dimension_numbers = #tpu.dot_dimension_numbers<[1], [0], [0], [1], [0, 0, 1, 1], [], []>} : vector<8x64xf32>, vector<64x32xf32>, vector<8x32xf32> -> vector<8x32xf32>
    %c0_151 = arith.constant 0 : index
    %c0_152 = arith.constant 0 : index
    %297 = vector.load %arg12[%c0_151, %c0_152] : memref<1x32xf32, #tpu.memory_space<vmem>>, vector<1x32xf32>
    %298 = vector.broadcast %297 : vector<1x32xf32> to vector<8x32xf32>
    %299 = arith.addf %296, %298 : vector<8x32xf32>
    %300 = arith.addf %299, %287 : vector<8x32xf32>
    %c2_153 = arith.constant 2 : index
    %c0_154 = arith.constant 0 : index
    %c0_155 = arith.constant 0 : index
    %301 = vector.load %arg13[%c2_153, %c0_154, %c0_155] : memref<3x1x32xf32, #tpu.memory_space<vmem>>, vector<1x1x32xf32>
    %302 = vector.shape_cast %301 : vector<1x1x32xf32> to vector<1x32xf32>
    %c2_156 = arith.constant 2 : index
    %c0_157 = arith.constant 0 : index
    %c0_158 = arith.constant 0 : index
    %303 = vector.load %arg14[%c2_156, %c0_157, %c0_158] : memref<3x1x32xf32, #tpu.memory_space<vmem>>, vector<1x1x32xf32>
    %304 = vector.shape_cast %303 : vector<1x1x32xf32> to vector<1x32xf32>
    %cst_159 = arith.constant dense<0.000000e+00> : vector<8xf32>
    %305 = vector.multi_reduction <add>, %300, %cst_159 [1] : vector<8x32xf32> to vector<8xf32>
    %306 = vector.shape_cast %305 : vector<8xf32> to vector<8x1xf32>
    %cst_160 = arith.constant 3.200000e+01 : f32
    %307 = vector.broadcast %cst_160 : f32 to vector<8x1xf32>
    %308 = arith.divf %306, %307 : vector<8x1xf32>
    %309 = vector.broadcast %308 : vector<8x1xf32> to vector<8x32xf32>
    %310 = arith.subf %300, %309 : vector<8x32xf32>
    %311 = arith.mulf %310, %310 : vector<8x32xf32>
    %cst_161 = arith.constant dense<0.000000e+00> : vector<8xf32>
    %312 = vector.multi_reduction <add>, %311, %cst_161 [1] : vector<8x32xf32> to vector<8xf32>
    %313 = vector.shape_cast %312 : vector<8xf32> to vector<8x1xf32>
    %cst_162 = arith.constant 3.200000e+01 : f32
    %314 = vector.broadcast %cst_162 : f32 to vector<8x1xf32>
    %315 = arith.divf %313, %314 : vector<8x1xf32>
    %316 = vector.broadcast %308 : vector<8x1xf32> to vector<8x32xf32>
    %317 = arith.subf %300, %316 : vector<8x32xf32>
    %318 = vector.broadcast %302 : vector<1x32xf32> to vector<8x32xf32>
    %319 = arith.mulf %318, %317 : vector<8x32xf32>
    %cst_163 = arith.constant 9.99999996E-13 : f32
    %320 = vector.broadcast %cst_163 : f32 to vector<8x1xf32>
    %321 = arith.addf %315, %320 : vector<8x1xf32>
    %322 = math.sqrt %321 : vector<8x1xf32>
    %323 = vector.broadcast %322 : vector<8x1xf32> to vector<8x32xf32>
    %324 = arith.divf %319, %323 : vector<8x32xf32>
    %325 = vector.broadcast %304 : vector<1x32xf32> to vector<8x32xf32>
    %326 = arith.addf %324, %325 : vector<8x32xf32>
    %c0_164 = arith.constant 0 : index
    %c0_165 = arith.constant 0 : index
    %c0_166 = arith.constant 0 : index
    %327 = vector.load %arg15[%c0_164, %c0_165, %c0_166] : memref<1x8x32xf32, #tpu.memory_space<vmem>>, vector<1x8x32xf32>
    %328 = vector.shape_cast %327 : vector<1x8x32xf32> to vector<8x32xf32>
    %329 = vector.shape_cast %326 : vector<8x32xf32> to vector<1x8x32xf32>
    tpu.vector_store %arg15[%c0_164, %c0_165, %c0_166], %329 {strides = array<i32>} : memref<1x8x32xf32, #tpu.memory_space<vmem>>, vector<1x8x32xf32>,
    return
  }
  func.func @transform_0(%arg0: i32) -> (i32, i32, i32) {
    %c0_i32 = arith.constant 0 : i32
    %c0_i32_0 = arith.constant 0 : i32
    %c0_i32_1 = arith.constant 0 : i32
    return %arg0, %c0_i32, %c0_i32_0 : i32, i32, i32
  }
  func.func @transform_1(%arg0: i32) -> (i32, i32, i32) {
    %c0_i32 = arith.constant 0 : i32
    %c0_i32_0 = arith.constant 0 : i32
    %c0_i32_1 = arith.constant 0 : i32
    return %arg0, %c0_i32, %c0_i32_0 : i32, i32, i32
  }
  func.func @transform_2(%arg0: i32) -> (i32, i32, i32, i32) {
    %c0_i32 = arith.constant 0 : i32
    %c0_i32_0 = arith.constant 0 : i32
    %c0_i32_1 = arith.constant 0 : i32
    %c0_i32_2 = arith.constant 0 : i32
    return %arg0, %c0_i32, %c0_i32_0, %c0_i32_1 : i32, i32, i32, i32
  }
  func.func @transform_3(%arg0: i32) -> (i32, i32, i32, i32) {
    %c0_i32 = arith.constant 0 : i32
    %c0_i32_0 = arith.constant 0 : i32
    %c0_i32_1 = arith.constant 0 : i32
    %c0_i32_2 = arith.constant 0 : i32
    return %arg0, %c0_i32, %c0_i32_0, %c0_i32_1 : i32, i32, i32, i32
  }
  func.func @transform_4(%arg0: i32) -> (i32, i32, i32) {
    %c0_i32 = arith.constant 0 : i32
    %c0_i32_0 = arith.constant 0 : i32
    %c0_i32_1 = arith.constant 0 : i32
    %c0_i32_2 = arith.constant 0 : i32
    return %c0_i32, %c0_i32_0, %c0_i32_1 : i32, i32, i32
  }
  func.func @transform_5(%arg0: i32) -> (i32, i32, i32) {
    %c0_i32 = arith.constant 0 : i32
    %c0_i32_0 = arith.constant 0 : i32
    %c0_i32_1 = arith.constant 0 : i32
    %c0_i32_2 = arith.constant 0 : i32
    return %c0_i32, %c0_i32_0, %c0_i32_1 : i32, i32, i32
  }
  func.func @transform_6(%arg0: i32) -> (i32, i32, i32) {
    %c0_i32 = arith.constant 0 : i32
    %c0_i32_0 = arith.constant 0 : i32
    %c0_i32_1 = arith.constant 0 : i32
    %c0_i32_2 = arith.constant 0 : i32
    return %c0_i32, %c0_i32_0, %c0_i32_1 : i32, i32, i32
  }
  func.func @transform_7(%arg0: i32) -> (i32, i32, i32) {
    %c0_i32 = arith.constant 0 : i32
    %c0_i32_0 = arith.constant 0 : i32
    %c0_i32_1 = arith.constant 0 : i32
    %c0_i32_2 = arith.constant 0 : i32
    return %c0_i32, %c0_i32_0, %c0_i32_1 : i32, i32, i32
  }
  func.func @transform_8(%arg0: i32) -> (i32, i32) {
    %c0_i32 = arith.constant 0 : i32
    %c0_i32_0 = arith.constant 0 : i32
    %c0_i32_1 = arith.constant 0 : i32
    return %c0_i32, %c0_i32_0 : i32, i32
  }
  func.func @transform_9(%arg0: i32) -> (i32, i32) {
    %c0_i32 = arith.constant 0 : i32
    %c0_i32_0 = arith.constant 0 : i32
    %c0_i32_1 = arith.constant 0 : i32
    return %c0_i32, %c0_i32_0 : i32, i32
  }
  func.func @transform_10(%arg0: i32) -> (i32, i32) {
    %c0_i32 = arith.constant 0 : i32
    %c0_i32_0 = arith.constant 0 : i32
    %c0_i32_1 = arith.constant 0 : i32
    return %c0_i32, %c0_i32_0 : i32, i32
  }
  func.func @transform_11(%arg0: i32) -> (i32, i32) {
    %c0_i32 = arith.constant 0 : i32
    %c0_i32_0 = arith.constant 0 : i32
    %c0_i32_1 = arith.constant 0 : i32
    return %c0_i32, %c0_i32_0 : i32, i32
  }
  func.func @transform_12(%arg0: i32) -> (i32, i32, i32) {
    %c0_i32 = arith.constant 0 : i32
    %c0_i32_0 = arith.constant 0 : i32
    %c0_i32_1 = arith.constant 0 : i32
    %c0_i32_2 = arith.constant 0 : i32
    return %c0_i32, %c0_i32_0, %c0_i32_1 : i32, i32, i32
  }
  func.func @transform_13(%arg0: i32) -> (i32, i32, i32) {
    %c0_i32 = arith.constant 0 : i32
    %c0_i32_0 = arith.constant 0 : i32
    %c0_i32_1 = arith.constant 0 : i32
    %c0_i32_2 = arith.constant 0 : i32
    return %c0_i32, %c0_i32_0, %c0_i32_1 : i32, i32, i32
  }
  func.func @transform_14(%arg0: i32) -> (i32, i32, i32) {
    %c0_i32 = arith.constant 0 : i32
    %c0_i32_0 = arith.constant 0 : i32
    %c0_i32_1 = arith.constant 0 : i32
    return %arg0, %c0_i32, %c0_i32_0 : i32, i32, i32
  }
}

module attributes {stable_mosaic.version = 11 : i64} {
  func.func @_linear_kernel(%arg0: i32, %arg1: i32, %arg2: memref<16x32xf32, #tpu.memory_space<vmem>>, %arg3: memref<32x128xf32, #tpu.memory_space<vmem>>, %arg4: memref<1x128xf32, #tpu.memory_space<vmem>>, %arg5: memref<16x128xf32, #tpu.memory_space<vmem>>) attributes {dimension_semantics = [#tpu.dimension_semantics<parallel>, #tpu.dimension_semantics<parallel>], iteration_bounds = array<i64: 1, 1>, scalar_prefetch = 0 : i64, scratch_operands = 0 : i64, tpu.core_type = #tpu.core_type<tc>, window_params = [{transform_indices = @transform_0, window_bounds = array<i64: 16, 32>}, {transform_indices = @transform_1, window_bounds = array<i64: 32, 128>}, {transform_indices = @transform_2, window_bounds = array<i64: 1, 128>}, {transform_indices = @transform_3, window_bounds = array<i64: 16, 128>}]} {
    %c0 = arith.constant 0 : index
    %c0_0 = arith.constant 0 : index
    %0 = vector.load %arg2[%c0, %c0_0] : memref<16x32xf32, #tpu.memory_space<vmem>>, vector<16x32xf32>
    %c0_1 = arith.constant 0 : index
    %c0_2 = arith.constant 0 : index
    %1 = vector.load %arg3[%c0_1, %c0_2] : memref<32x128xf32, #tpu.memory_space<vmem>>, vector<32x128xf32>
    %cst = arith.constant dense<0.000000e+00> : vector<16x128xf32>
    %2 = tpu.matmul %0, %1, %cst {dimension_numbers = #tpu.dot_dimension_numbers<[1], [0], [0], [1], [0, 0, 1, 1], [], []>} : vector<16x32xf32>, vector<32x128xf32>, vector<16x128xf32> -> vector<16x128xf32>
    %c0_3 = arith.constant 0 : index
    %c0_4 = arith.constant 0 : index
    %3 = vector.load %arg4[%c0_3, %c0_4] : memref<1x128xf32, #tpu.memory_space<vmem>>, vector<1x128xf32>
    %4 = vector.broadcast %3 : vector<1x128xf32> to vector<16x128xf32>
    %5 = arith.addf %2, %4 : vector<16x128xf32>
    %c0_5 = arith.constant 0 : index
    %c0_6 = arith.constant 0 : index
    %6 = vector.load %arg5[%c0_5, %c0_6] : memref<16x128xf32, #tpu.memory_space<vmem>>, vector<16x128xf32>
    tpu.vector_store %arg5[%c0_5, %c0_6], %5 {strides = array<i32>} : memref<16x128xf32, #tpu.memory_space<vmem>>, vector<16x128xf32>,
    return
  }
  func.func @transform_0(%arg0: i32, %arg1: i32) -> (i32, i32) {
    %c0_i32 = arith.constant 0 : i32
    %c0_i32_0 = arith.constant 0 : i32
    return %arg0, %c0_i32 : i32, i32
  }
  func.func @transform_1(%arg0: i32, %arg1: i32) -> (i32, i32) {
    %c0_i32 = arith.constant 0 : i32
    %c0_i32_0 = arith.constant 0 : i32
    return %c0_i32, %arg1 : i32, i32
  }
  func.func @transform_2(%arg0: i32, %arg1: i32) -> (i32, i32) {
    %c0_i32 = arith.constant 0 : i32
    %c0_i32_0 = arith.constant 0 : i32
    return %c0_i32, %arg1 : i32, i32
  }
  func.func @transform_3(%arg0: i32, %arg1: i32) -> (i32, i32) {
    %c0_i32 = arith.constant 0 : i32
    return %arg0, %arg1 : i32, i32
  }
}

module attributes {stable_mosaic.version = 11 : i64} {
  func.func @_layer_kernel(%arg0: i32, %arg1: memref<1x8x32xf32, #tpu.memory_space<vmem>>, %arg2: memref<1x8x32xf32, #tpu.memory_space<vmem>>, %arg3: memref<1x1x8x8xi32, #tpu.memory_space<vmem>>, %arg4: memref<1x1x8x8xi32, #tpu.memory_space<vmem>>, %arg5: memref<4x32x32xf32, #tpu.memory_space<vmem>>, %arg6: memref<4x1x32xf32, #tpu.memory_space<vmem>>, %arg7: memref<4x32x32xf32, #tpu.memory_space<vmem>>, %arg8: memref<4x1x32xf32, #tpu.memory_space<vmem>>, %arg9: memref<32x64xf32, #tpu.memory_space<vmem>>, %arg10: memref<1x64xf32, #tpu.memory_space<vmem>>, %arg11: memref<64x32xf32, #tpu.memory_space<vmem>>, %arg12: memref<1x32xf32, #tpu.memory_space<vmem>>, %arg13: memref<3x1x32xf32, #tpu.memory_space<vmem>>, %arg14: memref<3x1x32xf32, #tpu.memory_space<vmem>>, %arg15: memref<1x8x32xf32, #tpu.memory_space<vmem>>) attributes {dimension_semantics = [#tpu.dimension_semantics<parallel>], iteration_bounds = array<i64: 2>, scalar_prefetch = 0 : i64, scratch_operands = 0 : i64, tpu.core_type = #tpu.core_type<tc>, window_params = [{transform_indices = @transform_0, window_bounds = array<i64: 1, 8, 32>}, {transform_indices = @transform_1, window_bounds = array<i64: 1, 8, 32>}, {transform_indices = @transform_2, window_bounds = array<i64: 1, 1, 8, 8>}, {transform_indices = @transform_3, window_bounds = array<i64: 1, 1, 8, 8>}, {pipeline_mode = #tpu.pipeline_mode<synchronous>, transform_indices = @transform_4, window_bounds = array<i64: 4, 32, 32>}, {pipeline_mode = #tpu.pipeline_mode<synchronous>, transform_indices = @transform_5, window_bounds = array<i64: 4, 1, 32>}, {pipeline_mode = #tpu.pipeline_mode<synchronous>, transform_indices = @transform_6, window_bounds = array<i64: 4, 32, 32>}, {pipeline_mode = #tpu.pipeline_mode<synchronous>, transform_indices = @transform_7, window_bounds = array<i64: 4, 1, 32>}, {pipeline_mode = #tpu.pipeline_mode<synchronous>, transform_indices = @transform_8, window_bounds = array<i64: 32, 64>}, {pipeline_mode = #tpu.pipeline_mode<synchronous>, transform_indices = @transform_9, window_bounds = array<i64: 1, 64>}, {pipeline_mode = #tpu.pipeline_mode<synchronous>, transform_indices = @transform_10, window_bounds = array<i64: 64, 32>}, {pipeline_mode = #tpu.pipeline_mode<synchronous>, transform_indices = @transform_11, window_bounds = array<i64: 1, 32>}, {pipeline_mode = #tpu.pipeline_mode<synchronous>, transform_indices = @transform_12, window_bounds = array<i64: 3, 1, 32>}, {pipeline_mode = #tpu.pipeline_mode<synchronous>, transform_indices = @transform_13, window_bounds = array<i64: 3, 1, 32>}, {transform_indices = @transform_14, window_bounds = array<i64: 1, 8, 32>}]} {
    %c0 = arith.constant 0 : index
    %c0_0 = arith.constant 0 : index
    %c0_1 = arith.constant 0 : index
    %0 = vector.load %arg1[%c0, %c0_0, %c0_1] : memref<1x8x32xf32, #tpu.memory_space<vmem>>, vector<1x8x32xf32>
    %1 = vector.shape_cast %0 : vector<1x8x32xf32> to vector<8x32xf32>
    %c0_2 = arith.constant 0 : index
    %c0_3 = arith.constant 0 : index
    %c0_4 = arith.constant 0 : index
    %2 = vector.load %arg2[%c0_2, %c0_3, %c0_4] : memref<1x8x32xf32, #tpu.memory_space<vmem>>, vector<1x8x32xf32>
    %3 = vector.shape_cast %2 : vector<1x8x32xf32> to vector<8x32xf32>
    %c0_5 = arith.constant 0 : index
    %c0_6 = arith.constant 0 : index
    %c0_7 = arith.constant 0 : index
    %c0_8 = arith.constant 0 : index
    %4 = vector.load %arg3[%c0_5, %c0_6, %c0_7, %c0_8] : memref<1x1x8x8xi32, #tpu.memory_space<vmem>>, vector<1x1x8x8xi32>
    %5 = vector.shape_cast %4 : vector<1x1x8x8xi32> to vector<8x8xi32>
    %c0_9 = arith.constant 0 : index
    %c0_10 = arith.constant 0 : index
    %c0_11 = arith.constant 0 : index
    %6 = vector.load %arg5[%c0_9, %c0_10, %c0_11] : memref<4x32x32xf32, #tpu.memory_space<vmem>>, vector<1x32x32xf32>
    %7 = vector.shape_cast %6 : vector<1x32x32xf32> to vector<32x32xf32>
    %cst = arith.constant dense<0.000000e+00> : vector<8x32xf32>
    %8 = tpu.matmul %1, %7, %cst {dimension_numbers = #tpu.dot_dimension_numbers<[1], [0], [0], [1], [0, 0, 1, 1], [], []>} : vector<8x32xf32>, vector<32x32xf32>, vector<8x32xf32> -> vector<8x32xf32>
    %c0_12 = arith.constant 0 : index
    %c0_13 = arith.constant 0 : index
    %c0_14 = arith.constant 0 : index
    %9 = vector.load %arg6[%c0_12, %c0_13, %c0_14] : memref<4x1x32xf32, #tpu.memory_space<vmem>>, vector<1x1x32xf32>
    %10 = vector.shape_cast %9 : vector<1x1x32xf32> to vector<1x32xf32>
    %11 = vector.broadcast %10 : vector<1x32xf32> to vector<8x32xf32>
    %12 = arith.addf %8, %11 : vector<8x32xf32>
    %c1 = arith.constant 1 : index
    %c0_15 = arith.constant 0 : index
    %c0_16 = arith.constant 0 : index
    %13 = vector.load %arg5[%c1, %c0_15, %c0_16] : memref<4x32x32xf32, #tpu.memory_space<vmem>>, vector<1x32x32xf32>
    %14 = vector.shape_cast %13 : vector<1x32x32xf32> to vector<32x32xf32>
    %cst_17 = arith.constant dense<0.000000e+00> : vector<8x32xf32>
    %15 = tpu.matmul %1, %14, %cst_17 {dimension_numbers = #tpu.dot_dimension_numbers<[1], [0], [0], [1], [0, 0, 1, 1], [], []>} : vector<8x32xf32>, vector<32x32xf32>, vector<8x32xf32> -> vector<8x32xf32>
    %c1_18 = arith.constant 1 : index
    %c0_19 = arith.constant 0 : index
    %c0_20 = arith.constant 0 : index
    %16 = vector.load %arg6[%c1_18, %c0_19, %c0_20] : memref<4x1x32xf32, #tpu.memory_space<vmem>>, vector<1x1x32xf32>
    %17 = vector.shape_cast %16 : vector<1x1x32xf32> to vector<1x32xf32>
    %18 = vector.broadcast %17 : vector<1x32xf32> to vector<8x32xf32>
    %19 = arith.addf %15, %18 : vector<8x32xf32>
    %c2 = arith.constant 2 : index
    %c0_21 = arith.constant 0 : index
    %c0_22 = arith.constant 0 : index
    %20 = vector.load %arg5[%c2, %c0_21, %c0_22] : memref<4x32x32xf32, #tpu.memory_space<vmem>>, vector<1x32x32xf32>
    %21 = vector.shape_cast %20 : vector<1x32x32xf32> to vector<32x32xf32>
    %cst_23 = arith.constant dense<0.000000e+00> : vector<8x32xf32>
    %22 = tpu.matmul %1, %21, %cst_23 {dimension_numbers = #tpu.dot_dimension_numbers<[1], [0], [0], [1], [0, 0, 1, 1], [], []>} : vector<8x32xf32>, vector<32x32xf32>, vector<8x32xf32> -> vector<8x32xf32>
    %c2_24 = arith.constant 2 : index
    %c0_25 = arith.constant 0 : index
    %c0_26 = arith.constant 0 : index
    %23 = vector.load %arg6[%c2_24, %c0_25, %c0_26] : memref<4x1x32xf32, #tpu.memory_space<vmem>>, vector<1x1x32xf32>
    %24 = vector.shape_cast %23 : vector<1x1x32xf32> to vector<1x32xf32>
    %25 = vector.broadcast %24 : vector<1x32xf32> to vector<8x32xf32>
    %26 = arith.addf %22, %25 : vector<8x32xf32>
    %27 = vector.extract_strided_slice %12 {offsets = [0, 0], sizes = [8, 8], strides = [1, 1]} : vector<8x32xf32> to vector<8x8xf32>
    %28 = vector.extract_strided_slice %19 {offsets = [0, 0], sizes = [8, 8], strides = [1, 1]} : vector<8x32xf32> to vector<8x8xf32>
    %29 = vector.extract_strided_slice %26 {offsets = [0, 0], sizes = [8, 8], strides = [1, 1]} : vector<8x32xf32> to vector<8x8xf32>
    %cst_27 = arith.constant dense<0.000000e+00> : vector<8x8xf32>
    %30 = tpu.matmul %27, %28, %cst_27 {dimension_numbers = #tpu.dot_dimension_numbers<[1], [1], [0], [0], [0, 0, 1, 0], [], []>} : vector<8x8xf32>, vector<8x8xf32>, vector<8x8xf32> -> vector<8x8xf32>
    %cst_28 = arith.constant 0.353553385 : f32
    %31 = vector.broadcast %cst_28 : f32 to vector<8x8xf32>
    %32 = arith.mulf %30, %31 : vector<8x8xf32>
    %c0_i32 = arith.constant 0 : i32
    %33 = vector.broadcast %c0_i32 : i32 to vector<8x8xi32>
    %34 = arith.cmpi eq, %5, %33 : vector<8x8xi32>
    %cst_29 = arith.constant -1.000000e+04 : f32
    %35 = vector.broadcast %cst_29 : f32 to vector<8x8xf32>
    %36 = arith.select %34, %35, %32 : vector<8x8xi1>, vector<8x8xf32>
    %cst_30 = arith.constant dense<0xFF800000> : vector<8xf32>
    %37 = vector.multi_reduction <maximumf>, %36, %cst_30 [1] : vector<8x8xf32> to vector<8xf32>
    %38 = vector.shape_cast %37 : vector<8xf32> to vector<8x1xf32>
    %39 = vector.broadcast %38 : vector<8x1xf32> to vector<8x8xf32>
    %40 = arith.subf %36, %39 : vector<8x8xf32>
    %41 = math.exp %40 : vector<8x8xf32>
    %cst_31 = arith.constant dense<0.000000e+00> : vector<8xf32>
    %42 = vector.multi_reduction <add>, %41, %cst_31 [1] : vector<8x8xf32> to vector<8xf32>
    %43 = vector.shape_cast %42 : vector<8xf32> to vector<8x1xf32>
    %44 = tpu.reciprocal %43 : vector<8x1xf32> -> vector<8x1xf32>
    %45 = vector.broadcast %44 : vector<8x1xf32> to vector<8x8xf32>
    %46 = arith.mulf %41, %45 : vector<8x8xf32>
    %cst_32 = arith.constant dense<0.000000e+00> : vector<8x8xf32>
    %47 = tpu.matmul %46, %29, %cst_32 {dimension_numbers = #tpu.dot_dimension_numbers<[1], [0], [0], [1], [0, 0, 1, 1], [], []>} : vector<8x8xf32>, vector<8x8xf32>, vector<8x8xf32> -> vector<8x8xf32>
    %48 = vector.extract_strided_slice %12 {offsets = [0, 8], sizes = [8, 8], strides = [1, 1]} : vector<8x32xf32> to vector<8x8xf32>
    %49 = vector.extract_strided_slice %19 {offsets = [0, 8], sizes = [8, 8], strides = [1, 1]} : vector<8x32xf32> to vector<8x8xf32>
    %50 = vector.extract_strided_slice %26 {offsets = [0, 8], sizes = [8, 8], strides = [1, 1]} : vector<8x32xf32> to vector<8x8xf32>
    %cst_33 = arith.constant dense<0.000000e+00> : vector<8x8xf32>
    %51 = tpu.matmul %48, %49, %cst_33 {dimension_numbers = #tpu.dot_dimension_numbers<[1], [1], [0], [0], [0, 0, 1, 0], [], []>} : vector<8x8xf32>, vector<8x8xf32>, vector<8x8xf32> -> vector<8x8xf32>
    %cst_34 = arith.constant 0.353553385 : f32
    %52 = vector.broadcast %cst_34 : f32 to vector<8x8xf32>
    %53 = arith.mulf %51, %52 : vector<8x8xf32>
    %c0_i32_35 = arith.constant 0 : i32
    %54 = vector.broadcast %c0_i32_35 : i32 to vector<8x8xi32>
    %55 = arith.cmpi eq, %5, %54 : vector<8x8xi32>
    %cst_36 = arith.constant -1.000000e+04 : f32
    %56 = vector.broadcast %cst_36 : f32 to vector<8x8xf32>
    %57 = arith.select %55, %56, %53 : vector<8x8xi1>, vector<8x8xf32>
    %cst_37 = arith.constant dense<0xFF800000> : vector<8xf32>
    %58 = vector.multi_reduction <maximumf>, %57, %cst_37 [1] : vector<8x8xf32> to vector<8xf32>
    %59 = vector.shape_cast %58 : vector<8xf32> to vector<8x1xf32>
    %60 = vector.broadcast %59 : vector<8x1xf32> to vector<8x8xf32>
    %61 = arith.subf %57, %60 : vector<8x8xf32>
    %62 = math.exp %61 : vector<8x8xf32>
    %cst_38 = arith.constant dense<0.000000e+00> : vector<8xf32>
    %63 = vector.multi_reduction <add>, %62, %cst_38 [1] : vector<8x8xf32> to vector<8xf32>
    %64 = vector.shape_cast %63 : vector<8xf32> to vector<8x1xf32>
    %65 = tpu.reciprocal %64 : vector<8x1xf32> -> vector<8x1xf32>
    %66 = vector.broadcast %65 : vector<8x1xf32> to vector<8x8xf32>
    %67 = arith.mulf %62, %66 : vector<8x8xf32>
    %cst_39 = arith.constant dense<0.000000e+00> : vector<8x8xf32>
    %68 = tpu.matmul %67, %50, %cst_39 {dimension_numbers = #tpu.dot_dimension_numbers<[1], [0], [0], [1], [0, 0, 1, 1], [], []>} : vector<8x8xf32>, vector<8x8xf32>, vector<8x8xf32> -> vector<8x8xf32>
    %69 = vector.extract_strided_slice %12 {offsets = [0, 16], sizes = [8, 8], strides = [1, 1]} : vector<8x32xf32> to vector<8x8xf32>
    %70 = vector.extract_strided_slice %19 {offsets = [0, 16], sizes = [8, 8], strides = [1, 1]} : vector<8x32xf32> to vector<8x8xf32>
    %71 = vector.extract_strided_slice %26 {offsets = [0, 16], sizes = [8, 8], strides = [1, 1]} : vector<8x32xf32> to vector<8x8xf32>
    %cst_40 = arith.constant dense<0.000000e+00> : vector<8x8xf32>
    %72 = tpu.matmul %69, %70, %cst_40 {dimension_numbers = #tpu.dot_dimension_numbers<[1], [1], [0], [0], [0, 0, 1, 0], [], []>} : vector<8x8xf32>, vector<8x8xf32>, vector<8x8xf32> -> vector<8x8xf32>
    %cst_41 = arith.constant 0.353553385 : f32
    %73 = vector.broadcast %cst_41 : f32 to vector<8x8xf32>
    %74 = arith.mulf %72, %73 : vector<8x8xf32>
    %c0_i32_42 = arith.constant 0 : i32
    %75 = vector.broadcast %c0_i32_42 : i32 to vector<8x8xi32>
    %76 = arith.cmpi eq, %5, %75 : vector<8x8xi32>
    %cst_43 = arith.constant -1.000000e+04 : f32
    %77 = vector.broadcast %cst_43 : f32 to vector<8x8xf32>
    %78 = arith.select %76, %77, %74 : vector<8x8xi1>, vector<8x8xf32>
    %cst_44 = arith.constant dense<0xFF800000> : vector<8xf32>
    %79 = vector.multi_reduction <maximumf>, %78, %cst_44 [1] : vector<8x8xf32> to vector<8xf32>
    %80 = vector.shape_cast %79 : vector<8xf32> to vector<8x1xf32>
    %81 = vector.broadcast %80 : vector<8x1xf32> to vector<8x8xf32>
    %82 = arith.subf %78, %81 : vector<8x8xf32>
    %83 = math.exp %82 : vector<8x8xf32>
    %cst_45 = arith.constant dense<0.000000e+00> : vector<8xf32>
    %84 = vector.multi_reduction <add>, %83, %cst_45 [1] : vector<8x8xf32> to vector<8xf32>
    %85 = vector.shape_cast %84 : vector<8xf32> to vector<8x1xf32>
    %86 = tpu.reciprocal %85 : vector<8x1xf32> -> vector<8x1xf32>
    %87 = vector.broadcast %86 : vector<8x1xf32> to vector<8x8xf32>
    %88 = arith.mulf %83, %87 : vector<8x8xf32>
    %cst_46 = arith.constant dense<0.000000e+00> : vector<8x8xf32>
    %89 = tpu.matmul %88, %71, %cst_46 {dimension_numbers = #tpu.dot_dimension_numbers<[1], [0], [0], [1], [0, 0, 1, 1], [], []>} : vector<8x8xf32>, vector<8x8xf32>, vector<8x8xf32> -> vector<8x8xf32>
    %90 = vector.extract_strided_slice %12 {offsets = [0, 24], sizes = [8, 8], strides = [1, 1]} : vector<8x32xf32> to vector<8x8xf32>
    %91 = vector.extract_strided_slice %19 {offsets = [0, 24], sizes = [8, 8], strides = [1, 1]} : vector<8x32xf32> to vector<8x8xf32>
    %92 = vector.extract_strided_slice %26 {offsets = [0, 24], sizes = [8, 8], strides = [1, 1]} : vector<8x32xf32> to vector<8x8xf32>
    %cst_47 = arith.constant dense<0.000000e+00> : vector<8x8xf32>
    %93 = tpu.matmul %90, %91, %cst_47 {dimension_numbers = #tpu.dot_dimension_numbers<[1], [1], [0], [0], [0, 0, 1, 0], [], []>} : vector<8x8xf32>, vector<8x8xf32>, vector<8x8xf32> -> vector<8x8xf32>
    %cst_48 = arith.constant 0.353553385 : f32
    %94 = vector.broadcast %cst_48 : f32 to vector<8x8xf32>
    %95 = arith.mulf %93, %94 : vector<8x8xf32>
    %c0_i32_49 = arith.constant 0 : i32
    %96 = vector.broadcast %c0_i32_49 : i32 to vector<8x8xi32>
    %97 = arith.cmpi eq, %5, %96 : vector<8x8xi32>
    %cst_50 = arith.constant -1.000000e+04 : f32
    %98 = vector.broadcast %cst_50 : f32 to vector<8x8xf32>
    %99 = arith.select %97, %98, %95 : vector<8x8xi1>, vector<8x8xf32>
    %cst_51 = arith.constant dense<0xFF800000> : vector<8xf32>
    %100 = vector.multi_reduction <maximumf>, %99, %cst_51 [1] : vector<8x8xf32> to vector<8xf32>
    %101 = vector.shape_cast %100 : vector<8xf32> to vector<8x1xf32>
    %102 = vector.broadcast %101 : vector<8x1xf32> to vector<8x8xf32>
    %103 = arith.subf %99, %102 : vector<8x8xf32>
    %104 = math.exp %103 : vector<8x8xf32>
    %cst_52 = arith.constant dense<0.000000e+00> : vector<8xf32>
    %105 = vector.multi_reduction <add>, %104, %cst_52 [1] : vector<8x8xf32> to vector<8xf32>
    %106 = vector.shape_cast %105 : vector<8xf32> to vector<8x1xf32>
    %107 = tpu.reciprocal %106 : vector<8x1xf32> -> vector<8x1xf32>
    %108 = vector.broadcast %107 : vector<8x1xf32> to vector<8x8xf32>
    %109 = arith.mulf %104, %108 : vector<8x8xf32>
    %cst_53 = arith.constant dense<0.000000e+00> : vector<8x8xf32>
    %110 = tpu.matmul %109, %92, %cst_53 {dimension_numbers = #tpu.dot_dimension_numbers<[1], [0], [0], [1], [0, 0, 1, 1], [], []>} : vector<8x8xf32>, vector<8x8xf32>, vector<8x8xf32> -> vector<8x8xf32>
    %111 = tpu.concatenate %47, %68, %89, %110 in 1 : vector<8x8xf32>, vector<8x8xf32>, vector<8x8xf32>, vector<8x8xf32> -> vector<8x32xf32>
    %c3 = arith.constant 3 : index
    %c0_54 = arith.constant 0 : index
    %c0_55 = arith.constant 0 : index
    %112 = vector.load %arg5[%c3, %c0_54, %c0_55] : memref<4x32x32xf32, #tpu.memory_space<vmem>>, vector<1x32x32xf32>
    %113 = vector.shape_cast %112 : vector<1x32x32xf32> to vector<32x32xf32>
    %cst_56 = arith.constant dense<0.000000e+00> : vector<8x32xf32>
    %114 = tpu.matmul %111, %113, %cst_56 {dimension_numbers = #tpu.dot_dimension_numbers<[1], [0], [0], [1], [0, 0, 1, 1], [], []>} : vector<8x32xf32>, vector<32x32xf32>, vector<8x32xf32> -> vector<8x32xf32>
    %c3_57 = arith.constant 3 : index
    %c0_58 = arith.constant 0 : index
    %c0_59 = arith.constant 0 : index
    %115 = vector.load %arg6[%c3_57, %c0_58, %c0_59] : memref<4x1x32xf32, #tpu.memory_space<vmem>>, vector<1x1x32xf32>
    %116 = vector.shape_cast %115 : vector<1x1x32xf32> to vector<1x32xf32>
    %117 = vector.broadcast %116 : vector<1x32xf32> to vector<8x32xf32>
    %118 = arith.addf %114, %117 : vector<8x32xf32>
    %119 = arith.addf %118, %1 : vector<8x32xf32>
    %c0_60 = arith.constant 0 : index
    %c0_61 = arith.constant 0 : index
    %c0_62 = arith.constant 0 : index
    %120 = vector.load %arg13[%c0_60, %c0_61, %c0_62] : memref<3x1x32xf32, #tpu.memory_space<vmem>>, vector<1x1x32xf32>
    %121 = vector.shape_cast %120 : vector<1x1x32xf32> to vector<1x32xf32>
    %c0_63 = arith.constant 0 : index
    %c0_64 = arith.constant 0 : index
    %c0_65 = arith.constant 0 : index
    %122 = vector.load %arg14[%c0_63, %c0_64, %c0_65] : memref<3x1x32xf32, #tpu.memory_space<vmem>>, vector<1x1x32xf32>
    %123 = vector.shape_cast %122 : vector<1x1x32xf32> to vector<1x32xf32>
    %cst_66 = arith.constant dense<0.000000e+00> : vector<8xf32>
    %124 = vector.multi_reduction <add>, %119, %cst_66 [1] : vector<8x32xf32> to vector<8xf32>
    %125 = vector.shape_cast %124 : vector<8xf32> to vector<8x1xf32>
    %cst_67 = arith.constant 3.200000e+01 : f32
    %126 = vector.broadcast %cst_67 : f32 to vector<8x1xf32>
    %127 = arith.divf %125, %126 : vector<8x1xf32>
    %128 = vector.broadcast %127 : vector<8x1xf32> to vector<8x32xf32>
    %129 = arith.subf %119, %128 : vector<8x32xf32>
    %130 = arith.mulf %129, %129 : vector<8x32xf32>
    %cst_68 = arith.constant dense<0.000000e+00> : vector<8xf32>
    %131 = vector.multi_reduction <add>, %130, %cst_68 [1] : vector<8x32xf32> to vector<8xf32>
    %132 = vector.shape_cast %131 : vector<8xf32> to vector<8x1xf32>
    %cst_69 = arith.constant 3.200000e+01 : f32
    %133 = vector.broadcast %cst_69 : f32 to vector<8x1xf32>
    %134 = arith.divf %132, %133 : vector<8x1xf32>
    %135 = vector.broadcast %127 : vector<8x1xf32> to vector<8x32xf32>
    %136 = arith.subf %119, %135 : vector<8x32xf32>
    %137 = vector.broadcast %121 : vector<1x32xf32> to vector<8x32xf32>
    %138 = arith.mulf %137, %136 : vector<8x32xf32>
    %cst_70 = arith.constant 9.99999996E-13 : f32
    %139 = vector.broadcast %cst_70 : f32 to vector<8x1xf32>
    %140 = arith.addf %134, %139 : vector<8x1xf32>
    %141 = math.sqrt %140 : vector<8x1xf32>
    %142 = vector.broadcast %141 : vector<8x1xf32> to vector<8x32xf32>
    %143 = arith.divf %138, %142 : vector<8x32xf32>
    %144 = vector.broadcast %123 : vector<1x32xf32> to vector<8x32xf32>
    %145 = arith.addf %143, %144 : vector<8x32xf32>
    %c0_71 = arith.constant 0 : index
    %c0_72 = arith.constant 0 : index
    %c0_73 = arith.constant 0 : index
    %c0_74 = arith.constant 0 : index
    %146 = vector.load %arg4[%c0_71, %c0_72, %c0_73, %c0_74] : memref<1x1x8x8xi32, #tpu.memory_space<vmem>>, vector<1x1x8x8xi32>
    %147 = vector.shape_cast %146 : vector<1x1x8x8xi32> to vector<8x8xi32>
    %c0_75 = arith.constant 0 : index
    %c0_76 = arith.constant 0 : index
    %c0_77 = arith.constant 0 : index
    %148 = vector.load %arg7[%c0_75, %c0_76, %c0_77] : memref<4x32x32xf32, #tpu.memory_space<vmem>>, vector<1x32x32xf32>
    %149 = vector.shape_cast %148 : vector<1x32x32xf32> to vector<32x32xf32>
    %cst_78 = arith.constant dense<0.000000e+00> : vector<8x32xf32>
    %150 = tpu.matmul %145, %149, %cst_78 {dimension_numbers = #tpu.dot_dimension_numbers<[1], [0], [0], [1], [0, 0, 1, 1], [], []>} : vector<8x32xf32>, vector<32x32xf32>, vector<8x32xf32> -> vector<8x32xf32>
    %c0_79 = arith.constant 0 : index
    %c0_80 = arith.constant 0 : index
    %c0_81 = arith.constant 0 : index
    %151 = vector.load %arg8[%c0_79, %c0_80, %c0_81] : memref<4x1x32xf32, #tpu.memory_space<vmem>>, vector<1x1x32xf32>
    %152 = vector.shape_cast %151 : vector<1x1x32xf32> to vector<1x32xf32>
    %153 = vector.broadcast %152 : vector<1x32xf32> to vector<8x32xf32>
    %154 = arith.addf %150, %153 : vector<8x32xf32>
    %c1_82 = arith.constant 1 : index
    %c0_83 = arith.constant 0 : index
    %c0_84 = arith.constant 0 : index
    %155 = vector.load %arg7[%c1_82, %c0_83, %c0_84] : memref<4x32x32xf32, #tpu.memory_space<vmem>>, vector<1x32x32xf32>
    %156 = vector.shape_cast %155 : vector<1x32x32xf32> to vector<32x32xf32>
    %cst_85 = arith.constant dense<0.000000e+00> : vector<8x32xf32>
    %157 = tpu.matmul %3, %156, %cst_85 {dimension_numbers = #tpu.dot_dimension_numbers<[1], [0], [0], [1], [0, 0, 1, 1], [], []>} : vector<8x32xf32>, vector<32x32xf32>, vector<8x32xf32> -> vector<8x32xf32>
    %c1_86 = arith.constant 1 : index
    %c0_87 = arith.constant 0 : index
    %c0_88 = arith.constant 0 : index
    %158 = vector.load %arg8[%c1_86, %c0_87, %c0_88] : memref<4x1x32xf32, #tpu.memory_space<vmem>>, vector<1x1x32xf32>
    %159 = vector.shape_cast %158 : vector<1x1x32xf32> to vector<1x32xf32>
    %160 = vector.broadcast %159 : vector<1x32xf32> to vector<8x32xf32>
    %161 = arith.addf %157, %160 : vector<8x32xf32>
    %c2_89 = arith.constant 2 : index
    %c0_90 = arith.constant 0 : index
    %c0_91 = arith.constant 0 : index
    %162 = vector.load %arg7[%c2_89, %c0_90, %c0_91] : memref<4x32x32xf32, #tpu.memory_space<vmem>>, vector<1x32x32xf32>
    %163 = vector.shape_cast %162 : vector<1x32x32xf32> to vector<32x32xf32>
    %cst_92 = arith.constant dense<0.000000e+00> : vector<8x32xf32>
    %164 = tpu.matmul %3, %163, %cst_92 {dimension_numbers = #tpu.dot_dimension_numbers<[1], [0], [0], [1], [0, 0, 1, 1], [], []>} : vector<8x32xf32>, vector<32x32xf32>, vector<8x32xf32> -> vector<8x32xf32>
    %c2_93 = arith.constant 2 : index
    %c0_94 = arith.constant 0 : index
    %c0_95 = arith.constant 0 : index
    %165 = vector.load %arg8[%c2_93, %c0_94, %c0_95] : memref<4x1x32xf32, #tpu.memory_space<vmem>>, vector<1x1x32xf32>
    %166 = vector.shape_cast %165 : vector<1x1x32xf32> to vector<1x32xf32>
    %167 = vector.broadcast %166 : vector<1x32xf32> to vector<8x32xf32>
    %168 = arith.addf %164, %167 : vector<8x32xf32>
    %169 = vector.extract_strided_slice %154 {offsets = [0, 0], sizes = [8, 8], strides = [1, 1]} : vector<8x32xf32> to vector<8x8xf32>
    %170 = vector.extract_strided_slice %161 {offsets = [0, 0], sizes = [8, 8], strides = [1, 1]} : vector<8x32xf32> to vector<8x8xf32>
    %171 = vector.extract_strided_slice %168 {offsets = [0, 0], sizes = [8, 8], strides = [1, 1]} : vector<8x32xf32> to vector<8x8xf32>
    %cst_96 = arith.constant dense<0.000000e+00> : vector<8x8xf32>
    %172 = tpu.matmul %169, %170, %cst_96 {dimension_numbers = #tpu.dot_dimension_numbers<[1], [1], [0], [0], [0, 0, 1, 0], [], []>} : vector<8x8xf32>, vector<8x8xf32>, vector<8x8xf32> -> vector<8x8xf32>
    %cst_97 = arith.constant 0.353553385 : f32
    %173 = vector.broadcast %cst_97 : f32 to vector<8x8xf32>
    %174 = arith.mulf %172, %173 : vector<8x8xf32>
    %c0_i32_98 = arith.constant 0 : i32
    %175 = vector.broadcast %c0_i32_98 : i32 to vector<8x8xi32>
    %176 = arith.cmpi eq, %147, %175 : vector<8x8xi32>
    %cst_99 = arith.constant -1.000000e+04 : f32
    %177 = vector.broadcast %cst_99 : f32 to vector<8x8xf32>
    %178 = arith.select %176, %177, %174 : vector<8x8xi1>, vector<8x8xf32>
    %cst_100 = arith.constant dense<0xFF800000> : vector<8xf32>
    %179 = vector.multi_reduction <maximumf>, %178, %cst_100 [1] : vector<8x8xf32> to vector<8xf32>
    %180 = vector.shape_cast %179 : vector<8xf32> to vector<8x1xf32>
    %181 = vector.broadcast %180 : vector<8x1xf32> to vector<8x8xf32>
    %182 = arith.subf %178, %181 : vector<8x8xf32>
    %183 = math.exp %182 : vector<8x8xf32>
    %cst_101 = arith.constant dense<0.000000e+00> : vector<8xf32>
    %184 = vector.multi_reduction <add>, %183, %cst_101 [1] : vector<8x8xf32> to vector<8xf32>
    %185 = vector.shape_cast %184 : vector<8xf32> to vector<8x1xf32>
    %186 = tpu.reciprocal %185 : vector<8x1xf32> -> vector<8x1xf32>
    %187 = vector.broadcast %186 : vector<8x1xf32> to vector<8x8xf32>
    %188 = arith.mulf %183, %187 : vector<8x8xf32>
    %cst_102 = arith.constant dense<0.000000e+00> : vector<8x8xf32>
    %189 = tpu.matmul %188, %171, %cst_102 {dimension_numbers = #tpu.dot_dimension_numbers<[1], [0], [0], [1], [0, 0, 1, 1], [], []>} : vector<8x8xf32>, vector<8x8xf32>, vector<8x8xf32> -> vector<8x8xf32>
    %190 = vector.extract_strided_slice %154 {offsets = [0, 8], sizes = [8, 8], strides = [1, 1]} : vector<8x32xf32> to vector<8x8xf32>
    %191 = vector.extract_strided_slice %161 {offsets = [0, 8], sizes = [8, 8], strides = [1, 1]} : vector<8x32xf32> to vector<8x8xf32>
    %192 = vector.extract_strided_slice %168 {offsets = [0, 8], sizes = [8, 8], strides = [1, 1]} : vector<8x32xf32> to vector<8x8xf32>
    %cst_103 = arith.constant dense<0.000000e+00> : vector<8x8xf32>
    %193 = tpu.matmul %190, %191, %cst_103 {dimension_numbers = #tpu.dot_dimension_numbers<[1], [1], [0], [0], [0, 0, 1, 0], [], []>} : vector<8x8xf32>, vector<8x8xf32>, vector<8x8xf32> -> vector<8x8xf32>
    %cst_104 = arith.constant 0.353553385 : f32
    %194 = vector.broadcast %cst_104 : f32 to vector<8x8xf32>
    %195 = arith.mulf %193, %194 : vector<8x8xf32>
    %c0_i32_105 = arith.constant 0 : i32
    %196 = vector.broadcast %c0_i32_105 : i32 to vector<8x8xi32>
    %197 = arith.cmpi eq, %147, %196 : vector<8x8xi32>
    %cst_106 = arith.constant -1.000000e+04 : f32
    %198 = vector.broadcast %cst_106 : f32 to vector<8x8xf32>
    %199 = arith.select %197, %198, %195 : vector<8x8xi1>, vector<8x8xf32>
    %cst_107 = arith.constant dense<0xFF800000> : vector<8xf32>
    %200 = vector.multi_reduction <maximumf>, %199, %cst_107 [1] : vector<8x8xf32> to vector<8xf32>
    %201 = vector.shape_cast %200 : vector<8xf32> to vector<8x1xf32>
    %202 = vector.broadcast %201 : vector<8x1xf32> to vector<8x8xf32>
    %203 = arith.subf %199, %202 : vector<8x8xf32>
    %204 = math.exp %203 : vector<8x8xf32>
    %cst_108 = arith.constant dense<0.000000e+00> : vector<8xf32>
    %205 = vector.multi_reduction <add>, %204, %cst_108 [1] : vector<8x8xf32> to vector<8xf32>
    %206 = vector.shape_cast %205 : vector<8xf32> to vector<8x1xf32>
    %207 = tpu.reciprocal %206 : vector<8x1xf32> -> vector<8x1xf32>
    %208 = vector.broadcast %207 : vector<8x1xf32> to vector<8x8xf32>
    %209 = arith.mulf %204, %208 : vector<8x8xf32>
    %cst_109 = arith.constant dense<0.000000e+00> : vector<8x8xf32>
    %210 = tpu.matmul %209, %192, %cst_109 {dimension_numbers = #tpu.dot_dimension_numbers<[1], [0], [0], [1], [0, 0, 1, 1], [], []>} : vector<8x8xf32>, vector<8x8xf32>, vector<8x8xf32> -> vector<8x8xf32>
    %211 = vector.extract_strided_slice %154 {offsets = [0, 16], sizes = [8, 8], strides = [1, 1]} : vector<8x32xf32> to vector<8x8xf32>
    %212 = vector.extract_strided_slice %161 {offsets = [0, 16], sizes = [8, 8], strides = [1, 1]} : vector<8x32xf32> to vector<8x8xf32>
    %213 = vector.extract_strided_slice %168 {offsets = [0, 16], sizes = [8, 8], strides = [1, 1]} : vector<8x32xf32> to vector<8x8xf32>
    %cst_110 = arith.constant dense<0.000000e+00> : vector<8x8xf32>
    %214 = tpu.matmul %211, %212, %cst_110 {dimension_numbers = #tpu.dot_dimension_numbers<[1], [1], [0], [0], [0, 0, 1, 0], [], []>} : vector<8x8xf32>, vector<8x8xf32>, vector<8x8xf32> -> vector<8x8xf32>
    %cst_111 = arith.constant 0.353553385 : f32
    %215 = vector.broadcast %cst_111 : f32 to vector<8x8xf32>
    %216 = arith.mulf %214, %215 : vector<8x8xf32>
    %c0_i32_112 = arith.constant 0 : i32
    %217 = vector.broadcast %c0_i32_112 : i32 to vector<8x8xi32>
    %218 = arith.cmpi eq, %147, %217 : vector<8x8xi32>
    %cst_113 = arith.constant -1.000000e+04 : f32
    %219 = vector.broadcast %cst_113 : f32 to vector<8x8xf32>
    %220 = arith.select %218, %219, %216 : vector<8x8xi1>, vector<8x8xf32>
    %cst_114 = arith.constant dense<0xFF800000> : vector<8xf32>
    %221 = vector.multi_reduction <maximumf>, %220, %cst_114 [1] : vector<8x8xf32> to vector<8xf32>
    %222 = vector.shape_cast %221 : vector<8xf32> to vector<8x1xf32>
    %223 = vector.broadcast %222 : vector<8x1xf32> to vector<8x8xf32>
    %224 = arith.subf %220, %223 : vector<8x8xf32>
    %225 = math.exp %224 : vector<8x8xf32>
    %cst_115 = arith.constant dense<0.000000e+00> : vector<8xf32>
    %226 = vector.multi_reduction <add>, %225, %cst_115 [1] : vector<8x8xf32> to vector<8xf32>
    %227 = vector.shape_cast %226 : vector<8xf32> to vector<8x1xf32>
    %228 = tpu.reciprocal %227 : vector<8x1xf32> -> vector<8x1xf32>
    %229 = vector.broadcast %228 : vector<8x1xf32> to vector<8x8xf32>
    %230 = arith.mulf %225, %229 : vector<8x8xf32>
    %cst_116 = arith.constant dense<0.000000e+00> : vector<8x8xf32>
    %231 = tpu.matmul %230, %213, %cst_116 {dimension_numbers = #tpu.dot_dimension_numbers<[1], [0], [0], [1], [0, 0, 1, 1], [], []>} : vector<8x8xf32>, vector<8x8xf32>, vector<8x8xf32> -> vector<8x8xf32>
    %232 = vector.extract_strided_slice %154 {offsets = [0, 24], sizes = [8, 8], strides = [1, 1]} : vector<8x32xf32> to vector<8x8xf32>
    %233 = vector.extract_strided_slice %161 {offsets = [0, 24], sizes = [8, 8], strides = [1, 1]} : vector<8x32xf32> to vector<8x8xf32>
    %234 = vector.extract_strided_slice %168 {offsets = [0, 24], sizes = [8, 8], strides = [1, 1]} : vector<8x32xf32> to vector<8x8xf32>
    %cst_117 = arith.constant dense<0.000000e+00> : vector<8x8xf32>
    %235 = tpu.matmul %232, %233, %cst_117 {dimension_numbers = #tpu.dot_dimension_numbers<[1], [1], [0], [0], [0, 0, 1, 0], [], []>} : vector<8x8xf32>, vector<8x8xf32>, vector<8x8xf32> -> vector<8x8xf32>
    %cst_118 = arith.constant 0.353553385 : f32
    %236 = vector.broadcast %cst_118 : f32 to vector<8x8xf32>
    %237 = arith.mulf %235, %236 : vector<8x8xf32>
    %c0_i32_119 = arith.constant 0 : i32
    %238 = vector.broadcast %c0_i32_119 : i32 to vector<8x8xi32>
    %239 = arith.cmpi eq, %147, %238 : vector<8x8xi32>
    %cst_120 = arith.constant -1.000000e+04 : f32
    %240 = vector.broadcast %cst_120 : f32 to vector<8x8xf32>
    %241 = arith.select %239, %240, %237 : vector<8x8xi1>, vector<8x8xf32>
    %cst_121 = arith.constant dense<0xFF800000> : vector<8xf32>
    %242 = vector.multi_reduction <maximumf>, %241, %cst_121 [1] : vector<8x8xf32> to vector<8xf32>
    %243 = vector.shape_cast %242 : vector<8xf32> to vector<8x1xf32>
    %244 = vector.broadcast %243 : vector<8x1xf32> to vector<8x8xf32>
    %245 = arith.subf %241, %244 : vector<8x8xf32>
    %246 = math.exp %245 : vector<8x8xf32>
    %cst_122 = arith.constant dense<0.000000e+00> : vector<8xf32>
    %247 = vector.multi_reduction <add>, %246, %cst_122 [1] : vector<8x8xf32> to vector<8xf32>
    %248 = vector.shape_cast %247 : vector<8xf32> to vector<8x1xf32>
    %249 = tpu.reciprocal %248 : vector<8x1xf32> -> vector<8x1xf32>
    %250 = vector.broadcast %249 : vector<8x1xf32> to vector<8x8xf32>
    %251 = arith.mulf %246, %250 : vector<8x8xf32>
    %cst_123 = arith.constant dense<0.000000e+00> : vector<8x8xf32>
    %252 = tpu.matmul %251, %234, %cst_123 {dimension_numbers = #tpu.dot_dimension_numbers<[1], [0], [0], [1], [0, 0, 1, 1], [], []>} : vector<8x8xf32>, vector<8x8xf32>, vector<8x8xf32> -> vector<8x8xf32>
    %253 = tpu.concatenate %189, %210, %231, %252 in 1 : vector<8x8xf32>, vector<8x8xf32>, vector<8x8xf32>, vector<8x8xf32> -> vector<8x32xf32>
    %c3_124 = arith.constant 3 : index
    %c0_125 = arith.constant 0 : index
    %c0_126 = arith.constant 0 : index
    %254 = vector.load %arg7[%c3_124, %c0_125, %c0_126] : memref<4x32x32xf32, #tpu.memory_space<vmem>>, vector<1x32x32xf32>
    %255 = vector.shape_cast %254 : vector<1x32x32xf32> to vector<32x32xf32>
    %cst_127 = arith.constant dense<0.000000e+00> : vector<8x32xf32>
    %256 = tpu.matmul %253, %255, %cst_127 {dimension_numbers = #tpu.dot_dimension_numbers<[1], [0], [0], [1], [0, 0, 1, 1], [], []>} : vector<8x32xf32>, vector<32x32xf32>, vector<8x32xf32> -> vector<8x32xf32>
    %c3_128 = arith.constant 3 : index
    %c0_129 = arith.constant 0 : index
    %c0_130 = arith.constant 0 : index
    %257 = vector.load %arg8[%c3_128, %c0_129, %c0_130] : memref<4x1x32xf32, #tpu.memory_space<vmem>>, vector<1x1x32xf32>
    %258 = vector.shape_cast %257 : vector<1x1x32xf32> to vector<1x32xf32>
    %259 = vector.broadcast %258 : vector<1x32xf32> to vector<8x32xf32>
    %260 = arith.addf %256, %259 : vector<8x32xf32>
    %261 = arith.addf %260, %145 : vector<8x32xf32>
    %c1_131 = arith.constant 1 : index
    %c0_132 = arith.constant 0 : index
    %c0_133 = arith.constant 0 : index
    %262 = vector.load %arg13[%c1_131, %c0_132, %c0_133] : memref<3x1x32xf32, #tpu.memory_space<vmem>>, vector<1x1x32xf32>
    %263 = vector.shape_cast %262 : vector<1x1x32xf32> to vector<1x32xf32>
    %c1_134 = arith.constant 1 : index
    %c0_135 = arith.constant 0 : index
    %c0_136 = arith.constant 0 : index
    %264 = vector.load %arg14[%c1_134, %c0_135, %c0_136] : memref<3x1x32xf32, #tpu.memory_space<vmem>>, vector<1x1x32xf32>
    %265 = vector.shape_cast %264 : vector<1x1x32xf32> to vector<1x32xf32>
    %cst_137 = arith.constant dense<0.000000e+00> : vector<8xf32>
    %266 = vector.multi_reduction <add>, %261, %cst_137 [1] : vector<8x32xf32> to vector<8xf32>
    %267 = vector.shape_cast %266 : vector<8xf32> to vector<8x1xf32>
    %cst_138 = arith.constant 3.200000e+01 : f32
    %268 = vector.broadcast %cst_138 : f32 to vector<8x1xf32>
    %269 = arith.divf %267, %268 : vector<8x1xf32>
    %270 = vector.broadcast %269 : vector<8x1xf32> to vector<8x32xf32>
    %271 = arith.subf %261, %270 : vector<8x32xf32>
    %272 = arith.mulf %271, %271 : vector<8x32xf32>
    %cst_139 = arith.constant dense<0.000000e+00> : vector<8xf32>
    %273 = vector.multi_reduction <add>, %272, %cst_139 [1] : vector<8x32xf32> to vector<8xf32>
    %274 = vector.shape_cast %273 : vector<8xf32> to vector<8x1xf32>
    %cst_140 = arith.constant 3.200000e+01 : f32
    %275 = vector.broadcast %cst_140 : f32 to vector<8x1xf32>
    %276 = arith.divf %274, %275 : vector<8x1xf32>
    %277 = vector.broadcast %269 : vector<8x1xf32> to vector<8x32xf32>
    %278 = arith.subf %261, %277 : vector<8x32xf32>
    %279 = vector.broadcast %263 : vector<1x32xf32> to vector<8x32xf32>
    %280 = arith.mulf %279, %278 : vector<8x32xf32>
    %cst_141 = arith.constant 9.99999996E-13 : f32
    %281 = vector.broadcast %cst_141 : f32 to vector<8x1xf32>
    %282 = arith.addf %276, %281 : vector<8x1xf32>
    %283 = math.sqrt %282 : vector<8x1xf32>
    %284 = vector.broadcast %283 : vector<8x1xf32> to vector<8x32xf32>
    %285 = arith.divf %280, %284 : vector<8x32xf32>
    %286 = vector.broadcast %265 : vector<1x32xf32> to vector<8x32xf32>
    %287 = arith.addf %285, %286 : vector<8x32xf32>
    %c0_142 = arith.constant 0 : index
    %c0_143 = arith.constant 0 : index
    %288 = vector.load %arg9[%c0_142, %c0_143] : memref<32x64xf32, #tpu.memory_space<vmem>>, vector<32x64xf32>
    %cst_144 = arith.constant dense<0.000000e+00> : vector<8x64xf32>
    %289 = tpu.matmul %287, %288, %cst_144 {dimension_numbers = #tpu.dot_dimension_numbers<[1], [0], [0], [1], [0, 0, 1, 1], [], []>} : vector<8x32xf32>, vector<32x64xf32>, vector<8x64xf32> -> vector<8x64xf32>
    %c0_145 = arith.constant 0 : index
    %c0_146 = arith.constant 0 : index
    %290 = vector.load %arg10[%c0_145, %c0_146] : memref<1x64xf32, #tpu.memory_space<vmem>>, vector<1x64xf32>
    %291 = vector.broadcast %290 : vector<1x64xf32> to vector<8x64xf32>
    %292 = arith.addf %289, %291 : vector<8x64xf32>
    %cst_147 = arith.constant 0.000000e+00 : f32
    %293 = vector.broadcast %cst_147 : f32 to vector<8x64xf32>
    %294 = arith.maximumf %292, %293 : vector<8x64xf32>
    %c0_148 = arith.constant 0 : index
    %c0_149 = arith.constant 0 : index
    %295 = vector.load %arg11[%c0_148, %c0_149] : memref<64x32xf32, #tpu.memory_space<vmem>>, vector<64x32xf32>
    %cst_150 = arith.constant dense<0.000000e+00> : vector<8x32xf32>
    %296 = tpu.matmul %294, %295, %cst_150 {dimension_numbers = #tpu.dot_dimension_numbers<[1], [0], [0], [1], [0, 0, 1, 1], [], []>} : vector<8x64xf32>, vector<64x32xf32>, vector<8x32xf32> -> vector<8x32xf32>
    %c0_151 = arith.constant 0 : index
    %c0_152 = arith.constant 0 : index
    %297 = vector.load %arg12[%c0_151, %c0_152] : memref<1x32xf32, #tpu.memory_space<vmem>>, vector<1x32xf32>
    %298 = vector.broadcast %297 : vector<1x32xf32> to vector<8x32xf32>
    %299 = arith.addf %296, %298 : vector<8x32xf32>
    %300 = arith.addf %299, %287 : vector<8x32xf32>
    %c2_153 = arith.constant 2 : index
    %c0_154 = arith.constant 0 : index
    %c0_155 = arith.constant 0 : index
    %301 = vector.load %arg13[%c2_153, %c0_154, %c0_155] : memref<3x1x32xf32, #tpu.memory_space<vmem>>, vector<1x1x32xf32>
    %302 = vector.shape_cast %301 : vector<1x1x32xf32> to vector<1x32xf32>
    %c2_156 = arith.constant 2 : index
    %c0_157 = arith.constant 0 : index
    %c0_158 = arith.constant 0 : index
    %303 = vector.load %arg14[%c2_156, %c0_157, %c0_158] : memref<3x1x32xf32, #tpu.memory_space<vmem>>, vector<1x1x32xf32>
    %304 = vector.shape_cast %303 : vector<1x1x32xf32> to vector<1x32xf32>
    %cst_159 = arith.constant dense<0.000000e+00> : vector<8xf32>
    %305 = vector.multi_reduction <add>, %300, %cst_159 [1] : vector<8x32xf32> to vector<8xf32>
    %306 = vector.shape_cast %305 : vector<8xf32> to vector<8x1xf32>
    %cst_160 = arith.constant 3.200000e+01 : f32
    %307 = vector.broadcast %cst_160 : f32 to vector<8x1xf32>
    %308 = arith.divf %306, %307 : vector<8x1xf32>
    %309 = vector.broadcast %308 : vector<8x1xf32> to vector<8x32xf32>
    %310 = arith.subf %300, %309 : vector<8x32xf32>
    %311 = arith.mulf %310, %310 : vector<8x32xf32>
    %cst_161 = arith.constant dense<0.000000e+00> : vector<8xf32>
    %312 = vector.multi_reduction <add>, %311, %cst_161 [1] : vector<8x32xf32> to vector<8xf32>
    %313 = vector.shape_cast %312 : vector<8xf32> to vector<8x1xf32>
    %cst_162 = arith.constant 3.200000e+01 : f32
    %314 = vector.broadcast %cst_162 : f32 to vector<8x1xf32>
    %315 = arith.divf %313, %314 : vector<8x1xf32>
    %316 = vector.broadcast %308 : vector<8x1xf32> to vector<8x32xf32>
    %317 = arith.subf %300, %316 : vector<8x32xf32>
    %318 = vector.broadcast %302 : vector<1x32xf32> to vector<8x32xf32>
    %319 = arith.mulf %318, %317 : vector<8x32xf32>
    %cst_163 = arith.constant 9.99999996E-13 : f32
    %320 = vector.broadcast %cst_163 : f32 to vector<8x1xf32>
    %321 = arith.addf %315, %320 : vector<8x1xf32>
    %322 = math.sqrt %321 : vector<8x1xf32>
    %323 = vector.broadcast %322 : vector<8x1xf32> to vector<8x32xf32>
    %324 = arith.divf %319, %323 : vector<8x32xf32>
    %325 = vector.broadcast %304 : vector<1x32xf32> to vector<8x32xf32>
    %326 = arith.addf %324, %325 : vector<8x32xf32>
    %c0_164 = arith.constant 0 : index
    %c0_165 = arith.constant 0 : index
    %c0_166 = arith.constant 0 : index
    %327 = vector.load %arg15[%c0_164, %c0_165, %c0_166] : memref<1x8x32xf32, #tpu.memory_space<vmem>>, vector<1x8x32xf32>
    %328 = vector.shape_cast %327 : vector<1x8x32xf32> to vector<8x32xf32>
    %329 = vector.shape_cast %326 : vector<8x32xf32> to vector<1x8x32xf32>
    tpu.vector_store %arg15[%c0_164, %c0_165, %c0_166], %329 {strides = array<i32>} : memref<1x8x32xf32, #tpu.memory_space<vmem>>, vector<1x8x32xf32>,
    return
  }
  func.func @transform_0(%arg0: i32) -> (i32, i32, i32) {
    %c0_i32 = arith.constant 0 : i32
    %c0_i32_0 = arith.constant 0 : i32
    %c0_i32_1 = arith.constant 0 : i32
    return %arg0, %c0_i32, %c0_i32_0 : i32, i32, i32
  }
  func.func @transform_1(%arg0: i32) -> (i32, i32, i32) {
    %c0_i32 = arith.constant 0 : i32
    %c0_i32_0 = arith.constant 0 : i32
    %c0_i32_1 = arith.constant 0 : i32
    return %arg0, %c0_i32, %c0_i32_0 : i32, i32, i32
  }
  func.func @transform_2(%arg0: i32) -> (i32, i32, i32, i32) {
    %c0_i32 = arith.constant 0 : i32
    %c0_i32_0 = arith.constant 0 : i32
    %c0_i32_1 = arith.constant 0 : i32
    %c0_i32_2 = arith.constant 0 : i32
    return %arg0, %c0_i32, %c0_i32_0, %c0_i32_1 : i32, i32, i32, i32
  }
  func.func @transform_3(%arg0: i32) -> (i32, i32, i32, i32) {
    %c0_i32 = arith.constant 0 : i32
    %c0_i32_0 = arith.constant 0 : i32
    %c0_i32_1 = arith.constant 0 : i32
    %c0_i32_2 = arith.constant 0 : i32
    return %arg0, %c0_i32, %c0_i32_0, %c0_i32_1 : i32, i32, i32, i32
  }
  func.func @transform_4(%arg0: i32) -> (i32, i32, i32) {
    %c0_i32 = arith.constant 0 : i32
    %c0_i32_0 = arith.constant 0 : i32
    %c0_i32_1 = arith.constant 0 : i32
    %c0_i32_2 = arith.constant 0 : i32
    return %c0_i32, %c0_i32_0, %c0_i32_1 : i32, i32, i32
  }
  func.func @transform_5(%arg0: i32) -> (i32, i32, i32) {
    %c0_i32 = arith.constant 0 : i32
    %c0_i32_0 = arith.constant 0 : i32
    %c0_i32_1 = arith.constant 0 : i32
    %c0_i32_2 = arith.constant 0 : i32
    return %c0_i32, %c0_i32_0, %c0_i32_1 : i32, i32, i32
  }
  func.func @transform_6(%arg0: i32) -> (i32, i32, i32) {
    %c0_i32 = arith.constant 0 : i32
    %c0_i32_0 = arith.constant 0 : i32
    %c0_i32_1 = arith.constant 0 : i32
    %c0_i32_2 = arith.constant 0 : i32
    return %c0_i32, %c0_i32_0, %c0_i32_1 : i32, i32, i32
  }
  func.func @transform_7(%arg0: i32) -> (i32, i32, i32) {
    %c0_i32 = arith.constant 0 : i32
    %c0_i32_0 = arith.constant 0 : i32
    %c0_i32_1 = arith.constant 0 : i32
    %c0_i32_2 = arith.constant 0 : i32
    return %c0_i32, %c0_i32_0, %c0_i32_1 : i32, i32, i32
  }
  func.func @transform_8(%arg0: i32) -> (i32, i32) {
    %c0_i32 = arith.constant 0 : i32
    %c0_i32_0 = arith.constant 0 : i32
    %c0_i32_1 = arith.constant 0 : i32
    return %c0_i32, %c0_i32_0 : i32, i32
  }
  func.func @transform_9(%arg0: i32) -> (i32, i32) {
    %c0_i32 = arith.constant 0 : i32
    %c0_i32_0 = arith.constant 0 : i32
    %c0_i32_1 = arith.constant 0 : i32
    return %c0_i32, %c0_i32_0 : i32, i32
  }
  func.func @transform_10(%arg0: i32) -> (i32, i32) {
    %c0_i32 = arith.constant 0 : i32
    %c0_i32_0 = arith.constant 0 : i32
    %c0_i32_1 = arith.constant 0 : i32
    return %c0_i32, %c0_i32_0 : i32, i32
  }
  func.func @transform_11(%arg0: i32) -> (i32, i32) {
    %c0_i32 = arith.constant 0 : i32
    %c0_i32_0 = arith.constant 0 : i32
    %c0_i32_1 = arith.constant 0 : i32
    return %c0_i32, %c0_i32_0 : i32, i32
  }
  func.func @transform_12(%arg0: i32) -> (i32, i32, i32) {
    %c0_i32 = arith.constant 0 : i32
    %c0_i32_0 = arith.constant 0 : i32
    %c0_i32_1 = arith.constant 0 : i32
    %c0_i32_2 = arith.constant 0 : i32
    return %c0_i32, %c0_i32_0, %c0_i32_1 : i32, i32, i32
  }
  func.func @transform_13(%arg0: i32) -> (i32, i32, i32) {
    %c0_i32 = arith.constant 0 : i32
    %c0_i32_0 = arith.constant 0 : i32
    %c0_i32_1 = arith.constant 0 : i32
    %c0_i32_2 = arith.constant 0 : i32
    return %c0_i32, %c0_i32_0, %c0_i32_1 : i32, i32, i32
  }
  func.func @transform_14(%arg0: i32) -> (i32, i32, i32) {
    %c0_i32 = arith.constant 0 : i32
    %c0_i32_0 = arith.constant 0 : i32
    %c0_i32_1 = arith.constant 0 : i32
    return %arg0, %c0_i32, %c0_i32_0 : i32, i32, i32
  }
}

module attributes {stable_mosaic.version = 11 : i64} {
  func.func @_linear_kernel(%arg0: i32, %arg1: i32, %arg2: memref<16x32xf32, #tpu.memory_space<vmem>>, %arg3: memref<32x128xf32, #tpu.memory_space<vmem>>, %arg4: memref<1x128xf32, #tpu.memory_space<vmem>>, %arg5: memref<16x128xf32, #tpu.memory_space<vmem>>) attributes {dimension_semantics = [#tpu.dimension_semantics<parallel>, #tpu.dimension_semantics<parallel>], iteration_bounds = array<i64: 1, 1>, scalar_prefetch = 0 : i64, scratch_operands = 0 : i64, tpu.core_type = #tpu.core_type<tc>, window_params = [{transform_indices = @transform_0, window_bounds = array<i64: 16, 32>}, {transform_indices = @transform_1, window_bounds = array<i64: 32, 128>}, {transform_indices = @transform_2, window_bounds = array<i64: 1, 128>}, {transform_indices = @transform_3, window_bounds = array<i64: 16, 128>}]} {
    %c0 = arith.constant 0 : index
    %c0_0 = arith.constant 0 : index
    %0 = vector.load %arg2[%c0, %c0_0] : memref<16x32xf32, #tpu.memory_space<vmem>>, vector<16x32xf32>
    %c0_1 = arith.constant 0 : index
    %c0_2 = arith.constant 0 : index
    %1 = vector.load %arg3[%c0_1, %c0_2] : memref<32x128xf32, #tpu.memory_space<vmem>>, vector<32x128xf32>
    %cst = arith.constant dense<0.000000e+00> : vector<16x128xf32>
    %2 = tpu.matmul %0, %1, %cst {dimension_numbers = #tpu.dot_dimension_numbers<[1], [0], [0], [1], [0, 0, 1, 1], [], []>} : vector<16x32xf32>, vector<32x128xf32>, vector<16x128xf32> -> vector<16x128xf32>
    %c0_3 = arith.constant 0 : index
    %c0_4 = arith.constant 0 : index
    %3 = vector.load %arg4[%c0_3, %c0_4] : memref<1x128xf32, #tpu.memory_space<vmem>>, vector<1x128xf32>
    %4 = vector.broadcast %3 : vector<1x128xf32> to vector<16x128xf32>
    %5 = arith.addf %2, %4 : vector<16x128xf32>
    %c0_5 = arith.constant 0 : index
    %c0_6 = arith.constant 0 : index
    %6 = vector.load %arg5[%c0_5, %c0_6] : memref<16x128xf32, #tpu.memory_space<vmem>>, vector<16x128xf32>
    tpu.vector_store %arg5[%c0_5, %c0_6], %5 {strides = array<i32>} : memref<16x128xf32, #tpu.memory_space<vmem>>, vector<16x128xf32>,
    return
  }
  func.func @transform_0(%arg0: i32, %arg1: i32) -> (i32, i32) {
    %c0_i32 = arith.constant 0 : i32
    %c0_i32_0 = arith.constant 0 : i32
    return %arg0, %c0_i32 : i32, i32
  }
  func.func @transform_1(%arg0: i32, %arg1: i32) -> (i32, i32) {
    %c0_i32 = arith.constant 0 : i32
    %c0_i32_0 = arith.constant 0 : i32
    return %c0_i32, %arg1 : i32, i32
  }
  func.func @transform_2(%arg0: i32, %arg1: i32) -> (i32, i32) {
    %c0_i32 = arith.constant 0 : i32
    %c0_i32_0 = arith.constant 0 : i32
    return %c0_i32, %arg1 : i32, i32
  }
  func.func @transform_3(%arg0: i32, %arg1: i32) -> (i32, i32) {
    %c0_i32 = arith.constant 0 : i32
    return %arg0, %arg1 : i32, i32
  }
}

</mosaic_0001>

<bundles_post_ra>
// kernel: decoder_forward.5
= control target key start
LH: loop header
LB: loop body
LE: loop exit
PB: predicated region body
PF: predicated region fallthrough
CT: control target
= control target key end

     0   :  { %vm28_vm0 = vcmask 261120   ;;  %s220_s0 = inlined_call_operand.vmem [shape: f32[16,32], index: 0, kind: input, shape index: {}]   ;;  %s221_s1 = inlined_call_operand.vmem [shape: f32[32,128], index: 1, kind: input, shape index: {}]   ;;  %s222_s2 = inlined_call_operand.vmem [shape: f32[1,128], index: 2, kind: input, shape index: {}]   ;;  %s223_s3 = inlined_call_operand.hbm [shape: f32[16,128], index: 3, kind: output, shape index: {}]  }
   0x1   :  { %v20_v0 = vld [vmem:[%s221_s1 + $0x18] sm:$0xff]  ;;  %v19_v1 = vld [vmem:[%s221_s1 + $0x10] sm:$0xff]  ;;  %v15_v2 = vld [vmem:[%s220_s0] sm:$0xff] }
   0x2   :  { %137 = vmatprep.subr.mxu0 %v20_v0  ;;  %v18_v3 = vld [vmem:[%s221_s1 + $0x8] sm:$0xff]  ;;  %145 = vmatprep.mubr.msk.f32.mxu0 %vm28_vm0, %v15_v2 }
   0x3   :  { %138 = vmatpush3.msra.mxu0 %v20_v0 }
   0x4   :  { %8 = vsyncpa [#allocation3], 0  ;;  %139 = vmatprep.subr.mxu0 %v19_v1  ;;  %v17_v4 = vld [vmem:[%s221_s1] sm:$0xff]  ;;  %v16_v5 = vld [vmem:[%s220_s0 + $0x8] sm:$0xff]  ;;  %s173_s26 = smov [#allocation2]  }
   0x5   :  { %140 = vmatpush3.msra.mxu0 %v19_v1  ;;  %v128_v6 = vld [vmem:[%s222_s2] ss:$0 sm:$0xff]  ;;  %s117_s27 = sshll.u32 %s173_s26, 4  ;;  %s118_s27 = int_to_ptr.vmem [resolvable:$true] %s117_s27 }
   0x6   :  { %141 = vmatprep.subr.mxu0 %v18_v3  ;;  %s151_s1 = scalar_lea.vmem %s118_s27, 256  ;;  %p156_p1 = scmp.lt.s32.totalorder %s118_s27, %s118_s27 }
   0x7   :  { %142 = vmatpush3.msra.mxu0 %v18_v3  ;;  %p152_p0 = scmp.ne.s32.totalorder %s118_s27, %s151_s1  ;;  %p157_p2 = scmp.lt.s32.totalorder %s151_s1, %s151_s1 }
   0x8   :  { %143 = vmatprep.subr.mxu0 %v17_v4 }
   0x9   :  { %144 = vmatpush3.msra.mxu0 %v17_v4  ;;  %p158_p3 = por %p157_p2, %p156_p1 }
   0xa   :  { %146 = vmatmul.mubr.msk.f32.vlgmr.msra.gmra.mxu0 %vm28_vm0, %v16_v5 }
   0xb   :  { %p159_p4 = pnand %p158_p3, %p152_p0 }
  0xca   :  { %v147_v7 = vpop.f32.mrf.mxu0 }
  0xcb   :  { %v107_v8 = vadd.f32 %v147_v7, %v128_v6 }
  0xcc   :  { %v101_v9 = vpop.f32.mrf.mxu0 }
  0xcd   :  { %111 = vst [vmem:[#allocation2 + $0x8] sm:$0xff] %v107_v8  ;;  %v102_v10 = vadd.f32 %v128_v6, %v101_v9 }
  0xcf   :  { %110 = vst [vmem:[#allocation2] sm:$0xff] %v102_v10 }
  0xd0   :  { %162 = shalt.err (!%p159_p4)
}
  0xd1   :  { %s174_s0 = smov 128   ;;  %s175_s28 = smov 8  }
  0xd2   :  { %123 = dma.vmem_to_hbm [thread:$0]  %s118_s27, 256, %s223_s3, [#allocation3], %s174_s0, %s174_s0, %s175_s28  }
  0xd3   :  { %171 = dma.done.wait [#allocation3], 256  }
  0xd4   :  { %172 = vsyncadd [#allocation3], 4294967040 }
  0xd5   :  { %127 = vsyncpa [#allocation3], 1 }

// kernel: decoder_forward.3
= control target key start
LH: loop header
LB: loop body
LE: loop exit
PB: predicated region body
PF: predicated region fallthrough
CT: control target
= control target key end

     0   :  { %s3468_s29 = smov 0   ;;  %s3907_s0 = inlined_call_operand.vmem [shape: f32[2,8,32], index: 0, kind: input, shape index: {}]   ;;  %s3908_s1 = inlined_call_operand.vmem [shape: f32[2,8,32], index: 1, kind: input, shape index: {}]   ;;  %s3909_s2 = inlined_call_operand.vmem [shape: s32[2,1,8,8], index: 2, kind: input, shape index: {}]   ;;  %s3910_s3 = inlined_call_operand.vmem [shape: s32[2,1,8,8], index: 3, kind: input, shape index: {}]   ;;  %s3911_s4 = inlined_call_operand.vmem [shape: f32[4,32,32], index: 4, kind: input, shape index: {}]   ;;  %s3912_s5 = inlined_call_operand.vmem [shape: f32[4,1,32], index: 5, kind: input, shape index: {}]   ;;  %s3913_s6 = inlined_call_operand.vmem [shape: f32[4,32,32], index: 6, kind: input, shape index: {}]   ;;  %s3914_s7 = inlined_call_operand.vmem [shape: f32[4,1,32], index: 7, kind: input, shape index: {}]   ;;  %s3915_s8 = inlined_call_operand.vmem [shape: f32[32,64], index: 8, kind: input, shape index: {}]   ;;  %s3916_s9 = inlined_call_operand.vmem [shape: f32[1,64], index: 9, kind: input, shape index: {}]   ;;  %s3917_s10 = inlined_call_operand.vmem [shape: f32[64,32], index: 10, kind: input, shape index: {}]   ;;  %s3918_s11 = inlined_call_operand.vmem [shape: f32[1,32], index: 11, kind: input, shape index: {}]   ;;  %s3919_s12 = inlined_call_operand.vmem [shape: f32[3,1,32], index: 12, kind: input, shape index: {}]   ;;  %s3920_s13 = inlined_call_operand.vmem [shape: f32[3,1,32], index: 13, kind: input, shape index: {}]   ;;  %s3921_s14 = inlined_call_operand.vmem [shape: f32[2,8,32], index: 14, kind: output, shape index: {}]  }
   0x1 LB: > { %s2937_s30 = sadd.s32 4294967295, %s3383_s29   ;;  %p2941_p0 = scmp.ge.s32.totalorder %s3383_s29, 1  ;;  %s3383_s29 = sphi %s3468_s29, %s24_s29  }
   0x2   : > { %p438_p1 = scmp.lt.s32.totalorder %s3383_s29, 3 }
   0x4   : > { %p439_p2 = pnand %p2941_p0, %p438_p1 }
   0x5   : > { %p494_p3 = scmp.lt.s32.totalorder (!%p439_p2), %s2937_s30, 1  ;;  %s3387_s18 = smov (!%p439_p2), 112  }
   0x6   : > { %442 = sbr.rel (%p439_p2) target bundleno = 4064 (0xfe0), region = 76  ;;  %s3388_s19 = smov (!%p439_p2), 120  }
   0x7   : > { %s3389_s20 = smov (!%p439_p2), 104   ;;  %s3924_s24 = smov (!%p439_p2), 8  }
   0x8   : > { %s3923_s25 = smov (!%p439_p2), 16   ;;  %s3925_s15 = smov (!%p439_p2), 8  }
   0x9   : > { %s3926_s16 = smov (!%p439_p2), 16   ;;  %s3927_s17 = smov (!%p439_p2), 24  }
   0xb   : > { %v520_v0 = vld [vmem:[%s3911_s4 + $0x18] sm:$0xff]  ;;  %v3385_v1 = vmov 0.0   ;;  %v519_v2 = vld [vmem:[%s3911_s4 + $0x10] sm:$0xff]  ;;  %vm3386_vm0 = vmmov 0   ;;  %s3929_s30 = smov (!%p494_p3, %s2937_s30), 1  ;;  %v518_v3 = vld [vmem:[%s3911_s4 + $0x8] sm:$0xff] }
   0xc   : > { %3119 = vmatprep.subr.mxu1 %v3385_v1  ;;  %3127 = vmatprep.mubr.msk.f32.mxu1 %vm3386_vm0, %v3385_v1  ;;  %s3492_s21 = sshll.u32 %s3929_s30, 3  ;;  %v517_v4 = vld [vmem:[%s3911_s4] sm:$0xff]  ;;  %vm528_vm1 = vcmask 261120   ;;  %v2952_v6 = vld [vmem:[%s3911_s4 + $0x38] sm:$0xff]  ;;  %v2951_v7 = vld [vmem:[%s3911_s4 + $0x30] sm:$0xff]  ;;  %vm768_vm2 = vcmask 64512  }
   0xd   : > { %3120 = vmatpush3.msra.mxu1 %v520_v0  ;;  %3141 = vmatprep.subr.mxu0 %v3385_v1  ;;  %s497_s26 = scalar_lea.vmem %s3907_s0, %s3492_s21  ;;  %v2950_v8 = vld [vmem:[%s3911_s4 + $0x28] sm:$0xff]  ;;  %v2949_v9 = vld [vmem:[%s3911_s4 + $0x20] sm:$0xff]  ;;  %v2959_v10 = vld [vmem:[%s3911_s4 + $0x58] sm:$0xff]  ;;  %vm1447_vm4 = vcmask 130048   ;;  %vm1449_vm5 = vcmask 195584   ;;  %s501_s30 = scalar_lea.vmem %s3908_s1, %s3492_s21  ;;  %vm2734_vm11 = vcmask 523264  }
   0xe   : > { %3121 = vmatprep.subr.mxu1 %v3385_v1  ;;  %3149 = vmatprep.mubr.msk.f32.mxu0 %vm3386_vm0, %v3385_v1  ;;  %v3502_v5 = vld [vmem:[%s497_s26] sm:$0xff]  ;;  %v2958_v11 = vld [vmem:[%s3911_s4 + $0x50] sm:$0xff]  ;;  %v2957_v12 = vld [vmem:[%s3911_s4 + $0x48] sm:$0xff]  ;;  %s505_s26 = scalar_lea.vmem %s3909_s2, %s3492_s21  ;;  %s509_s22 = scalar_lea.vmem %s3910_s3, %s3492_s21 }
   0xf   : > { %3122 = vmatpush3.msra.mxu1 %v519_v2  ;;  %3142 = vmatpush3.msra.mxu0 %v2959_v10  ;;  %v2956_v13 = vld [vmem:[%s3911_s4 + $0x40] sm:$0xff] }
  0x10   : > { %3123 = vmatprep.subr.mxu1 %v3385_v1  ;;  %3143 = vmatprep.subr.mxu0 %v3385_v1  ;;  %v2954_v16 = vld [vmem:[%s3912_s5 + $0x1] ss:$0 sm:$0xff]  ;;  %v2947_v19 = vld [vmem:[%s3912_s5] ss:$0 sm:$0xff]  ;;  %v2961_v22 = vld [vmem:[%s3912_s5 + $0x2] ss:$0 sm:$0xff] }
  0x11   : > { %3124 = vmatpush3.msra.mxu1 %v518_v3  ;;  %3144 = vmatpush3.msra.mxu0 %v2958_v11  ;;  %v516_v32 = vld [vmem:[%s505_s26] sm:$0xff]  ;;  %s3922_s26 = smov 24  }
  0x12   : > { %3125 = vmatprep.subr.mxu1 %v3385_v1  ;;  %3145 = vmatprep.subr.mxu0 %v3385_v1  ;;  %vm846_vm3 = vcmp.eq.s32.totalorder %v516_v32, 0 }
  0x13   : > { %3126 = vmatpush3.msra.mxu1 %v517_v4  ;;  %3146 = vmatpush3.msra.mxu0 %v2957_v12 }
  0x14   : > { %3128 = vmatmul.mubr.msk.f32.vlgmr.msra.gmra.mxu1 %vm528_vm1, %v3502_v5  ;;  %3130 = vmatprep.subr.mxu1 %v3385_v1 }
  0x15   : > { %3131 = vmatpush3.msra.mxu1 %v2952_v6  ;;  %3138 = vmatprep.mubr.msk.f32.mxu1 %vm3386_vm0, %v3385_v1 }
  0x16   : > { %3132 = vmatprep.subr.mxu1 %v3385_v1  ;;  %3147 = vmatprep.subr.mxu0 %v3385_v1 }
  0x17   : > { %3133 = vmatpush3.msra.mxu1 %v2951_v7  ;;  %3148 = vmatpush3.msra.mxu0 %v2956_v13 }
  0x18   : > { %3134 = vmatprep.subr.mxu1 %v3385_v1  ;;  %3150 = vmatmul.mubr.msk.f32.vlgmr.msra.gmra.mxu0 %vm528_vm1, %v3502_v5 }
  0x19   : > { %3135 = vmatpush3.msra.mxu1 %v2950_v8  ;;  %3162 = vmatprep.subr.mxu0 %v3385_v1 }
  0x1a   : > { %3136 = vmatprep.subr.mxu1 %v3385_v1  ;;  %3164 = vmatprep.mubr.msk.f32.mxu0 %vm3386_vm0, %v3385_v1 }
  0x1b   : > { %3137 = vmatpush3.msra.mxu1 %v2949_v9 }
  0x1c   : > { %3139 = vmatmul.mubr.msk.f32.vlgmr.msra.gmra.mxu1 %vm528_vm1, %v3502_v5  ;;  %3152 = vmatprep.subr.mxu1 %v3385_v1 }
  0x1d   : > { %3154 = vmatprep.mubr.msk.f32.mxu1 %vm3386_vm0, %v3385_v1 }
  0xd4   : > { %v598_v14 = vpop.f32.mrf.mxu1 }
  0xd5   : > { %v599_v21 = vadd.f32 %v2947_v19, %v598_v14 }
  0xd6   : > { %v3129_v15 = vpop.f32.mrf.mxu1 }
  0xd8   : > { %v764_v23 = vpop.f32.mrf.mxu0 }
  0xd9   : > { %v3570_v24 = vadd.f32 %v2961_v22, %v764_v23 }
  0xda   : > { %v3151_v25 = vpop.f32.mrf.mxu0 }
  0xdc   : > { %v681_v17 = vpop.f32.mrf.mxu1 }
  0xdd   : > { %v682_v18 = vadd.f32 %v2954_v16, %v681_v17 }
  0xde   : > { %v3140_v20 = vpop.f32.mrf.mxu1 }
  0xdf   : > { %1102 = vrot.lane.b32.xlu1 %v682_v18, %s3387_s18  ;;  %934 = vrot.lane.b32.xlu0 %v682_v18, %s3388_s19 }
  0xe0   : > { %3153 = vmatpush3.xpose.msk.msra.mxu1 %vm768_vm2, %v682_v18 }
  0xe1   : > { %3157 = vmatprep.subr.mxu1 %v3385_v1 }
  0xe3   : > { %3155 = vmatmul.mubr.msk.f32.vlgmr.msra.gmra.mxu1 %vm768_vm2, %v599_v21  ;;  %1100 = vrot.lane.b32.xlu1 %v599_v21, %s3387_s18 }
  0xe4   : > { %932 = vrot.lane.b32.xlu0 %v599_v21, %s3388_s19  ;;  %3159 = vmatprep.mubr.msk.f32.mxu1 %vm3386_vm0, %v3385_v1 }
  0xe5   : > { %3158 = vmatpush3.msra.mxu1 %v3570_v24 }
  0xe6   : > { %3167 = vmatprep.subr.mxu1 %v3385_v1 }
  0xe7   : > { %1267 = vrot.lane.b32.xlu1 %v599_v21, %s3389_s20 }
  0xe8   : > { %1269 = vrot.lane.b32.xlu0 %v682_v18, %s3389_s20 }
 0x151   : > { %v935_v26 = vpop.permute.xlu0 %934  ;;  %v1103_v27 = vpop.permute.xlu1 %1102 }
 0x152   : > { %3163 = vmatpush3.xpose.msk.msra.mxu0 %vm768_vm2, %v935_v26 }
 0x153   : > { %3172 = vmatprep.subr.mxu0 %v3385_v1 }
 0x155   : > { %v1101_v29 = vpop.permute.xlu1 %1100 }
 0x156   : > { %v933_v28 = vpop.permute.xlu0 %932 }
 0x157   : > { %3165 = vmatmul.mubr.msk.f32.vlgmr.msra.gmra.mxu0 %vm768_vm2, %v933_v28  ;;  %v2978_v28 = vld [vmem:[%s3911_s4 + $0x78] sm:$0xff] }
 0x158   : > { %3173 = vmatpush3.xpose.msk.msra.mxu0 %vm768_vm2, %v1103_v27  ;;  %3174 = vmatprep.mubr.msk.f32.mxu0 %vm3386_vm0, %v3385_v1 }
 0x159   : > { %3182 = vmatprep.subr.mxu0 %v3385_v1  ;;  %v1268_v31 = vpop.permute.xlu1 %1267 }
 0x15a   : > { %v1270_v30 = vpop.permute.xlu0 %1269 }
 0x15b   : > { %3175 = vmatmul.mubr.msk.f32.vlgmr.msra.gmra.mxu0 %vm768_vm2, %v1101_v29  ;;  %v2977_v29 = vld [vmem:[%s3911_s4 + $0x70] sm:$0xff] }
 0x15c   : > { %3183 = vmatpush3.xpose.msk.msra.mxu0 %vm768_vm2, %v1270_v30  ;;  %3184 = vmatprep.mubr.msk.f32.mxu0 %vm3386_vm0, %v3385_v1  ;;  %v2976_v30 = vld [vmem:[%s3911_s4 + $0x68] sm:$0xff] }
 0x15d   : > { %3192 = vmatprep.subr.mxu0 %v3385_v1 }
 0x15f   : > { %3185 = vmatmul.mubr.msk.f32.vlgmr.msra.gmra.mxu0 %vm768_vm2, %v1268_v31  ;;  %v2975_v31 = vld [vmem:[%s3911_s4 + $0x60] sm:$0xff] }
 0x160   : > { %3200 = vmatprep.mubr.msk.f32.mxu0 %vm3386_vm0, %v3385_v1  ;;  %3193 = vmatpush3.msra.mxu0 %v2978_v28 }
 0x161   : > { %3194 = vmatprep.subr.mxu0 %v3385_v1 }
 0x162   : > { %3195 = vmatpush3.msra.mxu0 %v2977_v29 }
 0x163   : > { %3196 = vmatprep.subr.mxu0 %v3385_v1 }
 0x164   : > { %3197 = vmatpush3.msra.mxu0 %v2976_v30 }
 0x165   : > { %3198 = vmatprep.subr.mxu0 %v3385_v1 }
 0x166   : > { %3199 = vmatpush3.msra.mxu0 %v2975_v31 }
 0x167   : > { %3214 = vmatprep.subr.mxu0 %v3385_v1 }
 0x1a3   : > { %v841_v33 = vpop.f32.mrf.mxu1 }
 0x1a4   : > { %v845_v34 = vmul.f32 0.35355338, %v841_v33 }
 0x1a5   : > { %v3156_v35 = vpop.f32.mrf.mxu1 }
 0x1a6   : > { %v847_v36 = vsel %vm846_vm3, -10000.0, %v845_v34 }
 0x1a7   : > { %v848_v37 = vsel %vm768_vm2, %v847_v36, -inf }
 0x1a8   : > { %849 = vmax.xlane.f32.xlu0 %v848_v37 }
 0x217   : > { %v1006_v38 = vpop.f32.mrf.mxu0 }
 0x218   : > { %v1010_v39 = vmul.f32 0.35355338, %v1006_v38 }
 0x219   : > { %v3166_v40 = vpop.f32.mrf.mxu0 }
 0x21a   : > { %v1011_v41 = vsel %vm846_vm3, -10000.0, %v1010_v39 }
 0x21b   : > { %v1174_v42 = vpop.f32.mrf.mxu0  ;;  %v1012_v43 = vsel %vm768_vm2, %v1011_v41, -inf }
 0x21c   : > { %v1178_v44 = vmul.f32 0.35355338, %v1174_v42  ;;  %1013 = vmax.xlane.f32.xlu1 %v1012_v43 }
 0x21d   : > { %v3176_v45 = vpop.f32.mrf.mxu0 }
 0x21e   : > { %v1179_v46 = vsel %vm846_vm3, -10000.0, %v1178_v44  ;;  %v2980_v44 = vld [vmem:[%s3912_s5 + $0x3] ss:$0 sm:$0xff] }
 0x21f   : > { %v1341_v47 = vpop.f32.mrf.mxu0  ;;  %v1180_v48 = vsel %vm768_vm2, %v1179_v46, -inf }
 0x220   : > { %v1345_v49 = vmul.f32 0.35355338, %v1341_v47  ;;  %1181 = vmax.xlane.f32.xlu0 %v1180_v48 }
 0x221   : > { %v3186_v50 = vpop.f32.mrf.mxu0 }
 0x222   : > { %v1346_v51 = vsel %vm846_vm3, -10000.0, %v1345_v49 }
 0x223   : > { %v1347_v52 = vsel %vm768_vm2, %v1346_v51, -inf }
 0x224   : > { %1348 = vmax.xlane.f32.xlu0 %v1347_v52 }
 0x22d   : > { %1024 = vrot.lane.b32.xlu1 %v3570_v24, %s3388_s19 }
 0x231   : > { %v850_v53 = vpop.xlane.xlu0 %849 }
 0x232   : > { %v851_v54 = vsub.f32 %v847_v36, %v850_v53 }
 0x234   : > { %v852_v55 = vmul.f32 1.442695, %v851_v54 }
 0x236   : > { %3333 = vpow2.f32 %v852_v55  ;;  %v2989_v55 = vld [vmem:[%s3913_s6 + $0x38] sm:$0xff] }
 0x243   : > { %v3334_v56 = vpop.eup %3333 }
 0x244   : > { %v854_v57 = vsel %vm768_vm2, %v3334_v56, 0.0 }
 0x251   : > { %855 = vadd.xlane.f32.xlu1 %v854_v57  ;;  %v2987_v57 = vld [vmem:[%s3913_s6 + $0x28] sm:$0xff] }
 0x2a5   : > { %v1014_v58 = vpop.xlane.xlu1 %1013 }
 0x2a6   : > { %v1015_v59 = vsub.f32 %v1011_v41, %v1014_v58  ;;  %v1578_v58 = vld [vmem:[%s3913_s6 + $0x10] sm:$0xff] }
 0x2a8   : > { %v1016_v60 = vmul.f32 1.442695, %v1015_v59  ;;  %v1577_v59 = vld [vmem:[%s3913_s6 + $0x8] sm:$0xff] }
 0x2a9   : > { %v1182_v61 = vpop.xlane.xlu0 %1181  ;;  %v1025_v11 = vpop.permute.xlu1 %1024 }
 0x2aa   : > { %3335 = vpow2.f32 %v1016_v60  ;;  %v1183_v62 = vsub.f32 %v1179_v46, %v1182_v61  ;;  %v2986_v60 = vld [vmem:[%s3913_s6 + $0x20] sm:$0xff] }
 0x2ab   : > { %v3685_v61 = vld [vmem:[%s501_s30] sm:$0xff] }
 0x2ac   : > { %v1184_v63 = vmul.f32 1.442695, %v1183_v62  ;;  %v1576_v62 = vld [vmem:[%s3913_s6] sm:$0xff] }
 0x2ad   : > { %v1349_v0 = vpop.xlane.xlu0 %1348 }
 0x2ae   : > { %3337 = vpow2.f32 %v1184_v63  ;;  %v1350_v2 = vsub.f32 %v1346_v51, %v1349_v0 }
 0x2b0   : > { %v1351_v3 = vmul.f32 1.442695, %v1350_v2 }
 0x2b2   : > { %3339 = vpow2.f32 %v1351_v3 }
 0x2b7   : > { %v3336_v4 = vpop.eup %3335 }
 0x2b8   : > { %v1018_v6 = vsel %vm768_vm2, %v3336_v4, 0.0 }
 0x2b9   : > { %1019 = vadd.xlane.f32.xlu0 %v1018_v6 }
 0x2bb   : > { %v3338_v7 = vpop.eup %3337 }
 0x2bc   : > { %v1186_v8 = vsel %vm768_vm2, %v3338_v7, 0.0 }
 0x2bd   : > { %1187 = vadd.xlane.f32.xlu1 %v1186_v8 }
 0x2bf   : > { %v3340_v9 = vpop.eup %3339 }
 0x2c0   : > { %v1353_v10 = vsel %vm768_vm2, %v3340_v9, 0.0 }
 0x2c1   : > { %1354 = vadd.xlane.f32.xlu0 %v1353_v10 }
 0x2ce   : > { %1358 = vrot.lane.b32.xlu1 %v3570_v24, %s3389_s20 }
 0x2d7   : > { %1191 = vrot.lane.b32.xlu0 %v3570_v24, %s3387_s18 }
 0x2da   : > { %v856_v12 = vpop.xlane.xlu1 %855 }
 0x2db   : > { %3341 = vrcp.f32 %v856_v12  ;;  %v2983_v12 = vld [vmem:[%s3920_s13] ss:$0 sm:$0xff] }
 0x2e8   : > { %v3342_v13 = vpop.eup %3341 }
 0x2e9   : > { %v858_v14 = vmul.f32 %v3342_v13, %v3334_v56  ;;  %v2988_v56 = vld [vmem:[%s3913_s6 + $0x30] sm:$0xff] }
 0x2eb   : > { %3160 = vmatmul.mubr.msk.f32.vlgmr.msra.gmra.mxu1 %vm768_vm2, %v858_v14 }
 0x2ec   : > { %3168 = vmatpush3.msra.mxu1 %v1025_v11  ;;  %3169 = vmatprep.mubr.msk.f32.mxu1 %vm3386_vm0, %v3385_v1 }
 0x2ed   : > { %3177 = vmatprep.subr.mxu1 %v3385_v1 }
 0x342   : > { %v1020_v15 = vpop.xlane.xlu0 %1019 }
 0x343   : > { %3343 = vrcp.f32 %v1020_v15  ;;  %v2991_v15 = vld [vmem:[%s3914_s7 + $0x1] ss:$0 sm:$0xff] }
 0x346   : > { %v1188_v16 = vpop.xlane.xlu1 %1187 }
 0x347   : > { %3345 = vrcp.f32 %v1188_v16 }
 0x34a   : > { %v1355_v17 = vpop.xlane.xlu0 %1354  ;;  %v1359_v23 = vpop.permute.xlu1 %1358 }
 0x34b   : > { %3347 = vrcp.f32 %v1355_v17 }
 0x34e   : > { %v1192_v20 = vpop.permute.xlu0 %1191 }
 0x350   : > { %v3344_v18 = vpop.eup %3343 }
 0x351   : > { %v1022_v19 = vmul.f32 %v3344_v18, %v3336_v4 }
 0x353   : > { %3170 = vmatmul.mubr.msk.f32.vlgmr.msra.gmra.mxu1 %vm768_vm2, %v1022_v19  ;;  %v2984_v19 = vld [vmem:[%s3914_s7] ss:$0 sm:$0xff] }
 0x354   : > { %v3346_v21 = vpop.eup %3345  ;;  %3178 = vmatpush3.msra.mxu1 %v1192_v20  ;;  %3179 = vmatprep.mubr.msk.f32.mxu1 %vm3386_vm0, %v3385_v1  ;;  %v2996_v20 = vld [vmem:[%s3913_s6 + $0x58] sm:$0xff] }
 0x355   : > { %3187 = vmatprep.subr.mxu1 %v3385_v1  ;;  %v1190_v22 = vmul.f32 %v3346_v21, %v3338_v7  ;;  %v2995_v21 = vld [vmem:[%s3913_s6 + $0x50] sm:$0xff] }
 0x357   : > { %3180 = vmatmul.mubr.msk.f32.vlgmr.msra.gmra.mxu1 %vm768_vm2, %v1190_v22 }
 0x358   : > { %v3348_v24 = vpop.eup %3347  ;;  %3188 = vmatpush3.msra.mxu1 %v1359_v23  ;;  %3189 = vmatprep.mubr.msk.f32.mxu1 %vm3386_vm0, %v3385_v1 }
 0x359   : > { %v1357_v25 = vmul.f32 %v3348_v24, %v3340_v9  ;;  %3203 = vmatprep.subr.mxu1 %v3385_v1  ;;  %v2982_v9 = vld [vmem:[%s3919_s12] ss:$0 sm:$0xff] }
 0x35b   : > { %3190 = vmatmul.mubr.msk.f32.vlgmr.msra.gmra.mxu1 %vm768_vm2, %v1357_v25  ;;  %v2994_v25 = vld [vmem:[%s3913_s6 + $0x48] sm:$0xff] }
 0x35c   : > { %3211 = vmatprep.mubr.msk.f32.mxu1 %vm3386_vm0, %v3385_v1 }
 0x3ab   : > { %v928_v26 = vpop.f32.mrf.mxu1 }
 0x3ad   : > { %v3161_v27 = vpop.f32.mrf.mxu1 }
 0x3ae   : > { %v2993_v27 = vld [vmem:[%s3913_s6 + $0x40] sm:$0xff] }
 0x413   : > { %v1096_v32 = vpop.f32.mrf.mxu1 }
 0x414   : > { %1435 = vrot.lane.b32.xlu1 %v1096_v32, %s3924_s24 }
 0x415   : > { %v3171_v33 = vpop.f32.mrf.mxu1 }
 0x416   : > { %v1575_v33 = vld [vmem:[%s509_s22] sm:$0xff] }
 0x417   : > { %v1263_v34 = vpop.f32.mrf.mxu1  ;;  %vm1906_vm8 = vcmp.eq.s32.totalorder %v1575_v33, 0  ;;  %v3015_v33 = vld [vmem:[%s3913_s6 + $0x78] sm:$0xff] }
 0x418   : > { %1439 = vrot.lane.b32.xlu0 %v1263_v34, %s3923_s25 }
 0x419   : > { %v3181_v35 = vpop.f32.mrf.mxu1 }
 0x41b   : > { %v1430_v36 = vpop.f32.mrf.mxu1 }
 0x41c   : > { %1443 = vrot.lane.b32.xlu1 %v1430_v36, %s3922_s26 }
 0x41d   : > { %v3191_v37 = vpop.f32.mrf.mxu1 }
 0x486   : > { %v1436_v38 = vpop.permute.xlu1 %1435 }
 0x487   : > { %v1446_v40 = vsel %vm768_vm2, %v928_v26, %v1436_v38  ;;  %v2998_v38 = vld [vmem:[%s3914_s7 + $0x2] ss:$0 sm:$0xff] }
 0x48a   : > { %v1440_v39 = vpop.permute.xlu0 %1439 }
 0x48b   : > { %v1448_v41 = vsel %vm1447_vm4, %v1446_v40, %v1440_v39 }
 0x48e   : > { %v1444_v42 = vpop.permute.xlu1 %1443 }
 0x48f   : > { %v1450_v43 = vsel %vm1449_vm5, %v1448_v41, %v1444_v42 }
 0x490   : > { %3201 = vmatmul.mubr.msk.f32.vlgmr.msra.gmra.mxu0 %vm528_vm1, %v1450_v43 }
 0x491   : > { %3222 = vmatprep.mubr.msk.f32.mxu0 %vm3386_vm0, %v3385_v1  ;;  %3215 = vmatpush3.msra.mxu0 %v2989_v55 }
 0x492   : > { %3216 = vmatprep.subr.mxu0 %v3385_v1 }
 0x493   : > { %3217 = vmatpush3.msra.mxu0 %v2988_v56 }
 0x494   : > { %3218 = vmatprep.subr.mxu0 %v3385_v1 }
 0x495   : > { %3219 = vmatpush3.msra.mxu0 %v2987_v57 }
 0x496   : > { %3220 = vmatprep.subr.mxu0 %v3385_v1 }
 0x497   : > { %3221 = vmatpush3.msra.mxu0 %v2986_v60 }
 0x498   : > { %3223 = vmatmul.mubr.msk.f32.vlgmr.msra.gmra.mxu0 %vm528_vm1, %v3685_v61  ;;  %3236 = vmatprep.subr.mxu0 %v3385_v1 }
 0x499   : > { %3238 = vmatprep.mubr.msk.f32.mxu0 %vm3386_vm0, %v3385_v1 }
 0x550   : > { %v1533_v45 = vpop.f32.mrf.mxu0 }
 0x551   : > { %v1534_v46 = vadd.f32 %v2980_v44, %v1533_v45 }
 0x552   : > { %v3202_v47 = vpop.f32.mrf.mxu0 }
 0x553   : > { %v1537_v48 = vadd.f32 %v1534_v46, %v3502_v5  ;;  %v1579_v5 = vld [vmem:[%s3913_s6 + $0x18] sm:$0xff] }
 0x554   : > { %3204 = vmatpush3.msra.mxu1 %v1579_v5 }
 0x555   : > { %v1540_v49 = vsel %vm528_vm1, %v1537_v48, 0.0  ;;  %3205 = vmatprep.subr.mxu1 %v3385_v1 }
 0x556   : > { %1541 = vadd.xlane.f32.xlu0 %v1540_v49  ;;  %3206 = vmatpush3.msra.mxu1 %v1578_v58 }
 0x557   : > { %3207 = vmatprep.subr.mxu1 %v3385_v1 }
 0x558   : > { %3208 = vmatpush3.msra.mxu1 %v1577_v59  ;;  %v1742_v16 = vpop.f32.mrf.mxu0 }
 0x559   : > { %3209 = vmatprep.subr.mxu1 %v3385_v1  ;;  %v1743_v17 = vadd.f32 %v2991_v15, %v1742_v16 }
 0x55a   : > { %3210 = vmatpush3.msra.mxu1 %v1576_v62  ;;  %v3224_v18 = vpop.f32.mrf.mxu0 }
 0x55b   : > { %3225 = vmatprep.subr.mxu1 %v3385_v1  ;;  %3237 = vmatpush3.xpose.msk.msra.mxu0 %vm768_vm2, %v1743_v17 }
 0x55c   : > { %3246 = vmatprep.subr.mxu0 %v3385_v1 }
 0x56c   : > { %1994 = vrot.lane.b32.xlu0 %v1743_v17, %s3388_s19 }
 0x570   : > { %2162 = vrot.lane.b32.xlu0 %v1743_v17, %s3387_s18 }
 0x574   : > { %2329 = vrot.lane.b32.xlu0 %v1743_v17, %s3389_s20 }
 0x5df   : > { %v1542_v50 = vpop.xlane.xlu0 %1541 }
 0x5e0   : > { %v1544_v51 = vmul.f32 0.03125, %v1542_v50 }
 0x5e2   : > { %v1545_v52 = vsub.f32 %v1537_v48, %v1544_v51 }
 0x5e3   : > { %v1995_v26 = vpop.permute.xlu0 %1994 }
 0x5e4   : > { %v1546_v53 = vmul.f32 %v1545_v52, %v1545_v52  ;;  %v1557_v10 = vmul.f32 %v2982_v9, %v1545_v52 }
 0x5e6   : > { %v1547_v54 = vsel %vm528_vm1, %v1546_v53, 0.0 }
 0x5e7   : > { %1548 = vadd.xlane.f32.xlu1 %v1547_v54  ;;  %v2163_v28 = vpop.permute.xlu0 %2162 }
 0x5eb   : > { %v2330_v31 = vpop.permute.xlu0 %2329 }
 0x670   : > { %v1549_v63 = vpop.xlane.xlu1 %1548 }
 0x671   : > { %v1550_v0 = vmul.f32 0.03125, %v1549_v63 }
 0x673   : > { %v1558_v2 = vadd.f32 1e-12, %v1550_v0 }
 0x675   : > { %3349 = vrsqrt.f32 %v1558_v2  ;;  %vm1561_vm6 = vcmp.eq.f32.partialorder %v1558_v2, inf  ;;  %v1564_v6 = vand.u32 2147483648, %v1558_v2  ;;  %vm1563_vm7 = vcmp.eq.f32.partialorder %v1558_v2, 0.0 }
 0x682   : > { %v3350_v3 = vpop.eup %3349 }
 0x683   : > { %v1560_v4 = vmul.f32 %v3350_v3, %v1558_v2 }
 0x685   : > { %v1562_v7 = vsel %vm1561_vm6, %v1558_v2, %v1560_v4 }
 0x686   : > { %v1565_v8 = vsel %vm1563_vm7, %v1564_v6, %v1562_v7 }
 0x687   : > { %3351 = vrcp.f32 %v1565_v8 }
 0x694   : > { %v3352_v11 = vpop.eup %3351 }
 0x695   : > { %v1567_v13 = vmul.f32 %v3352_v11, %v1557_v10 }
 0x697   : > { %v3705_v14 = vadd.f32 %v2983_v12, %v1567_v13 }
 0x699   : > { %3212 = vmatmul.mubr.msk.f32.vlgmr.msra.gmra.mxu1 %vm528_vm1, %v3705_v14 }
 0x69a   : > { %3233 = vmatprep.mubr.msk.f32.mxu1 %vm3386_vm0, %v3385_v1  ;;  %3226 = vmatpush3.msra.mxu1 %v2996_v20 }
 0x69b   : > { %3227 = vmatprep.subr.mxu1 %v3385_v1 }
 0x69c   : > { %3228 = vmatpush3.msra.mxu1 %v2995_v21 }
 0x69d   : > { %3229 = vmatprep.subr.mxu1 %v3385_v1 }
 0x69e   : > { %3230 = vmatpush3.msra.mxu1 %v2994_v25 }
 0x69f   : > { %3231 = vmatprep.subr.mxu1 %v3385_v1 }
 0x6a0   : > { %3232 = vmatpush3.msra.mxu1 %v2993_v27 }
 0x6a1   : > { %3234 = vmatmul.mubr.msk.f32.vlgmr.msra.gmra.mxu1 %vm528_vm1, %v3685_v61  ;;  %3241 = vmatprep.subr.mxu1 %v3385_v1 }
 0x6a2   : > { %3243 = vmatprep.mubr.msk.f32.mxu1 %vm3386_vm0, %v3385_v1 }
 0x759   : > { %v1656_v22 = vpop.f32.mrf.mxu1 }
 0x75a   : > { %v1657_v23 = vadd.f32 %v2984_v19, %v1656_v22 }
 0x75b   : > { %v3213_v24 = vpop.f32.mrf.mxu1 }
 0x75c   : > { %1992 = vrot.lane.b32.xlu1 %v1657_v23, %s3388_s19  ;;  %3239 = vmatmul.mubr.msk.f32.vlgmr.msra.gmra.mxu0 %vm768_vm2, %v1657_v23 }
 0x75d   : > { %3247 = vmatpush3.xpose.msk.msra.mxu0 %vm768_vm2, %v1995_v26  ;;  %3248 = vmatprep.mubr.msk.f32.mxu0 %vm3386_vm0, %v3385_v1 }
 0x75e   : > { %3256 = vmatprep.subr.mxu0 %v3385_v1 }
 0x760   : > { %2160 = vrot.lane.b32.xlu1 %v1657_v23, %s3387_s18 }
 0x761   : > { %v1825_v40 = vpop.f32.mrf.mxu1 }
 0x762   : > { %v1826_v41 = vadd.f32 %v2998_v38, %v1825_v40 }
 0x763   : > { %v3235_v42 = vpop.f32.mrf.mxu1 }
 0x764   : > { %2327 = vrot.lane.b32.xlu1 %v1657_v23, %s3389_s20  ;;  %3242 = vmatpush3.msra.mxu1 %v1826_v41 }
 0x765   : > { %3251 = vmatprep.subr.mxu1 %v3385_v1 }
 0x7ce   : > { %v1993_v29 = vpop.permute.xlu1 %1992 }
 0x7cf   : > { %3249 = vmatmul.mubr.msk.f32.vlgmr.msra.gmra.mxu0 %vm768_vm2, %v1993_v29 }
 0x7d0   : > { %3257 = vmatpush3.xpose.msk.msra.mxu0 %vm768_vm2, %v2163_v28  ;;  %3258 = vmatprep.mubr.msk.f32.mxu0 %vm3386_vm0, %v3385_v1 }
 0x7d1   : > { %3266 = vmatprep.subr.mxu0 %v3385_v1 }
 0x7d2   : > { %v2161_v30 = vpop.permute.xlu1 %2160 }
 0x7d3   : > { %3259 = vmatmul.mubr.msk.f32.vlgmr.msra.gmra.mxu0 %vm768_vm2, %v2161_v30 }
 0x7d4   : > { %3267 = vmatpush3.xpose.msk.msra.mxu0 %vm768_vm2, %v2330_v31  ;;  %3268 = vmatprep.mubr.msk.f32.mxu0 %vm3386_vm0, %v3385_v1 }
 0x7d5   : > { %3276 = vmatprep.subr.mxu0 %v3385_v1 }
 0x7d6   : > { %v2328_v32 = vpop.permute.xlu1 %2327 }
 0x7d7   : > { %3269 = vmatmul.mubr.msk.f32.vlgmr.msra.gmra.mxu0 %vm768_vm2, %v2328_v32 }
 0x7d8   : > { %3284 = vmatprep.mubr.msk.f32.mxu0 %vm3386_vm0, %v3385_v1  ;;  %3277 = vmatpush3.msra.mxu0 %v3015_v33 }
 0x7d9   : > { %3278 = vmatprep.subr.mxu0 %v3385_v1 }
 0x81c   : > { %v1901_v34 = vpop.f32.mrf.mxu0 }
 0x81d   : > { %v1905_v35 = vmul.f32 0.35355338, %v1901_v34  ;;  %v3014_v34 = vld [vmem:[%s3913_s6 + $0x70] sm:$0xff] }
 0x81e   : > { %v3240_v36 = vpop.f32.mrf.mxu0  ;;  %3279 = vmatpush3.msra.mxu0 %v3014_v34 }
 0x81f   : > { %v1907_v37 = vsel %vm1906_vm8, -10000.0, %v1905_v35  ;;  %v3013_v35 = vld [vmem:[%s3913_s6 + $0x68] sm:$0xff]  ;;  %3280 = vmatprep.subr.mxu0 %v3385_v1  ;;  %v3012_v36 = vld [vmem:[%s3913_s6 + $0x60] sm:$0xff] }
 0x820   : > { %v1908_v39 = vsel %vm768_vm2, %v1907_v37, -inf  ;;  %3281 = vmatpush3.msra.mxu0 %v3013_v35 }
 0x821   : > { %1909 = vmax.xlane.f32.xlu0 %v1908_v39  ;;  %3282 = vmatprep.subr.mxu0 %v3385_v1 }
 0x822   : > { %3283 = vmatpush3.msra.mxu0 %v3012_v36 }
 0x823   : > { %3298 = vmatprep.subr.mxu0 %v3385_v1 }
 0x88f   : > { %v2066_v43 = vpop.f32.mrf.mxu0 }
 0x890   : > { %v2070_v44 = vmul.f32 0.35355338, %v2066_v43 }
 0x891   : > { %v3250_v45 = vpop.f32.mrf.mxu0 }
 0x892   : > { %v2071_v46 = vsel %vm1906_vm8, -10000.0, %v2070_v44 }
 0x893   : > { %v2234_v47 = vpop.f32.mrf.mxu0  ;;  %v2072_v48 = vsel %vm768_vm2, %v2071_v46, -inf }
 0x894   : > { %v2238_v49 = vmul.f32 0.35355338, %v2234_v47  ;;  %2073 = vmax.xlane.f32.xlu1 %v2072_v48 }
 0x895   : > { %v3260_v50 = vpop.f32.mrf.mxu0 }
 0x896   : > { %v2239_v51 = vsel %vm1906_vm8, -10000.0, %v2238_v49  ;;  %v3017_v49 = vld [vmem:[%s3914_s7 + $0x3] ss:$0 sm:$0xff] }
 0x897   : > { %v2401_v52 = vpop.f32.mrf.mxu0  ;;  %v2240_v53 = vsel %vm768_vm2, %v2239_v51, -inf }
 0x898   : > { %v2405_v54 = vmul.f32 0.35355338, %v2401_v52  ;;  %2241 = vmax.xlane.f32.xlu0 %v2240_v53 }
 0x899   : > { %v3270_v55 = vpop.f32.mrf.mxu0 }
 0x89a   : > { %v2406_v56 = vsel %vm1906_vm8, -10000.0, %v2405_v54 }
 0x89b   : > { %v2407_v5 = vsel %vm768_vm2, %v2406_v56, -inf }
 0x89c   : > { %2408 = vmax.xlane.f32.xlu0 %v2407_v5 }
 0x8a5   : > { %2084 = vrot.lane.b32.xlu1 %v1826_v41, %s3388_s19 }
 0x8aa   : > { %v1910_v57 = vpop.xlane.xlu0 %1909 }
 0x8ab   : > { %v1911_v58 = vsub.f32 %v1907_v37, %v1910_v57 }
 0x8ad   : > { %v1912_v59 = vmul.f32 1.442695, %v1911_v58 }
 0x8af   : > { %3353 = vpow2.f32 %v1912_v59  ;;  %v2637_v59 = vld [vmem:[%s3915_s8 + $0x18] sm:$0xff] }
 0x8bc   : > { %v3354_v60 = vpop.eup %3353 }
 0x8bd   : > { %v1914_v61 = vsel %vm768_vm2, %v3354_v60, 0.0 }
 0x8c9   : > { %1915 = vadd.xlane.f32.xlu1 %v1914_v61  ;;  %v2634_v61 = vld [vmem:[%s3915_s8] sm:$0xff] }
 0x91d   : > { %v2074_v62 = vpop.xlane.xlu1 %2073 }
 0x91e   : > { %v2075_v63 = vsub.f32 %v2071_v46, %v2074_v62  ;;  %v2726_v62 = vld [vmem:[%s3917_s10 + $0x38] sm:$0xff] }
 0x920   : > { %v2076_v0 = vmul.f32 1.442695, %v2075_v63  ;;  %v2725_v63 = vld [vmem:[%s3917_s10 + $0x30] sm:$0xff] }
 0x921   : > { %v2242_v2 = vpop.xlane.xlu0 %2241  ;;  %v2085_v16 = vpop.permute.xlu1 %2084 }
 0x922   : > { %3355 = vpow2.f32 %v2076_v0  ;;  %v2243_v3 = vsub.f32 %v2239_v51, %v2242_v2  ;;  %v2724_v0 = vld [vmem:[%s3917_s10 + $0x28] sm:$0xff]  ;;  %v2723_v2 = vld [vmem:[%s3917_s10 + $0x20] sm:$0xff] }
 0x924   : > { %v2244_v4 = vmul.f32 1.442695, %v2243_v3  ;;  %v2722_v3 = vld [vmem:[%s3917_s10 + $0x18] sm:$0xff] }
 0x925   : > { %v2409_v6 = vpop.xlane.xlu0 %2408 }
 0x926   : > { %3357 = vpow2.f32 %v2244_v4  ;;  %v2410_v7 = vsub.f32 %v2406_v56, %v2409_v6 }
 0x928   : > { %v2411_v8 = vmul.f32 1.442695, %v2410_v7 }
 0x92a   : > { %3359 = vpow2.f32 %v2411_v8 }
 0x92f   : > { %v3356_v9 = vpop.eup %3355 }
 0x930   : > { %v2078_v10 = vsel %vm768_vm2, %v3356_v9, 0.0 }
 0x931   : > { %2079 = vadd.xlane.f32.xlu0 %v2078_v10 }
 0x933   : > { %v3358_v11 = vpop.eup %3357 }
 0x934   : > { %v2246_v12 = vsel %vm768_vm2, %v3358_v11, 0.0 }
 0x935   : > { %2247 = vadd.xlane.f32.xlu1 %v2246_v12 }
 0x937   : > { %v3360_v13 = vpop.eup %3359 }
 0x938   : > { %v2413_v15 = vsel %vm768_vm2, %v3360_v13, 0.0 }
 0x939   : > { %2414 = vadd.xlane.f32.xlu0 %v2413_v15 }
 0x946   : > { %2418 = vrot.lane.b32.xlu1 %v1826_v41, %s3389_s20 }
 0x94f   : > { %2251 = vrot.lane.b32.xlu0 %v1826_v41, %s3387_s18 }
 0x952   : > { %v1916_v17 = vpop.xlane.xlu1 %1915 }
 0x953   : > { %3361 = vrcp.f32 %v1916_v17  ;;  %v3022_v17 = vld [vmem:[%s3920_s13 + $0x1] ss:$0 sm:$0xff] }
 0x960   : > { %v3362_v18 = vpop.eup %3361 }
 0x961   : > { %v1918_v19 = vmul.f32 %v3362_v18, %v3354_v60  ;;  %v2636_v60 = vld [vmem:[%s3915_s8 + $0x10] sm:$0xff] }
 0x963   : > { %3244 = vmatmul.mubr.msk.f32.vlgmr.msra.gmra.mxu1 %vm768_vm2, %v1918_v19 }
 0x964   : > { %3252 = vmatpush3.msra.mxu1 %v2085_v16  ;;  %3253 = vmatprep.mubr.msk.f32.mxu1 %vm3386_vm0, %v3385_v1 }
 0x965   : > { %3261 = vmatprep.subr.mxu1 %v3385_v1 }
 0x9ba   : > { %v2080_v20 = vpop.xlane.xlu0 %2079 }
 0x9bb   : > { %3363 = vrcp.f32 %v2080_v20  ;;  %v2721_v20 = vld [vmem:[%s3917_s10 + $0x10] sm:$0xff] }
 0x9be   : > { %v2248_v21 = vpop.xlane.xlu1 %2247 }
 0x9bf   : > { %3365 = vrcp.f32 %v2248_v21  ;;  %v2720_v21 = vld [vmem:[%s3917_s10 + $0x8] sm:$0xff] }
 0x9c2   : > { %v2415_v22 = vpop.xlane.xlu0 %2414  ;;  %v2419_v28 = vpop.permute.xlu1 %2418 }
 0x9c3   : > { %3367 = vrcp.f32 %v2415_v22  ;;  %v2719_v22 = vld [vmem:[%s3917_s10] sm:$0xff] }
 0x9c6   : > { %v2252_v25 = vpop.permute.xlu0 %2251 }
 0x9c8   : > { %v3364_v23 = vpop.eup %3363 }
 0x9c9   : > { %v2082_v24 = vmul.f32 %v3364_v23, %v3356_v9  ;;  %v3023_v23 = vld [vmem:[%s3916_s9] ss:$0 sm:$0xff] }
 0x9cb   : > { %3254 = vmatmul.mubr.msk.f32.vlgmr.msra.gmra.mxu1 %vm768_vm2, %v2082_v24 }
 0x9cc   : > { %v3366_v26 = vpop.eup %3365  ;;  %3262 = vmatpush3.msra.mxu1 %v2252_v25  ;;  %3263 = vmatprep.mubr.msk.f32.mxu1 %vm3386_vm0, %v3385_v1 }
 0x9cd   : > { %3271 = vmatprep.subr.mxu1 %v3385_v1  ;;  %v2250_v27 = vmul.f32 %v3366_v26, %v3358_v11 }
 0x9cf   : > { %3264 = vmatmul.mubr.msk.f32.vlgmr.msra.gmra.mxu1 %vm768_vm2, %v2250_v27 }
 0x9d0   : > { %v3368_v29 = vpop.eup %3367  ;;  %3272 = vmatpush3.msra.mxu1 %v2419_v28  ;;  %3273 = vmatprep.mubr.msk.f32.mxu1 %vm3386_vm0, %v3385_v1  ;;  %v3025_v28 = vld [vmem:[%s3918_s11] ss:$0 sm:$0xff] }
 0x9d1   : > { %v2417_v30 = vmul.f32 %v3368_v29, %v3360_v13  ;;  %3287 = vmatprep.subr.mxu1 %v3385_v1  ;;  %v3021_v13 = vld [vmem:[%s3919_s12 + $0x1] ss:$0 sm:$0xff] }
 0x9d3   : > { %3274 = vmatmul.mubr.msk.f32.vlgmr.msra.gmra.mxu1 %vm768_vm2, %v2417_v30 }
 0x9d4   : > { %3295 = vmatprep.mubr.msk.f32.mxu1 %vm3386_vm0, %v3385_v1  ;;  %3288 = vmatpush3.msra.mxu1 %v2637_v59 }
 0x9d5   : > { %3289 = vmatprep.subr.mxu1 %v3385_v1 }
 0x9d6   : > { %3290 = vmatpush3.msra.mxu1 %v2636_v60 }
 0x9d7   : > { %3291 = vmatprep.subr.mxu1 %v3385_v1 }
 0xa23   : > { %v1988_v31 = vpop.f32.mrf.mxu1 }
 0xa25   : > { %v3245_v32 = vpop.f32.mrf.mxu1 }
 0xa8b   : > { %v2156_v37 = vpop.f32.mrf.mxu1 }
 0xa8c   : > { %2495 = vrot.lane.b32.xlu1 %v2156_v37, %s3925_s15 }
 0xa8d   : > { %v3255_v38 = vpop.f32.mrf.mxu1 }
 0xa8f   : > { %v2323_v39 = vpop.f32.mrf.mxu1 }
 0xa90   : > { %2499 = vrot.lane.b32.xlu0 %v2323_v39, %s3926_s16  ;;  %s513_s16 = scalar_lea.vmem %s3921_s14, %s3492_s21 }
 0xa91   : > { %v3265_v40 = vpop.f32.mrf.mxu1 }
 0xa93   : > { %v2490_v41 = vpop.f32.mrf.mxu1 }
 0xa94   : > { %2503 = vrot.lane.b32.xlu1 %v2490_v41, %s3927_s17 }
 0xa95   : > { %v3275_v42 = vpop.f32.mrf.mxu1 }
 0xafe   : > { %v2496_v43 = vpop.permute.xlu1 %2495 }
 0xaff   : > { %v2506_v45 = vsel %vm768_vm2, %v1988_v31, %v2496_v43 }
 0xb02   : > { %v2500_v44 = vpop.permute.xlu0 %2499 }
 0xb03   : > { %v2507_v46 = vsel %vm1447_vm4, %v2506_v45, %v2500_v44 }
 0xb06   : > { %v2504_v47 = vpop.permute.xlu1 %2503 }
 0xb07   : > { %v2508_v48 = vsel %vm1449_vm5, %v2507_v46, %v2504_v47  ;;  %v3029_v46 = vld [vmem:[%s3919_s12 + $0x2] ss:$0 sm:$0xff] }
 0xb08   : > { %3285 = vmatmul.mubr.msk.f32.vlgmr.msra.gmra.mxu0 %vm528_vm1, %v2508_v48 }
 0xb09   : > { %3314 = vmatprep.mubr.msk.f32.mxu0 %vm3386_vm0, %v3385_v1  ;;  %3299 = vmatpush3.msra.mxu0 %v2726_v62 }
 0xb0a   : > { %3300 = vmatprep.subr.mxu0 %v3385_v1 }
 0xb0b   : > { %3301 = vmatpush3.msra.mxu0 %v2725_v63 }
 0xb0c   : > { %3302 = vmatprep.subr.mxu0 %v3385_v1 }
 0xb0d   : > { %3303 = vmatpush3.msra.mxu0 %v2724_v0 }
 0xb0e   : > { %3304 = vmatprep.subr.mxu0 %v3385_v1 }
 0xb0f   : > { %3305 = vmatpush3.msra.mxu0 %v2723_v2 }
 0xb10   : > { %3306 = vmatprep.subr.mxu0 %v3385_v1 }
 0xb11   : > { %3307 = vmatpush3.msra.mxu0 %v2722_v3 }
 0xb12   : > { %3308 = vmatprep.subr.mxu0 %v3385_v1 }
 0xb13   : > { %3309 = vmatpush3.msra.mxu0 %v2721_v20 }
 0xb14   : > { %3310 = vmatprep.subr.mxu0 %v3385_v1 }
 0xb15   : > { %3311 = vmatpush3.msra.mxu0 %v2720_v21 }
 0xb16   : > { %3312 = vmatprep.subr.mxu0 %v3385_v1 }
 0xb17   : > { %3313 = vmatpush3.msra.mxu0 %v2719_v22 }
 0xbc8   : > { %v2591_v50 = vpop.f32.mrf.mxu0 }
 0xbc9   : > { %v2592_v51 = vadd.f32 %v3017_v49, %v2591_v50  ;;  %v3030_v49 = vld [vmem:[%s3920_s13 + $0x2] ss:$0 sm:$0xff] }
 0xbca   : > { %v3286_v52 = vpop.f32.mrf.mxu0 }
 0xbcb   : > { %v2595_v53 = vadd.f32 %v2592_v51, %v3705_v14  ;;  %v2635_v14 = vld [vmem:[%s3915_s8 + $0x8] sm:$0xff] }
 0xbcc   : > { %3292 = vmatpush3.msra.mxu1 %v2635_v14 }
 0xbcd   : > { %v2600_v54 = vsel %vm528_vm1, %v2595_v53, 0.0  ;;  %3293 = vmatprep.subr.mxu1 %v3385_v1 }
 0xbce   : > { %2601 = vadd.xlane.f32.xlu0 %v2600_v54  ;;  %3294 = vmatpush3.msra.mxu1 %v2634_v61 }
 0xc57   : > { %v2602_v55 = vpop.xlane.xlu0 %2601 }
 0xc58   : > { %v2603_v56 = vmul.f32 0.03125, %v2602_v55 }
 0xc5a   : > { %v2604_v5 = vsub.f32 %v2595_v53, %v2603_v56 }
 0xc5c   : > { %v2605_v57 = vmul.f32 %v2604_v5, %v2604_v5  ;;  %v2616_v15 = vmul.f32 %v3021_v13, %v2604_v5 }
 0xc5e   : > { %v2606_v58 = vsel %vm528_vm1, %v2605_v57, 0.0 }
 0xc5f   : > { %2607 = vadd.xlane.f32.xlu1 %v2606_v58 }
 0xce8   : > { %v2608_v4 = vpop.xlane.xlu1 %2607 }
 0xce9   : > { %v2609_v6 = vmul.f32 0.03125, %v2608_v4 }
 0xceb   : > { %v2617_v7 = vadd.f32 1e-12, %v2609_v6 }
 0xced   : > { %3369 = vrsqrt.f32 %v2617_v7  ;;  %vm2620_vm9 = vcmp.eq.f32.partialorder %v2617_v7, inf  ;;  %v2623_v10 = vand.u32 2147483648, %v2617_v7  ;;  %vm2622_vm10 = vcmp.eq.f32.partialorder %v2617_v7, 0.0 }
 0xcfa   : > { %v3370_v8 = vpop.eup %3369 }
 0xcfb   : > { %v2619_v9 = vmul.f32 %v3370_v8, %v2617_v7 }
 0xcfd   : > { %v2621_v11 = vsel %vm2620_vm9, %v2617_v7, %v2619_v9 }
 0xcfe   : > { %v2624_v12 = vsel %vm2622_vm10, %v2623_v10, %v2621_v11 }
 0xcff   : > { %3371 = vrcp.f32 %v2624_v12 }
 0xd0c   : > { %v3372_v16 = vpop.eup %3371 }
 0xd0d   : > { %v2626_v18 = vmul.f32 %v3372_v16, %v2616_v15 }
 0xd0f   : > { %v2633_v19 = vadd.f32 %v3022_v17, %v2626_v18 }
 0xd11   : > { %3296 = vmatmul.mubr.msk.f32.vlgmr.msra.gmra.mxu1 %vm528_vm1, %v2633_v19 }
 0xdd1   : > { %v2714_v24 = vpop.f32.mrf.mxu1 }
 0xdd2   : > { %v2715_v25 = vadd.f32 %v3023_v23, %v2714_v24 }
 0xdd3   : > { %v3297_v26 = vpop.f32.mrf.mxu1 }
 0xdd4   : > { %v2718_v27 = vmax.f32 %v2715_v25, 0.0 }
 0xdd6   : > { %3315 = vmatmul.mubr.msk.f32.vlgmr.msra.gmra.mxu0 %vm2734_vm11, %v2718_v27 }
 0xe96   : > { %v2804_v29 = vpop.f32.mrf.mxu0 }
 0xe97   : > { %v2805_v30 = vadd.f32 %v3025_v28, %v2804_v29 }
 0xe98   : > { %v3316_v31 = vpop.f32.mrf.mxu0 }
 0xe99   : > { %v2808_v32 = vadd.f32 %v2805_v30, %v2633_v19 }
 0xe9b   : > { %v2813_v1 = vsel %vm528_vm1, %v2808_v32, 0.0 }
 0xe9c   : > { %2814 = vadd.xlane.f32.xlu0 %v2813_v1 }
 0xf25   : > { %v2815_v33 = vpop.xlane.xlu0 %2814 }
 0xf26   : > { %v2816_v34 = vmul.f32 0.03125, %v2815_v33 }
 0xf28   : > { %v2817_v35 = vsub.f32 %v2808_v32, %v2816_v34 }
 0xf2a   : > { %v2818_v36 = vmul.f32 %v2817_v35, %v2817_v35  ;;  %v2829_v47 = vmul.f32 %v3029_v46, %v2817_v35 }
 0xf2c   : > { %v2819_v37 = vsel %vm528_vm1, %v2818_v36, 0.0 }
 0xf2d   : > { %2820 = vadd.xlane.f32.xlu0 %v2819_v37 }
 0xfb6   : > { %v2821_v38 = vpop.xlane.xlu0 %2820 }
 0xfb7   : > { %v2822_v39 = vmul.f32 0.03125, %v2821_v38 }
 0xfb9   : > { %v2830_v40 = vadd.f32 1e-12, %v2822_v39 }
 0xfbb   : > { %3373 = vrsqrt.f32 %v2830_v40  ;;  %vm2833_vm12 = vcmp.eq.f32.partialorder %v2830_v40, inf  ;;  %v2836_v43 = vand.u32 2147483648, %v2830_v40  ;;  %vm2835_vm13 = vcmp.eq.f32.partialorder %v2830_v40, 0.0 }
 0xfc8   : > { %v3374_v41 = vpop.eup %3373 }
 0xfc9   : > { %v2832_v42 = vmul.f32 %v3374_v41, %v2830_v40 }
 0xfcb   : > { %v2834_v44 = vsel %vm2833_vm12, %v2830_v40, %v2832_v42 }
 0xfcc   : > { %v2837_v45 = vsel %vm2835_vm13, %v2836_v43, %v2834_v44 }
 0xfcd   : > { %3375 = vrcp.f32 %v2837_v45 }
 0xfda   : > { %v3376_v48 = vpop.eup %3375 }
 0xfdb   : > { %v2839_v50 = vmul.f32 %v3376_v48, %v2829_v47 }
 0xfdd   : > { %v2846_v51 = vadd.f32 %v3030_v49, %v2839_v50 }
 0xfdf   : > { %2847 = vst.msk [vmem:[%s513_s16] sm:$0xff] %vm528_vm1, %v2846_v51 }
 0xfe0 PF: > { %s24_s29 = sadd.s32 1, %s3383_s29  }
 0xfe1   : > { %p21_p4 = scmp.ge.s32.totalorder %s24_s29, 4  }
 0xfe3   :  { %23 = sbr.rel (!%p21_p4) target bundleno = 1 (0x1), region = 131 }

// kernel: decoder_forward.5
= control target key start
LH: loop header
LB: loop body
LE: loop exit
PB: predicated region body
PF: predicated region fallthrough
CT: control target
= control target key end

     0   :  { %vm28_vm0 = vcmask 261120   ;;  %s220_s0 = inlined_call_operand.vmem [shape: f32[16,32], index: 0, kind: input, shape index: {}]   ;;  %s221_s1 = inlined_call_operand.vmem [shape: f32[32,128], index: 1, kind: input, shape index: {}]   ;;  %s222_s2 = inlined_call_operand.vmem [shape: f32[1,128], index: 2, kind: input, shape index: {}]   ;;  %s223_s3 = inlined_call_operand.hbm [shape: f32[16,128], index: 3, kind: output, shape index: {}]  }
   0x1   :  { %v20_v0 = vld [vmem:[%s221_s1 + $0x18] sm:$0xff]  ;;  %v19_v1 = vld [vmem:[%s221_s1 + $0x10] sm:$0xff]  ;;  %v15_v2 = vld [vmem:[%s220_s0] sm:$0xff] }
   0x2   :  { %137 = vmatprep.subr.mxu0 %v20_v0  ;;  %v18_v3 = vld [vmem:[%s221_s1 + $0x8] sm:$0xff]  ;;  %145 = vmatprep.mubr.msk.f32.mxu0 %vm28_vm0, %v15_v2 }
   0x3   :  { %138 = vmatpush3.msra.mxu0 %v20_v0 }
   0x4   :  { %8 = vsyncpa [#allocation3], 0  ;;  %139 = vmatprep.subr.mxu0 %v19_v1  ;;  %v17_v4 = vld [vmem:[%s221_s1] sm:$0xff]  ;;  %v16_v5 = vld [vmem:[%s220_s0 + $0x8] sm:$0xff]  ;;  %s173_s26 = smov [#allocation2]  }
   0x5   :  { %140 = vmatpush3.msra.mxu0 %v19_v1  ;;  %v128_v6 = vld [vmem:[%s222_s2] ss:$0 sm:$0xff]  ;;  %s117_s27 = sshll.u32 %s173_s26, 4  ;;  %s118_s27 = int_to_ptr.vmem [resolvable:$true] %s117_s27 }
   0x6   :  { %141 = vmatprep.subr.mxu0 %v18_v3  ;;  %s151_s1 = scalar_lea.vmem %s118_s27, 256  ;;  %p156_p1 = scmp.lt.s32.totalorder %s118_s27, %s118_s27 }
   0x7   :  { %142 = vmatpush3.msra.mxu0 %v18_v3  ;;  %p152_p0 = scmp.ne.s32.totalorder %s118_s27, %s151_s1  ;;  %p157_p2 = scmp.lt.s32.totalorder %s151_s1, %s151_s1 }
   0x8   :  { %143 = vmatprep.subr.mxu0 %v17_v4 }
   0x9   :  { %144 = vmatpush3.msra.mxu0 %v17_v4  ;;  %p158_p3 = por %p157_p2, %p156_p1 }
   0xa   :  { %146 = vmatmul.mubr.msk.f32.vlgmr.msra.gmra.mxu0 %vm28_vm0, %v16_v5 }
   0xb   :  { %p159_p4 = pnand %p158_p3, %p152_p0 }
  0xca   :  { %v147_v7 = vpop.f32.mrf.mxu0 }
  0xcb   :  { %v107_v8 = vadd.f32 %v147_v7, %v128_v6 }
  0xcc   :  { %v101_v9 = vpop.f32.mrf.mxu0 }
  0xcd   :  { %111 = vst [vmem:[#allocation2 + $0x8] sm:$0xff] %v107_v8  ;;  %v102_v10 = vadd.f32 %v128_v6, %v101_v9 }
  0xcf   :  { %110 = vst [vmem:[#allocation2] sm:$0xff] %v102_v10 }
  0xd0   :  { %162 = shalt.err (!%p159_p4)
}
  0xd1   :  { %s174_s0 = smov 128   ;;  %s175_s28 = smov 8  }
  0xd2   :  { %123 = dma.vmem_to_hbm [thread:$0]  %s118_s27, 256, %s223_s3, [#allocation3], %s174_s0, %s174_s0, %s175_s28  }
  0xd3   :  { %171 = dma.done.wait [#allocation3], 256  }
  0xd4   :  { %172 = vsyncadd [#allocation3], 4294967040 }
  0xd5   :  { %127 = vsyncpa [#allocation3], 1 }

// kernel: decoder_forward.3
= control target key start
LH: loop header
LB: loop body
LE: loop exit
PB: predicated region body
PF: predicated region fallthrough
CT: control target
= control target key end

     0   :  { %s3468_s29 = smov 0   ;;  %s3907_s0 = inlined_call_operand.vmem [shape: f32[2,8,32], index: 0, kind: input, shape index: {}]   ;;  %s3908_s1 = inlined_call_operand.vmem [shape: f32[2,8,32], index: 1, kind: input, shape index: {}]   ;;  %s3909_s2 = inlined_call_operand.vmem [shape: s32[2,1,8,8], index: 2, kind: input, shape index: {}]   ;;  %s3910_s3 = inlined_call_operand.vmem [shape: s32[2,1,8,8], index: 3, kind: input, shape index: {}]   ;;  %s3911_s4 = inlined_call_operand.vmem [shape: f32[4,32,32], index: 4, kind: input, shape index: {}]   ;;  %s3912_s5 = inlined_call_operand.vmem [shape: f32[4,1,32], index: 5, kind: input, shape index: {}]   ;;  %s3913_s6 = inlined_call_operand.vmem [shape: f32[4,32,32], index: 6, kind: input, shape index: {}]   ;;  %s3914_s7 = inlined_call_operand.vmem [shape: f32[4,1,32], index: 7, kind: input, shape index: {}]   ;;  %s3915_s8 = inlined_call_operand.vmem [shape: f32[32,64], index: 8, kind: input, shape index: {}]   ;;  %s3916_s9 = inlined_call_operand.vmem [shape: f32[1,64], index: 9, kind: input, shape index: {}]   ;;  %s3917_s10 = inlined_call_operand.vmem [shape: f32[64,32], index: 10, kind: input, shape index: {}]   ;;  %s3918_s11 = inlined_call_operand.vmem [shape: f32[1,32], index: 11, kind: input, shape index: {}]   ;;  %s3919_s12 = inlined_call_operand.vmem [shape: f32[3,1,32], index: 12, kind: input, shape index: {}]   ;;  %s3920_s13 = inlined_call_operand.vmem [shape: f32[3,1,32], index: 13, kind: input, shape index: {}]   ;;  %s3921_s14 = inlined_call_operand.vmem [shape: f32[2,8,32], index: 14, kind: output, shape index: {}]  }
   0x1 LB: > { %s2937_s30 = sadd.s32 4294967295, %s3383_s29   ;;  %p2941_p0 = scmp.ge.s32.totalorder %s3383_s29, 1  ;;  %s3383_s29 = sphi %s3468_s29, %s24_s29  }
   0x2   : > { %p438_p1 = scmp.lt.s32.totalorder %s3383_s29, 3 }
   0x4   : > { %p439_p2 = pnand %p2941_p0, %p438_p1 }
   0x5   : > { %p494_p3 = scmp.lt.s32.totalorder (!%p439_p2), %s2937_s30, 1  ;;  %s3387_s18 = smov (!%p439_p2), 112  }
   0x6   : > { %442 = sbr.rel (%p439_p2) target bundleno = 4064 (0xfe0), region = 76  ;;  %s3388_s19 = smov (!%p439_p2), 120  }
   0x7   : > { %s3389_s20 = smov (!%p439_p2), 104   ;;  %s3924_s24 = smov (!%p439_p2), 8  }
   0x8   : > { %s3923_s25 = smov (!%p439_p2), 16   ;;  %s3925_s15 = smov (!%p439_p2), 8  }
   0x9   : > { %s3926_s16 = smov (!%p439_p2), 16   ;;  %s3927_s17 = smov (!%p439_p2), 24  }
   0xb   : > { %v520_v0 = vld [vmem:[%s3911_s4 + $0x18] sm:$0xff]  ;;  %v3385_v1 = vmov 0.0   ;;  %v519_v2 = vld [vmem:[%s3911_s4 + $0x10] sm:$0xff]  ;;  %vm3386_vm0 = vmmov 0   ;;  %s3929_s30 = smov (!%p494_p3, %s2937_s30), 1  ;;  %v518_v3 = vld [vmem:[%s3911_s4 + $0x8] sm:$0xff] }
   0xc   : > { %3119 = vmatprep.subr.mxu1 %v3385_v1  ;;  %3127 = vmatprep.mubr.msk.f32.mxu1 %vm3386_vm0, %v3385_v1  ;;  %s3492_s21 = sshll.u32 %s3929_s30, 3  ;;  %v517_v4 = vld [vmem:[%s3911_s4] sm:$0xff]  ;;  %vm528_vm1 = vcmask 261120   ;;  %v2952_v6 = vld [vmem:[%s3911_s4 + $0x38] sm:$0xff]  ;;  %v2951_v7 = vld [vmem:[%s3911_s4 + $0x30] sm:$0xff]  ;;  %vm768_vm2 = vcmask 64512  }
   0xd   : > { %3120 = vmatpush3.msra.mxu1 %v520_v0  ;;  %3141 = vmatprep.subr.mxu0 %v3385_v1  ;;  %s497_s26 = scalar_lea.vmem %s3907_s0, %s3492_s21  ;;  %v2950_v8 = vld [vmem:[%s3911_s4 + $0x28] sm:$0xff]  ;;  %v2949_v9 = vld [vmem:[%s3911_s4 + $0x20] sm:$0xff]  ;;  %v2959_v10 = vld [vmem:[%s3911_s4 + $0x58] sm:$0xff]  ;;  %vm1447_vm4 = vcmask 130048   ;;  %vm1449_vm5 = vcmask 195584   ;;  %s501_s30 = scalar_lea.vmem %s3908_s1, %s3492_s21  ;;  %vm2734_vm11 = vcmask 523264  }
   0xe   : > { %3121 = vmatprep.subr.mxu1 %v3385_v1  ;;  %3149 = vmatprep.mubr.msk.f32.mxu0 %vm3386_vm0, %v3385_v1  ;;  %v3502_v5 = vld [vmem:[%s497_s26] sm:$0xff]  ;;  %v2958_v11 = vld [vmem:[%s3911_s4 + $0x50] sm:$0xff]  ;;  %v2957_v12 = vld [vmem:[%s3911_s4 + $0x48] sm:$0xff]  ;;  %s505_s26 = scalar_lea.vmem %s3909_s2, %s3492_s21  ;;  %s509_s22 = scalar_lea.vmem %s3910_s3, %s3492_s21 }
   0xf   : > { %3122 = vmatpush3.msra.mxu1 %v519_v2  ;;  %3142 = vmatpush3.msra.mxu0 %v2959_v10  ;;  %v2956_v13 = vld [vmem:[%s3911_s4 + $0x40] sm:$0xff] }
  0x10   : > { %3123 = vmatprep.subr.mxu1 %v3385_v1  ;;  %3143 = vmatprep.subr.mxu0 %v3385_v1  ;;  %v2954_v16 = vld [vmem:[%s3912_s5 + $0x1] ss:$0 sm:$0xff]  ;;  %v2947_v19 = vld [vmem:[%s3912_s5] ss:$0 sm:$0xff]  ;;  %v2961_v22 = vld [vmem:[%s3912_s5 + $0x2] ss:$0 sm:$0xff] }
  0x11   : > { %3124 = vmatpush3.msra.mxu1 %v518_v3  ;;  %3144 = vmatpush3.msra.mxu0 %v2958_v11  ;;  %v516_v32 = vld [vmem:[%s505_s26] sm:$0xff]  ;;  %s3922_s26 = smov 24  }
  0x12   : > { %3125 = vmatprep.subr.mxu1 %v3385_v1  ;;  %3145 = vmatprep.subr.mxu0 %v3385_v1  ;;  %vm846_vm3 = vcmp.eq.s32.totalorder %v516_v32, 0 }
  0x13   : > { %3126 = vmatpush3.msra.mxu1 %v517_v4  ;;  %3146 = vmatpush3.msra.mxu0 %v2957_v12 }
  0x14   : > { %3128 = vmatmul.mubr.msk.f32.vlgmr.msra.gmra.mxu1 %vm528_vm1, %v3502_v5  ;;  %3130 = vmatprep.subr.mxu1 %v3385_v1 }
  0x15   : > { %3131 = vmatpush3.msra.mxu1 %v2952_v6  ;;  %3138 = vmatprep.mubr.msk.f32.mxu1 %vm3386_vm0, %v3385_v1 }
  0x16   : > { %3132 = vmatprep.subr.mxu1 %v3385_v1  ;;  %3147 = vmatprep.subr.mxu0 %v3385_v1 }
  0x17   : > { %3133 = vmatpush3.msra.mxu1 %v2951_v7  ;;  %3148 = vmatpush3.msra.mxu0 %v2956_v13 }
  0x18   : > { %3134 = vmatprep.subr.mxu1 %v3385_v1  ;;  %3150 = vmatmul.mubr.msk.f32.vlgmr.msra.gmra.mxu0 %vm528_vm1, %v3502_v5 }
  0x19   : > { %3135 = vmatpush3.msra.mxu1 %v2950_v8  ;;  %3162 = vmatprep.subr.mxu0 %v3385_v1 }
  0x1a   : > { %3136 = vmatprep.subr.mxu1 %v3385_v1  ;;  %3164 = vmatprep.mubr.msk.f32.mxu0 %vm3386_vm0, %v3385_v1 }
  0x1b   : > { %3137 = vmatpush3.msra.mxu1 %v2949_v9 }
  0x1c   : > { %3139 = vmatmul.mubr.msk.f32.vlgmr.msra.gmra.mxu1 %vm528_vm1, %v3502_v5  ;;  %3152 = vmatprep.subr.mxu1 %v3385_v1 }
  0x1d   : > { %3154 = vmatprep.mubr.msk.f32.mxu1 %vm3386_vm0, %v3385_v1 }
  0xd4   : > { %v598_v14 = vpop.f32.mrf.mxu1 }
  0xd5   : > { %v599_v21 = vadd.f32 %v2947_v19, %v598_v14 }
  0xd6   : > { %v3129_v15 = vpop.f32.mrf.mxu1 }
  0xd8   : > { %v764_v23 = vpop.f32.mrf.mxu0 }
  0xd9   : > { %v3570_v24 = vadd.f32 %v2961_v22, %v764_v23 }
  0xda   : > { %v3151_v25 = vpop.f32.mrf.mxu0 }
  0xdc   : > { %v681_v17 = vpop.f32.mrf.mxu1 }
  0xdd   : > { %v682_v18 = vadd.f32 %v2954_v16, %v681_v17 }
  0xde   : > { %v3140_v20 = vpop.f32.mrf.mxu1 }
  0xdf   : > { %1102 = vrot.lane.b32.xlu1 %v682_v18, %s3387_s18  ;;  %934 = vrot.lane.b32.xlu0 %v682_v18, %s3388_s19 }
  0xe0   : > { %3153 = vmatpush3.xpose.msk.msra.mxu1 %vm768_vm2, %v682_v18 }
  0xe1   : > { %3157 = vmatprep.subr.mxu1 %v3385_v1 }
  0xe3   : > { %3155 = vmatmul.mubr.msk.f32.vlgmr.msra.gmra.mxu1 %vm768_vm2, %v599_v21  ;;  %1100 = vrot.lane.b32.xlu1 %v599_v21, %s3387_s18 }
  0xe4   : > { %932 = vrot.lane.b32.xlu0 %v599_v21, %s3388_s19  ;;  %3159 = vmatprep.mubr.msk.f32.mxu1 %vm3386_vm0, %v3385_v1 }
  0xe5   : > { %3158 = vmatpush3.msra.mxu1 %v3570_v24 }
  0xe6   : > { %3167 = vmatprep.subr.mxu1 %v3385_v1 }
  0xe7   : > { %1267 = vrot.lane.b32.xlu1 %v599_v21, %s3389_s20 }
  0xe8   : > { %1269 = vrot.lane.b32.xlu0 %v682_v18, %s3389_s20 }
 0x151   : > { %v935_v26 = vpop.permute.xlu0 %934  ;;  %v1103_v27 = vpop.permute.xlu1 %1102 }
 0x152   : > { %3163 = vmatpush3.xpose.msk.msra.mxu0 %vm768_vm2, %v935_v26 }
 0x153   : > { %3172 = vmatprep.subr.mxu0 %v3385_v1 }
 0x155   : > { %v1101_v29 = vpop.permute.xlu1 %1100 }
 0x156   : > { %v933_v28 = vpop.permute.xlu0 %932 }
 0x157   : > { %3165 = vmatmul.mubr.msk.f32.vlgmr.msra.gmra.mxu0 %vm768_vm2, %v933_v28  ;;  %v2978_v28 = vld [vmem:[%s3911_s4 + $0x78] sm:$0xff] }
 0x158   : > { %3173 = vmatpush3.xpose.msk.msra.mxu0 %vm768_vm2, %v1103_v27  ;;  %3174 = vmatprep.mubr.msk.f32.mxu0 %vm3386_vm0, %v3385_v1 }
 0x159   : > { %3182 = vmatprep.subr.mxu0 %v3385_v1  ;;  %v1268_v31 = vpop.permute.xlu1 %1267 }
 0x15a   : > { %v1270_v30 = vpop.permute.xlu0 %1269 }
 0x15b   : > { %3175 = vmatmul.mubr.msk.f32.vlgmr.msra.gmra.mxu0 %vm768_vm2, %v1101_v29  ;;  %v2977_v29 = vld [vmem:[%s3911_s4 + $0x70] sm:$0xff] }
 0x15c   : > { %3183 = vmatpush3.xpose.msk.msra.mxu0 %vm768_vm2, %v1270_v30  ;;  %3184 = vmatprep.mubr.msk.f32.mxu0 %vm3386_vm0, %v3385_v1  ;;  %v2976_v30 = vld [vmem:[%s3911_s4 + $0x68] sm:$0xff] }
 0x15d   : > { %3192 = vmatprep.subr.mxu0 %v3385_v1 }
 0x15f   : > { %3185 = vmatmul.mubr.msk.f32.vlgmr.msra.gmra.mxu0 %vm768_vm2, %v1268_v31  ;;  %v2975_v31 = vld [vmem:[%s3911_s4 + $0x60] sm:$0xff] }
 0x160   : > { %3200 = vmatprep.mubr.msk.f32.mxu0 %vm3386_vm0, %v3385_v1  ;;  %3193 = vmatpush3.msra.mxu0 %v2978_v28 }
 0x161   : > { %3194 = vmatprep.subr.mxu0 %v3385_v1 }
 0x162   : > { %3195 = vmatpush3.msra.mxu0 %v2977_v29 }
 0x163   : > { %3196 = vmatprep.subr.mxu0 %v3385_v1 }
 0x164   : > { %3197 = vmatpush3.msra.mxu0 %v2976_v30 }
 0x165   : > { %3198 = vmatprep.subr.mxu0 %v3385_v1 }
 0x166   : > { %3199 = vmatpush3.msra.mxu0 %v2975_v31 }
 0x167   : > { %3214 = vmatprep.subr.mxu0 %v3385_v1 }
 0x1a3   : > { %v841_v33 = vpop.f32.mrf.mxu1 }
 0x1a4   : > { %v845_v34 = vmul.f32 0.35355338, %v841_v33 }
 0x1a5   : > { %v3156_v35 = vpop.f32.mrf.mxu1 }
 0x1a6   : > { %v847_v36 = vsel %vm846_vm3, -10000.0, %v845_v34 }
 0x1a7   : > { %v848_v37 = vsel %vm768_vm2, %v847_v36, -inf }
 0x1a8   : > { %849 = vmax.xlane.f32.xlu0 %v848_v37 }
 0x217   : > { %v1006_v38 = vpop.f32.mrf.mxu0 }
 0x218   : > { %v1010_v39 = vmul.f32 0.35355338, %v1006_v38 }
 0x219   : > { %v3166_v40 = vpop.f32.mrf.mxu0 }
 0x21a   : > { %v1011_v41 = vsel %vm846_vm3, -10000.0, %v1010_v39 }
 0x21b   : > { %v1174_v42 = vpop.f32.mrf.mxu0  ;;  %v1012_v43 = vsel %vm768_vm2, %v1011_v41, -inf }
 0x21c   : > { %v1178_v44 = vmul.f32 0.35355338, %v1174_v42  ;;  %1013 = vmax.xlane.f32.xlu1 %v1012_v43 }
 0x21d   : > { %v3176_v45 = vpop.f32.mrf.mxu0 }
 0x21e   : > { %v1179_v46 = vsel %vm846_vm3, -10000.0, %v1178_v44  ;;  %v2980_v44 = vld [vmem:[%s3912_s5 + $0x3] ss:$0 sm:$0xff] }
 0x21f   : > { %v1341_v47 = vpop.f32.mrf.mxu0  ;;  %v1180_v48 = vsel %vm768_vm2, %v1179_v46, -inf }
 0x220   : > { %v1345_v49 = vmul.f32 0.35355338, %v1341_v47  ;;  %1181 = vmax.xlane.f32.xlu0 %v1180_v48 }
 0x221   : > { %v3186_v50 = vpop.f32.mrf.mxu0 }
 0x222   : > { %v1346_v51 = vsel %vm846_vm3, -10000.0, %v1345_v49 }
 0x223   : > { %v1347_v52 = vsel %vm768_vm2, %v1346_v51, -inf }
 0x224   : > { %1348 = vmax.xlane.f32.xlu0 %v1347_v52 }
 0x22d   : > { %1024 = vrot.lane.b32.xlu1 %v3570_v24, %s3388_s19 }
 0x231   : > { %v850_v53 = vpop.xlane.xlu0 %849 }
 0x232   : > { %v851_v54 = vsub.f32 %v847_v36, %v850_v53 }
 0x234   : > { %v852_v55 = vmul.f32 1.442695, %v851_v54 }
 0x236   : > { %3333 = vpow2.f32 %v852_v55  ;;  %v2989_v55 = vld [vmem:[%s3913_s6 + $0x38] sm:$0xff] }
 0x243   : > { %v3334_v56 = vpop.eup %3333 }
 0x244   : > { %v854_v57 = vsel %vm768_vm2, %v3334_v56, 0.0 }
 0x251   : > { %855 = vadd.xlane.f32.xlu1 %v854_v57  ;;  %v2987_v57 = vld [vmem:[%s3913_s6 + $0x28] sm:$0xff] }
 0x2a5   : > { %v1014_v58 = vpop.xlane.xlu1 %1013 }
 0x2a6   : > { %v1015_v59 = vsub.f32 %v1011_v41, %v1014_v58  ;;  %v1578_v58 = vld [vmem:[%s3913_s6 + $0x10] sm:$0xff] }
 0x2a8   : > { %v1016_v60 = vmul.f32 1.442695, %v1015_v59  ;;  %v1577_v59 = vld [vmem:[%s3913_s6 + $0x8] sm:$0xff] }
 0x2a9   : > { %v1182_v61 = vpop.xlane.xlu0 %1181  ;;  %v1025_v11 = vpop.permute.xlu1 %1024 }
 0x2aa   : > { %3335 = vpow2.f32 %v1016_v60  ;;  %v1183_v62 = vsub.f32 %v1179_v46, %v1182_v61  ;;  %v2986_v60 = vld [vmem:[%s3913_s6 + $0x20] sm:$0xff] }
 0x2ab   : > { %v3685_v61 = vld [vmem:[%s501_s30] sm:$0xff] }
 0x2ac   : > { %v1184_v63 = vmul.f32 1.442695, %v1183_v62  ;;  %v1576_v62 = vld [vmem:[%s3913_s6] sm:$0xff] }
 0x2ad   : > { %v1349_v0 = vpop.xlane.xlu0 %1348 }
 0x2ae   : > { %3337 = vpow2.f32 %v1184_v63  ;;  %v1350_v2 = vsub.f32 %v1346_v51, %v1349_v0 }
 0x2b0   : > { %v1351_v3 = vmul.f32 1.442695, %v1350_v2 }
 0x2b2   : > { %3339 = vpow2.f32 %v1351_v3 }
 0x2b7   : > { %v3336_v4 = vpop.eup %3335 }
 0x2b8   : > { %v1018_v6 = vsel %vm768_vm2, %v3336_v4, 0.0 }
 0x2b9   : > { %1019 = vadd.xlane.f32.xlu0 %v1018_v6 }
 0x2bb   : > { %v3338_v7 = vpop.eup %3337 }
 0x2bc   : > { %v1186_v8 = vsel %vm768_vm2, %v3338_v7, 0.0 }
 0x2bd   : > { %1187 = vadd.xlane.f32.xlu1 %v1186_v8 }
 0x2bf   : > { %v3340_v9 = vpop.eup %3339 }
 0x2c0   : > { %v1353_v10 = vsel %vm768_vm2, %v3340_v9, 0.0 }
 0x2c1   : > { %1354 = vadd.xlane.f32.xlu0 %v1353_v10 }
 0x2ce   : > { %1358 = vrot.lane.b32.xlu1 %v3570_v24, %s3389_s20 }
 0x2d7   : > { %1191 = vrot.lane.b32.xlu0 %v3570_v24, %s3387_s18 }
 0x2da   : > { %v856_v12 = vpop.xlane.xlu1 %855 }
 0x2db   : > { %3341 = vrcp.f32 %v856_v12  ;;  %v2983_v12 = vld [vmem:[%s3920_s13] ss:$0 sm:$0xff] }
 0x2e8   : > { %v3342_v13 = vpop.eup %3341 }
 0x2e9   : > { %v858_v14 = vmul.f32 %v3342_v13, %v3334_v56  ;;  %v2988_v56 = vld [vmem:[%s3913_s6 + $0x30] sm:$0xff] }
 0x2eb   : > { %3160 = vmatmul.mubr.msk.f32.vlgmr.msra.gmra.mxu1 %vm768_vm2, %v858_v14 }
 0x2ec   : > { %3168 = vmatpush3.msra.mxu1 %v1025_v11  ;;  %3169 = vmatprep.mubr.msk.f32.mxu1 %vm3386_vm0, %v3385_v1 }
 0x2ed   : > { %3177 = vmatprep.subr.mxu1 %v3385_v1 }
 0x342   : > { %v1020_v15 = vpop.xlane.xlu0 %1019 }
 0x343   : > { %3343 = vrcp.f32 %v1020_v15  ;;  %v2991_v15 = vld [vmem:[%s3914_s7 + $0x1] ss:$0 sm:$0xff] }
 0x346   : > { %v1188_v16 = vpop.xlane.xlu1 %1187 }
 0x347   : > { %3345 = vrcp.f32 %v1188_v16 }
 0x34a   : > { %v1355_v17 = vpop.xlane.xlu0 %1354  ;;  %v1359_v23 = vpop.permute.xlu1 %1358 }
 0x34b   : > { %3347 = vrcp.f32 %v1355_v17 }
 0x34e   : > { %v1192_v20 = vpop.permute.xlu0 %1191 }
 0x350   : > { %v3344_v18 = vpop.eup %3343 }
 0x351   : > { %v1022_v19 = vmul.f32 %v3344_v18, %v3336_v4 }
 0x353   : > { %3170 = vmatmul.mubr.msk.f32.vlgmr.msra.gmra.mxu1 %vm768_vm2, %v1022_v19  ;;  %v2984_v19 = vld [vmem:[%s3914_s7] ss:$0 sm:$0xff] }
 0x354   : > { %v3346_v21 = vpop.eup %3345  ;;  %3178 = vmatpush3.msra.mxu1 %v1192_v20  ;;  %3179 = vmatprep.mubr.msk.f32.mxu1 %vm3386_vm0, %v3385_v1  ;;  %v2996_v20 = vld [vmem:[%s3913_s6 + $0x58] sm:$0xff] }
 0x355   : > { %3187 = vmatprep.subr.mxu1 %v3385_v1  ;;  %v1190_v22 = vmul.f32 %v3346_v21, %v3338_v7  ;;  %v2995_v21 = vld [vmem:[%s3913_s6 + $0x50] sm:$0xff] }
 0x357   : > { %3180 = vmatmul.mubr.msk.f32.vlgmr.msra.gmra.mxu1 %vm768_vm2, %v1190_v22 }
 0x358   : > { %v3348_v24 = vpop.eup %3347  ;;  %3188 = vmatpush3.msra.mxu1 %v1359_v23  ;;  %3189 = vmatprep.mubr.msk.f32.mxu1 %vm3386_vm0, %v3385_v1 }
 0x359   : > { %v1357_v25 = vmul.f32 %v3348_v24, %v3340_v9  ;;  %3203 = vmatprep.subr.mxu1 %v3385_v1  ;;  %v2982_v9 = vld [vmem:[%s3919_s12] ss:$0 sm:$0xff] }
 0x35b   : > { %3190 = vmatmul.mubr.msk.f32.vlgmr.msra.gmra.mxu1 %vm768_vm2, %v1357_v25  ;;  %v2994_v25 = vld [vmem:[%s3913_s6 + $0x48] sm:$0xff] }
 0x35c   : > { %3211 = vmatprep.mubr.msk.f32.mxu1 %vm3386_vm0, %v3385_v1 }
 0x3ab   : > { %v928_v26 = vpop.f32.mrf.mxu1 }
 0x3ad   : > { %v3161_v27 = vpop.f32.mrf.mxu1 }
 0x3ae   : > { %v2993_v27 = vld [vmem:[%s3913_s6 + $0x40] sm:$0xff] }
 0x413   : > { %v1096_v32 = vpop.f32.mrf.mxu1 }
 0x414   : > { %1435 = vrot.lane.b32.xlu1 %v1096_v32, %s3924_s24 }
 0x415   : > { %v3171_v33 = vpop.f32.mrf.mxu1 }
 0x416   : > { %v1575_v33 = vld [vmem:[%s509_s22] sm:$0xff] }
 0x417   : > { %v1263_v34 = vpop.f32.mrf.mxu1  ;;  %vm1906_vm8 = vcmp.eq.s32.totalorder %v1575_v33, 0  ;;  %v3015_v33 = vld [vmem:[%s3913_s6 + $0x78] sm:$0xff] }
 0x418   : > { %1439 = vrot.lane.b32.xlu0 %v1263_v34, %s3923_s25 }
 0x419   : > { %v3181_v35 = vpop.f32.mrf.mxu1 }
 0x41b   : > { %v1430_v36 = vpop.f32.mrf.mxu1 }
 0x41c   : > { %1443 = vrot.lane.b32.xlu1 %v1430_v36, %s3922_s26 }
 0x41d   : > { %v3191_v37 = vpop.f32.mrf.mxu1 }
 0x486   : > { %v1436_v38 = vpop.permute.xlu1 %1435 }
 0x487   : > { %v1446_v40 = vsel %vm768_vm2, %v928_v26, %v1436_v38  ;;  %v2998_v38 = vld [vmem:[%s3914_s7 + $0x2] ss:$0 sm:$0xff] }
 0x48a   : > { %v1440_v39 = vpop.permute.xlu0 %1439 }
 0x48b   : > { %v1448_v41 = vsel %vm1447_vm4, %v1446_v40, %v1440_v39 }
 0x48e   : > { %v1444_v42 = vpop.permute.xlu1 %1443 }
 0x48f   : > { %v1450_v43 = vsel %vm1449_vm5, %v1448_v41, %v1444_v42 }
 0x490   : > { %3201 = vmatmul.mubr.msk.f32.vlgmr.msra.gmra.mxu0 %vm528_vm1, %v1450_v43 }
 0x491   : > { %3222 = vmatprep.mubr.msk.f32.mxu0 %vm3386_vm0, %v3385_v1  ;;  %3215 = vmatpush3.msra.mxu0 %v2989_v55 }
 0x492   : > { %3216 = vmatprep.subr.mxu0 %v3385_v1 }
 0x493   : > { %3217 = vmatpush3.msra.mxu0 %v2988_v56 }
 0x494   : > { %3218 = vmatprep.subr.mxu0 %v3385_v1 }
 0x495   : > { %3219 = vmatpush3.msra.mxu0 %v2987_v57 }
 0x496   : > { %3220 = vmatprep.subr.mxu0 %v3385_v1 }
 0x497   : > { %3221 = vmatpush3.msra.mxu0 %v2986_v60 }
 0x498   : > { %3223 = vmatmul.mubr.msk.f32.vlgmr.msra.gmra.mxu0 %vm528_vm1, %v3685_v61  ;;  %3236 = vmatprep.subr.mxu0 %v3385_v1 }
 0x499   : > { %3238 = vmatprep.mubr.msk.f32.mxu0 %vm3386_vm0, %v3385_v1 }
 0x550   : > { %v1533_v45 = vpop.f32.mrf.mxu0 }
 0x551   : > { %v1534_v46 = vadd.f32 %v2980_v44, %v1533_v45 }
 0x552   : > { %v3202_v47 = vpop.f32.mrf.mxu0 }
 0x553   : > { %v1537_v48 = vadd.f32 %v1534_v46, %v3502_v5  ;;  %v1579_v5 = vld [vmem:[%s3913_s6 + $0x18] sm:$0xff] }
 0x554   : > { %3204 = vmatpush3.msra.mxu1 %v1579_v5 }
 0x555   : > { %v1540_v49 = vsel %vm528_vm1, %v1537_v48, 0.0  ;;  %3205 = vmatprep.subr.mxu1 %v3385_v1 }
 0x556   : > { %1541 = vadd.xlane.f32.xlu0 %v1540_v49  ;;  %3206 = vmatpush3.msra.mxu1 %v1578_v58 }
 0x557   : > { %3207 = vmatprep.subr.mxu1 %v3385_v1 }
 0x558   : > { %3208 = vmatpush3.msra.mxu1 %v1577_v59  ;;  %v1742_v16 = vpop.f32.mrf.mxu0 }
 0x559   : > { %3209 = vmatprep.subr.mxu1 %v3385_v1  ;;  %v1743_v17 = vadd.f32 %v2991_v15, %v1742_v16 }
 0x55a   : > { %3210 = vmatpush3.msra.mxu1 %v1576_v62  ;;  %v3224_v18 = vpop.f32.mrf.mxu0 }
 0x55b   : > { %3225 = vmatprep.subr.mxu1 %v3385_v1  ;;  %3237 = vmatpush3.xpose.msk.msra.mxu0 %vm768_vm2, %v1743_v17 }
 0x55c   : > { %3246 = vmatprep.subr.mxu0 %v3385_v1 }
 0x56c   : > { %1994 = vrot.lane.b32.xlu0 %v1743_v17, %s3388_s19 }
 0x570   : > { %2162 = vrot.lane.b32.xlu0 %v1743_v17, %s3387_s18 }
 0x574   : > { %2329 = vrot.lane.b32.xlu0 %v1743_v17, %s3389_s20 }
 0x5df   : > { %v1542_v50 = vpop.xlane.xlu0 %1541 }
 0x5e0   : > { %v1544_v51 = vmul.f32 0.03125, %v1542_v50 }
 0x5e2   : > { %v1545_v52 = vsub.f32 %v1537_v48, %v1544_v51 }
 0x5e3   : > { %v1995_v26 = vpop.permute.xlu0 %1994 }
 0x5e4   : > { %v1546_v53 = vmul.f32 %v1545_v52, %v1545_v52  ;;  %v1557_v10 = vmul.f32 %v2982_v9, %v1545_v52 }
 0x5e6   : > { %v1547_v54 = vsel %vm528_vm1, %v1546_v53, 0.0 }
 0x5e7   : > { %1548 = vadd.xlane.f32.xlu1 %v1547_v54  ;;  %v2163_v28 = vpop.permute.xlu0 %2162 }
 0x5eb   : > { %v2330_v31 = vpop.permute.xlu0 %2329 }
 0x670   : > { %v1549_v63 = vpop.xlane.xlu1 %1548 }
 0x671   : > { %v1550_v0 = vmul.f32 0.03125, %v1549_v63 }
 0x673   : > { %v1558_v2 = vadd.f32 1e-12, %v1550_v0 }
 0x675   : > { %3349 = vrsqrt.f32 %v1558_v2  ;;  %vm1561_vm6 = vcmp.eq.f32.partialorder %v1558_v2, inf  ;;  %v1564_v6 = vand.u32 2147483648, %v1558_v2  ;;  %vm1563_vm7 = vcmp.eq.f32.partialorder %v1558_v2, 0.0 }
 0x682   : > { %v3350_v3 = vpop.eup %3349 }
 0x683   : > { %v1560_v4 = vmul.f32 %v3350_v3, %v1558_v2 }
 0x685   : > { %v1562_v7 = vsel %vm1561_vm6, %v1558_v2, %v1560_v4 }
 0x686   : > { %v1565_v8 = vsel %vm1563_vm7, %v1564_v6, %v1562_v7 }
 0x687   : > { %3351 = vrcp.f32 %v1565_v8 }
 0x694   : > { %v3352_v11 = vpop.eup %3351 }
 0x695   : > { %v1567_v13 = vmul.f32 %v3352_v11, %v1557_v10 }
 0x697   : > { %v3705_v14 = vadd.f32 %v2983_v12, %v1567_v13 }
 0x699   : > { %3212 = vmatmul.mubr.msk.f32.vlgmr.msra.gmra.mxu1 %vm528_vm1, %v3705_v14 }
 0x69a   : > { %3233 = vmatprep.mubr.msk.f32.mxu1 %vm3386_vm0, %v3385_v1  ;;  %3226 = vmatpush3.msra.mxu1 %v2996_v20 }
 0x69b   : > { %3227 = vmatprep.subr.mxu1 %v3385_v1 }
 0x69c   : > { %3228 = vmatpush3.msra.mxu1 %v2995_v21 }
 0x69d   : > { %3229 = vmatprep.subr.mxu1 %v3385_v1 }
 0x69e   : > { %3230 = vmatpush3.msra.mxu1 %v2994_v25 }
 0x69f   : > { %3231 = vmatprep.subr.mxu1 %v3385_v1 }
 0x6a0   : > { %3232 = vmatpush3.msra.mxu1 %v2993_v27 }
 0x6a1   : > { %3234 = vmatmul.mubr.msk.f32.vlgmr.msra.gmra.mxu1 %vm528_vm1, %v3685_v61  ;;  %3241 = vmatprep.subr.mxu1 %v3385_v1 }
 0x6a2   : > { %3243 = vmatprep.mubr.msk.f32.mxu1 %vm3386_vm0, %v3385_v1 }
 0x759   : > { %v1656_v22 = vpop.f32.mrf.mxu1 }
 0x75a   : > { %v1657_v23 = vadd.f32 %v2984_v19, %v1656_v22 }
 0x75b   : > { %v3213_v24 = vpop.f32.mrf.mxu1 }
 0x75c   : > { %1992 = vrot.lane.b32.xlu1 %v1657_v23, %s3388_s19  ;;  %3239 = vmatmul.mubr.msk.f32.vlgmr.msra.gmra.mxu0 %vm768_vm2, %v1657_v23 }
 0x75d   : > { %3247 = vmatpush3.xpose.msk.msra.mxu0 %vm768_vm2, %v1995_v26  ;;  %3248 = vmatprep.mubr.msk.f32.mxu0 %vm3386_vm0, %v3385_v1 }
 0x75e   : > { %3256 = vmatprep.subr.mxu0 %v3385_v1 }
 0x760   : > { %2160 = vrot.lane.b32.xlu1 %v1657_v23, %s3387_s18 }
 0x761   : > { %v1825_v40 = vpop.f32.mrf.mxu1 }
 0x762   : > { %v1826_v41 = vadd.f32 %v2998_v38, %v1825_v40 }
 0x763   : > { %v3235_v42 = vpop.f32.mrf.mxu1 }
 0x764   : > { %2327 = vrot.lane.b32.xlu1 %v1657_v23, %s3389_s20  ;;  %3242 = vmatpush3.msra.mxu1 %v1826_v41 }
 0x765   : > { %3251 = vmatprep.subr.mxu1 %v3385_v1 }
 0x7ce   : > { %v1993_v29 = vpop.permute.xlu1 %1992 }
 0x7cf   : > { %3249 = vmatmul.mubr.msk.f32.vlgmr.msra.gmra.mxu0 %vm768_vm2, %v1993_v29 }
 0x7d0   : > { %3257 = vmatpush3.xpose.msk.msra.mxu0 %vm768_vm2, %v2163_v28  ;;  %3258 = vmatprep.mubr.msk.f32.mxu0 %vm3386_vm0, %v3385_v1 }
 0x7d1   : > { %3266 = vmatprep.subr.mxu0 %v3385_v1 }
 0x7d2   : > { %v2161_v30 = vpop.permute.xlu1 %2160 }
 0x7d3   : > { %3259 = vmatmul.mubr.msk.f32.vlgmr.msra.gmra.mxu0 %vm768_vm2, %v2161_v30 }
 0x7d4   : > { %3267 = vmatpush3.xpose.msk.msra.mxu0 %vm768_vm2, %v2330_v31  ;;  %3268 = vmatprep.mubr.msk.f32.mxu0 %vm3386_vm0, %v3385_v1 }
 0x7d5   : > { %3276 = vmatprep.subr.mxu0 %v3385_v1 }
 0x7d6   : > { %v2328_v32 = vpop.permute.xlu1 %2327 }
 0x7d7   : > { %3269 = vmatmul.mubr.msk.f32.vlgmr.msra.gmra.mxu0 %vm768_vm2, %v2328_v32 }
 0x7d8   : > { %3284 = vmatprep.mubr.msk.f32.mxu0 %vm3386_vm0, %v3385_v1  ;;  %3277 = vmatpush3.msra.mxu0 %v3015_v33 }
 0x7d9   : > { %3278 = vmatprep.subr.mxu0 %v3385_v1 }
 0x81c   : > { %v1901_v34 = vpop.f32.mrf.mxu0 }
 0x81d   : > { %v1905_v35 = vmul.f32 0.35355338, %v1901_v34  ;;  %v3014_v34 = vld [vmem:[%s3913_s6 + $0x70] sm:$0xff] }
 0x81e   : > { %v3240_v36 = vpop.f32.mrf.mxu0  ;;  %3279 = vmatpush3.msra.mxu0 %v3014_v34 }
 0x81f   : > { %v1907_v37 = vsel %vm1906_vm8, -10000.0, %v1905_v35  ;;  %v3013_v35 = vld [vmem:[%s3913_s6 + $0x68] sm:$0xff]  ;;  %3280 = vmatprep.subr.mxu0 %v3385_v1  ;;  %v3012_v36 = vld [vmem:[%s3913_s6 + $0x60] sm:$0xff] }
 0x820   : > { %v1908_v39 = vsel %vm768_vm2, %v1907_v37, -inf  ;;  %3281 = vmatpush3.msra.mxu0 %v3013_v35 }
 0x821   : > { %1909 = vmax.xlane.f32.xlu0 %v1908_v39  ;;  %3282 = vmatprep.subr.mxu0 %v3385_v1 }
 0x822   : > { %3283 = vmatpush3.msra.mxu0 %v3012_v36 }
 0x823   : > { %3298 = vmatprep.subr.mxu0 %v3385_v1 }
 0x88f   : > { %v2066_v43 = vpop.f32.mrf.mxu0 }
 0x890   : > { %v2070_v44 = vmul.f32 0.35355338, %v2066_v43 }
 0x891   : > { %v3250_v45 = vpop.f32.mrf.mxu0 }
 0x892   : > { %v2071_v46 = vsel %vm1906_vm8, -10000.0, %v2070_v44 }
 0x893   : > { %v2234_v47 = vpop.f32.mrf.mxu0  ;;  %v2072_v48 = vsel %vm768_vm2, %v2071_v46, -inf }
 0x894   : > { %v2238_v49 = vmul.f32 0.35355338, %v2234_v47  ;;  %2073 = vmax.xlane.f32.xlu1 %v2072_v48 }
 0x895   : > { %v3260_v50 = vpop.f32.mrf.mxu0 }
 0x896   : > { %v2239_v51 = vsel %vm1906_vm8, -10000.0, %v2238_v49  ;;  %v3017_v49 = vld [vmem:[%s3914_s7 + $0x3] ss:$0 sm:$0xff] }
 0x897   : > { %v2401_v52 = vpop.f32.mrf.mxu0  ;;  %v2240_v53 = vsel %vm768_vm2, %v2239_v51, -inf }
 0x898   : > { %v2405_v54 = vmul.f32 0.35355338, %v2401_v52  ;;  %2241 = vmax.xlane.f32.xlu0 %v2240_v53 }
 0x899   : > { %v3270_v55 = vpop.f32.mrf.mxu0 }
 0x89a   : > { %v2406_v56 = vsel %vm1906_vm8, -10000.0, %v2405_v54 }
 0x89b   : > { %v2407_v5 = vsel %vm768_vm2, %v2406_v56, -inf }
 0x89c   : > { %2408 = vmax.xlane.f32.xlu0 %v2407_v5 }
 0x8a5   : > { %2084 = vrot.lane.b32.xlu1 %v1826_v41, %s3388_s19 }
 0x8aa   : > { %v1910_v57 = vpop.xlane.xlu0 %1909 }
 0x8ab   : > { %v1911_v58 = vsub.f32 %v1907_v37, %v1910_v57 }
 0x8ad   : > { %v1912_v59 = vmul.f32 1.442695, %v1911_v58 }
 0x8af   : > { %3353 = vpow2.f32 %v1912_v59  ;;  %v2637_v59 = vld [vmem:[%s3915_s8 + $0x18] sm:$0xff] }
 0x8bc   : > { %v3354_v60 = vpop.eup %3353 }
 0x8bd   : > { %v1914_v61 = vsel %vm768_vm2, %v3354_v60, 0.0 }
 0x8c9   : > { %1915 = vadd.xlane.f32.xlu1 %v1914_v61  ;;  %v2634_v61 = vld [vmem:[%s3915_s8] sm:$0xff] }
 0x91d   : > { %v2074_v62 = vpop.xlane.xlu1 %2073 }
 0x91e   : > { %v2075_v63 = vsub.f32 %v2071_v46, %v2074_v62  ;;  %v2726_v62 = vld [vmem:[%s3917_s10 + $0x38] sm:$0xff] }
 0x920   : > { %v2076_v0 = vmul.f32 1.442695, %v2075_v63  ;;  %v2725_v63 = vld [vmem:[%s3917_s10 + $0x30] sm:$0xff] }
 0x921   : > { %v2242_v2 = vpop.xlane.xlu0 %2241  ;;  %v2085_v16 = vpop.permute.xlu1 %2084 }
 0x922   : > { %3355 = vpow2.f32 %v2076_v0  ;;  %v2243_v3 = vsub.f32 %v2239_v51, %v2242_v2  ;;  %v2724_v0 = vld [vmem:[%s3917_s10 + $0x28] sm:$0xff]  ;;  %v2723_v2 = vld [vmem:[%s3917_s10 + $0x20] sm:$0xff] }
 0x924   : > { %v2244_v4 = vmul.f32 1.442695, %v2243_v3  ;;  %v2722_v3 = vld [vmem:[%s3917_s10 + $0x18] sm:$0xff] }
 0x925   : > { %v2409_v6 = vpop.xlane.xlu0 %2408 }
 0x926   : > { %3357 = vpow2.f32 %v2244_v4  ;;  %v2410_v7 = vsub.f32 %v2406_v56, %v2409_v6 }
 0x928   : > { %v2411_v8 = vmul.f32 1.442695, %v2410_v7 }
 0x92a   : > { %3359 = vpow2.f32 %v2411_v8 }
 0x92f   : > { %v3356_v9 = vpop.eup %3355 }
 0x930   : > { %v2078_v10 = vsel %vm768_vm2, %v3356_v9, 0.0 }
 0x931   : > { %2079 = vadd.xlane.f32.xlu0 %v2078_v10 }
 0x933   : > { %v3358_v11 = vpop.eup %3357 }
 0x934   : > { %v2246_v12 = vsel %vm768_vm2, %v3358_v11, 0.0 }
 0x935   : > { %2247 = vadd.xlane.f32.xlu1 %v2246_v12 }
 0x937   : > { %v3360_v13 = vpop.eup %3359 }
 0x938   : > { %v2413_v15 = vsel %vm768_vm2, %v3360_v13, 0.0 }
 0x939   : > { %2414 = vadd.xlane.f32.xlu0 %v2413_v15 }
 0x946   : > { %2418 = vrot.lane.b32.xlu1 %v1826_v41, %s3389_s20 }
 0x94f   : > { %2251 = vrot.lane.b32.xlu0 %v1826_v41, %s3387_s18 }
 0x952   : > { %v1916_v17 = vpop.xlane.xlu1 %1915 }
 0x953   : > { %3361 = vrcp.f32 %v1916_v17  ;;  %v3022_v17 = vld [vmem:[%s3920_s13 + $0x1] ss:$0 sm:$0xff] }
 0x960   : > { %v3362_v18 = vpop.eup %3361 }
 0x961   : > { %v1918_v19 = vmul.f32 %v3362_v18, %v3354_v60  ;;  %v2636_v60 = vld [vmem:[%s3915_s8 + $0x10] sm:$0xff] }
 0x963   : > { %3244 = vmatmul.mubr.msk.f32.vlgmr.msra.gmra.mxu1 %vm768_vm2, %v1918_v19 }
 0x964   : > { %3252 = vmatpush3.msra.mxu1 %v2085_v16  ;;  %3253 = vmatprep.mubr.msk.f32.mxu1 %vm3386_vm0, %v3385_v1 }
 0x965   : > { %3261 = vmatprep.subr.mxu1 %v3385_v1 }
 0x9ba   : > { %v2080_v20 = vpop.xlane.xlu0 %2079 }
 0x9bb   : > { %3363 = vrcp.f32 %v2080_v20  ;;  %v2721_v20 = vld [vmem:[%s3917_s10 + $0x10] sm:$0xff] }
 0x9be   : > { %v2248_v21 = vpop.xlane.xlu1 %2247 }
 0x9bf   : > { %3365 = vrcp.f32 %v2248_v21  ;;  %v2720_v21 = vld [vmem:[%s3917_s10 + $0x8] sm:$0xff] }
 0x9c2   : > { %v2415_v22 = vpop.xlane.xlu0 %2414  ;;  %v2419_v28 = vpop.permute.xlu1 %2418 }
 0x9c3   : > { %3367 = vrcp.f32 %v2415_v22  ;;  %v2719_v22 = vld [vmem:[%s3917_s10] sm:$0xff] }
 0x9c6   : > { %v2252_v25 = vpop.permute.xlu0 %2251 }
 0x9c8   : > { %v3364_v23 = vpop.eup %3363 }
 0x9c9   : > { %v2082_v24 = vmul.f32 %v3364_v23, %v3356_v9  ;;  %v3023_v23 = vld [vmem:[%s3916_s9] ss:$0 sm:$0xff] }
 0x9cb   : > { %3254 = vmatmul.mubr.msk.f32.vlgmr.msra.gmra.mxu1 %vm768_vm2, %v2082_v24 }
 0x9cc   : > { %v3366_v26 = vpop.eup %3365  ;;  %3262 = vmatpush3.msra.mxu1 %v2252_v25  ;;  %3263 = vmatprep.mubr.msk.f32.mxu1 %vm3386_vm0, %v3385_v1 }
 0x9cd   : > { %3271 = vmatprep.subr.mxu1 %v3385_v1  ;;  %v2250_v27 = vmul.f32 %v3366_v26, %v3358_v11 }
 0x9cf   : > { %3264 = vmatmul.mubr.msk.f32.vlgmr.msra.gmra.mxu1 %vm768_vm2, %v2250_v27 }
 0x9d0   : > { %v3368_v29 = vpop.eup %3367  ;;  %3272 = vmatpush3.msra.mxu1 %v2419_v28  ;;  %3273 = vmatprep.mubr.msk.f32.mxu1 %vm3386_vm0, %v3385_v1  ;;  %v3025_v28 = vld [vmem:[%s3918_s11] ss:$0 sm:$0xff] }
 0x9d1   : > { %v2417_v30 = vmul.f32 %v3368_v29, %v3360_v13  ;;  %3287 = vmatprep.subr.mxu1 %v3385_v1  ;;  %v3021_v13 = vld [vmem:[%s3919_s12 + $0x1] ss:$0 sm:$0xff] }
 0x9d3   : > { %3274 = vmatmul.mubr.msk.f32.vlgmr.msra.gmra.mxu1 %vm768_vm2, %v2417_v30 }
 0x9d4   : > { %3295 = vmatprep.mubr.msk.f32.mxu1 %vm3386_vm0, %v3385_v1  ;;  %3288 = vmatpush3.msra.mxu1 %v2637_v59 }
 0x9d5   : > { %3289 = vmatprep.subr.mxu1 %v3385_v1 }
 0x9d6   : > { %3290 = vmatpush3.msra.mxu1 %v2636_v60 }
 0x9d7   : > { %3291 = vmatprep.subr.mxu1 %v3385_v1 }
 0xa23   : > { %v1988_v31 = vpop.f32.mrf.mxu1 }
 0xa25   : > { %v3245_v32 = vpop.f32.mrf.mxu1 }
 0xa8b   : > { %v2156_v37 = vpop.f32.mrf.mxu1 }
 0xa8c   : > { %2495 = vrot.lane.b32.xlu1 %v2156_v37, %s3925_s15 }
 0xa8d   : > { %v3255_v38 = vpop.f32.mrf.mxu1 }
 0xa8f   : > { %v2323_v39 = vpop.f32.mrf.mxu1 }
 0xa90   : > { %2499 = vrot.lane.b32.xlu0 %v2323_v39, %s3926_s16  ;;  %s513_s16 = scalar_lea.vmem %s3921_s14, %s3492_s21 }
 0xa91   : > { %v3265_v40 = vpop.f32.mrf.mxu1 }
 0xa93   : > { %v2490_v41 = vpop.f32.mrf.mxu1 }
 0xa94   : > { %2503 = vrot.lane.b32.xlu1 %v2490_v41, %s3927_s17 }
 0xa95   : > { %v3275_v42 = vpop.f32.mrf.mxu1 }
 0xafe   : > { %v2496_v43 = vpop.permute.xlu1 %2495 }
 0xaff   : > { %v2506_v45 = vsel %vm768_vm2, %v1988_v31, %v2496_v43 }
 0xb02   : > { %v2500_v44 = vpop.permute.xlu0 %2499 }
 0xb03   : > { %v2507_v46 = vsel %vm1447_vm4, %v2506_v45, %v2500_v44 }
 0xb06   : > { %v2504_v47 = vpop.permute.xlu1 %2503 }
 0xb07   : > { %v2508_v48 = vsel %vm1449_vm5, %v2507_v46, %v2504_v47  ;;  %v3029_v46 = vld [vmem:[%s3919_s12 + $0x2] ss:$0 sm:$0xff] }
 0xb08   : > { %3285 = vmatmul.mubr.msk.f32.vlgmr.msra.gmra.mxu0 %vm528_vm1, %v2508_v48 }
 0xb09   : > { %3314 = vmatprep.mubr.msk.f32.mxu0 %vm3386_vm0, %v3385_v1  ;;  %3299 = vmatpush3.msra.mxu0 %v2726_v62 }
 0xb0a   : > { %3300 = vmatprep.subr.mxu0 %v3385_v1 }
 0xb0b   : > { %3301 = vmatpush3.msra.mxu0 %v2725_v63 }
 0xb0c   : > { %3302 = vmatprep.subr.mxu0 %v3385_v1 }
 0xb0d   : > { %3303 = vmatpush3.msra.mxu0 %v2724_v0 }
 0xb0e   : > { %3304 = vmatprep.subr.mxu0 %v3385_v1 }
 0xb0f   : > { %3305 = vmatpush3.msra.mxu0 %v2723_v2 }
 0xb10   : > { %3306 = vmatprep.subr.mxu0 %v3385_v1 }
 0xb11   : > { %3307 = vmatpush3.msra.mxu0 %v2722_v3 }
 0xb12   : > { %3308 = vmatprep.subr.mxu0 %v3385_v1 }
 0xb13   : > { %3309 = vmatpush3.msra.mxu0 %v2721_v20 }
 0xb14   : > { %3310 = vmatprep.subr.mxu0 %v3385_v1 }
 0xb15   : > { %3311 = vmatpush3.msra.mxu0 %v2720_v21 }
 0xb16   : > { %3312 = vmatprep.subr.mxu0 %v3385_v1 }
 0xb17   : > { %3313 = vmatpush3.msra.mxu0 %v2719_v22 }
 0xbc8   : > { %v2591_v50 = vpop.f32.mrf.mxu0 }
 0xbc9   : > { %v2592_v51 = vadd.f32 %v3017_v49, %v2591_v50  ;;  %v3030_v49 = vld [vmem:[%s3920_s13 + $0x2] ss:$0 sm:$0xff] }
 0xbca   : > { %v3286_v52 = vpop.f32.mrf.mxu0 }
 0xbcb   : > { %v2595_v53 = vadd.f32 %v2592_v51, %v3705_v14  ;;  %v2635_v14 = vld [vmem:[%s3915_s8 + $0x8] sm:$0xff] }
 0xbcc   : > { %3292 = vmatpush3.msra.mxu1 %v2635_v14 }
 0xbcd   : > { %v2600_v54 = vsel %vm528_vm1, %v2595_v53, 0.0  ;;  %3293 = vmatprep.subr.mxu1 %v3385_v1 }
 0xbce   : > { %2601 = vadd.xlane.f32.xlu0 %v2600_v54  ;;  %3294 = vmatpush3.msra.mxu1 %v2634_v61 }
 0xc57   : > { %v2602_v55 = vpop.xlane.xlu0 %2601 }
 0xc58   : > { %v2603_v56 = vmul.f32 0.03125, %v2602_v55 }
 0xc5a   : > { %v2604_v5 = vsub.f32 %v2595_v53, %v2603_v56 }
 0xc5c   : > { %v2605_v57 = vmul.f32 %v2604_v5, %v2604_v5  ;;  %v2616_v15 = vmul.f32 %v3021_v13, %v2604_v5 }
 0xc5e   : > { %v2606_v58 = vsel %vm528_vm1, %v2605_v57, 0.0 }
 0xc5f   : > { %2607 = vadd.xlane.f32.xlu1 %v2606_v58 }
 0xce8   : > { %v2608_v4 = vpop.xlane.xlu1 %2607 }
 0xce9   : > { %v2609_v6 = vmul.f32 0.03125, %v2608_v4 }
 0xceb   : > { %v2617_v7 = vadd.f32 1e-12, %v2609_v6 }
 0xced   : > { %3369 = vrsqrt.f32 %v2617_v7  ;;  %vm2620_vm9 = vcmp.eq.f32.partialorder %v2617_v7, inf  ;;  %v2623_v10 = vand.u32 2147483648, %v2617_v7  ;;  %vm2622_vm10 = vcmp.eq.f32.partialorder %v2617_v7, 0.0 }
 0xcfa   : > { %v3370_v8 = vpop.eup %3369 }
 0xcfb   : > { %v2619_v9 = vmul.f32 %v3370_v8, %v2617_v7 }
 0xcfd   : > { %v2621_v11 = vsel %vm2620_vm9, %v2617_v7, %v2619_v9 }
 0xcfe   : > { %v2624_v12 = vsel %vm2622_vm10, %v2623_v10, %v2621_v11 }
 0xcff   : > { %3371 = vrcp.f32 %v2624_v12 }
 0xd0c   : > { %v3372_v16 = vpop.eup %3371 }
 0xd0d   : > { %v2626_v18 = vmul.f32 %v3372_v16, %v2616_v15 }
 0xd0f   : > { %v2633_v19 = vadd.f32 %v3022_v17, %v2626_v18 }
 0xd11   : > { %3296 = vmatmul.mubr.msk.f32.vlgmr.msra.gmra.mxu1 %vm528_vm1, %v2633_v19 }
 0xdd1   : > { %v2714_v24 = vpop.f32.mrf.mxu1 }
 0xdd2   : > { %v2715_v25 = vadd.f32 %v3023_v23, %v2714_v24 }
 0xdd3   : > { %v3297_v26 = vpop.f32.mrf.mxu1 }
 0xdd4   : > { %v2718_v27 = vmax.f32 %v2715_v25, 0.0 }
 0xdd6   : > { %3315 = vmatmul.mubr.msk.f32.vlgmr.msra.gmra.mxu0 %vm2734_vm11, %v2718_v27 }
 0xe96   : > { %v2804_v29 = vpop.f32.mrf.mxu0 }
 0xe97   : > { %v2805_v30 = vadd.f32 %v3025_v28, %v2804_v29 }
 0xe98   : > { %v3316_v31 = vpop.f32.mrf.mxu0 }
 0xe99   : > { %v2808_v32 = vadd.f32 %v2805_v30, %v2633_v19 }
 0xe9b   : > { %v2813_v1 = vsel %vm528_vm1, %v2808_v32, 0.0 }
 0xe9c   : > { %2814 = vadd.xlane.f32.xlu0 %v2813_v1 }
 0xf25   : > { %v2815_v33 = vpop.xlane.xlu0 %2814 }
 0xf26   : > { %v2816_v34 = vmul.f32 0.03125, %v2815_v33 }
 0xf28   : > { %v2817_v35 = vsub.f32 %v2808_v32, %v2816_v34 }
 0xf2a   : > { %v2818_v36 = vmul.f32 %v2817_v35, %v2817_v35  ;;  %v2829_v47 = vmul.f32 %v3029_v46, %v2817_v35 }
 0xf2c   : > { %v2819_v37 = vsel %vm528_vm1, %v2818_v36, 0.0 }
 0xf2d   : > { %2820 = vadd.xlane.f32.xlu0 %v2819_v37 }
 0xfb6   : > { %v2821_v38 = vpop.xlane.xlu0 %2820 }
 0xfb7   : > { %v2822_v39 = vmul.f32 0.03125, %v2821_v38 }
 0xfb9   : > { %v2830_v40 = vadd.f32 1e-12, %v2822_v39 }
 0xfbb   : > { %3373 = vrsqrt.f32 %v2830_v40  ;;  %vm2833_vm12 = vcmp.eq.f32.partialorder %v2830_v40, inf  ;;  %v2836_v43 = vand.u32 2147483648, %v2830_v40  ;;  %vm2835_vm13 = vcmp.eq.f32.partialorder %v2830_v40, 0.0 }
 0xfc8   : > { %v3374_v41 = vpop.eup %3373 }
 0xfc9   : > { %v2832_v42 = vmul.f32 %v3374_v41, %v2830_v40 }
 0xfcb   : > { %v2834_v44 = vsel %vm2833_vm12, %v2830_v40, %v2832_v42 }
 0xfcc   : > { %v2837_v45 = vsel %vm2835_vm13, %v2836_v43, %v2834_v44 }
 0xfcd   : > { %3375 = vrcp.f32 %v2837_v45 }
 0xfda   : > { %v3376_v48 = vpop.eup %3375 }
 0xfdb   : > { %v2839_v50 = vmul.f32 %v3376_v48, %v2829_v47 }
 0xfdd   : > { %v2846_v51 = vadd.f32 %v3030_v49, %v2839_v50 }
 0xfdf   : > { %2847 = vst.msk [vmem:[%s513_s16] sm:$0xff] %vm528_vm1, %v2846_v51 }
 0xfe0 PF: > { %s24_s29 = sadd.s32 1, %s3383_s29  }
 0xfe1   : > { %p21_p4 = scmp.ge.s32.totalorder %s24_s29, 4  }
 0xfe3   :  { %23 = sbr.rel (!%p21_p4) target bundleno = 1 (0x1), region = 131 }

</bundles_post_ra>
